<compile_context>
chip_gen: v7x
topology: tpu7x:2x2x1
jax: 0.10.0
libtpu: 0.0.40
codegen_flags: <defaults>
</compile_context>

<pallas_src>
import math
import functools

import jax
import jax.numpy as jnp
from jax.experimental import pallas as pl
from jax.experimental.pallas import tpu as pltpu


TILE_N = 1024                     # lane (pixel) tile target, multiple of 128
_VMEM_LIMIT = 32 * 1024 * 1024    # safe on v5e/v6e (128 MiB phys) and v7x (64 MiB phys)


def _round_up(x, m):
    return (x + m - 1) // m * m


def _cparams():
    return pltpu.CompilerParams(dimension_semantics=("parallel",),
                                vmem_limit_bytes=_VMEM_LIMIT)


def _tiles(mp_raw, hb):
    """Lane tile tn (multiple of the halo block hb>=128) and padded pixel count MpT."""
    m = _round_up(mp_raw, 128)
    nt = max(1, -(-m // TILE_N))
    if nt == 1 and m > 128:
        nt = 2                     # keep grid >= 2 so ("parallel",) can use both v7x TCs
    tn = max(_round_up(-(-m // nt), hb), hb)
    return tn, _round_up(m, tn)


def _halo_specs(c, tn, hb, nt):
    """prev-halo / current / next-halo BlockSpecs for a shifted-window conv input."""
    r = tn // hb
    last = nt * r - 1
    prev = pl.BlockSpec((c, hb), lambda i: (0, jnp.maximum(i * r - 1, 0)))
    cur = pl.BlockSpec((c, tn), lambda i: (0, i))
    nxt = pl.BlockSpec((c, hb), lambda i: (0, jnp.minimum((i + 1) * r, last)))
    return prev, cur, nxt


# ---------------------------------------------------------------------------
# Pallas kernels
# ---------------------------------------------------------------------------

def _conv3x3_kernel(xm_ref, xc_ref, xp_ref, w_ref, b_ref, mk_ref, *rest,
                    wp, halo, has_res):
    """In-kernel shifted-window 3x3 conv: out = mask * (sum_k W_k @ shift_k(x) + b [+res])."""
    if has_res:
        r_ref, o_ref = rest
    else:
        (o_ref,) = rest
    cin = xc_ref.shape[0]
    tn = xc_ref.shape[1]
    hb = xm_ref.shape[1]
    # (Cin, tn + 2*halo) window assembled in VMEM from the halo blocks + current tile.
    win = jnp.concatenate(
        [xm_ref[:, hb - halo:], xc_ref[...], xp_ref[:, :halo]], axis=1)
    acc = None
    for k in range(9):
        s = (k // 3 - 1) * wp + (k % 3 - 1)           # flat-pixel shift of tap k
        xs = win[:, halo + s: halo + s + tn]
        t = jnp.dot(w_ref[:, k * cin:(k + 1) * cin], xs,
                    preferred_element_type=jnp.float32)
        acc = t if acc is None else acc + t
    acc = acc + b_ref[...]
    if has_res:
        acc = acc + r_ref[...].astype(jnp.float32)
    o_ref[...] = (acc * mk_ref[...]).astype(o_ref.dtype)


def _offset_conv_kernel(xm, xc, xp, dm, dc, dp, wx_ref, wd_ref, b_ref,
                        dy_ref, dx_ref, ms_ref, *, wp, halo):
    """3x3 conv on concat(x, d) as two accumulated shifted-window conv sums.
    Outputs dy, dx (f32) and the sigmoid-activated modulation mask."""
    c = xc.shape[0]
    tn = xc.shape[1]
    hb = xm.shape[1]
    xwin = jnp.concatenate([xm[:, hb - halo:], xc[...], xp[:, :halo]], axis=1)
    dwin = jnp.concatenate([dm[:, hb - halo:], dc[...], dp[:, :halo]], axis=1)
    acc = None
    for k in range(9):
        s = (k // 3 - 1) * wp + (k % 3 - 1)
        t = (jnp.dot(wx_ref[:, k * c:(k + 1) * c], xwin[:, halo + s: halo + s + tn],
                     preferred_element_type=jnp.float32)
             + jnp.dot(wd_ref[:, k * c:(k + 1) * c], dwin[:, halo + s: halo + s + tn],
                       preferred_element_type=jnp.float32))
        acc = t if acc is None else acc + t
    acc = acc + b_ref[...]                           # (27, tn)
    dy_ref[...] = acc[0:9]
    dx_ref[...] = acc[9:18]
    ms_ref[...] = jax.nn.sigmoid(acc[18:27])


def _dgm_kernel(x_ref, d_ref, p_ref, mk_ref, wa_ref, wgb2_ref, wd_ref, bd_ref,
                o_ref, *, c, act):
    """Fused DGM: SFT (gamma/beta) + deformable-conv matmul + epilogue, one bf16 store."""
    # SFT: first layers of both branches stacked into one (2C, C) matmul.
    h = jnp.dot(wa_ref[...], d_ref[...], preferred_element_type=jnp.float32)      # (2C, tn)
    h = jnp.where(h > 0, h, 0.1 * h)                                               # LeakyReLU(0.1)
    # Second layers merged into one block-diagonal (2C, 2C) matmul.
    gb = jnp.dot(wgb2_ref[...], h.astype(jnp.bfloat16),
                 preferred_element_type=jnp.float32)                               # (2C, tn)
    gamma = gb[:c]
    beta = gb[c:]
    # Modulated deformable conv: one K = 9*C dot on pre-gathered bf16 patches.
    dcn = jnp.dot(wd_ref[...], p_ref[...],
                  preferred_element_type=jnp.float32) + bd_ref[...]                # (C, tn)
    x = x_ref[...].astype(jnp.float32)
    out = x * (gamma + 1.0) + (beta + dcn)           # sft + dcn + input_feat
    if act == "relu":
        out = jnp.maximum(out, 0.0)
    o_ref[...] = (out * mk_ref[...]).astype(o_ref.dtype)


# ---------------------------------------------------------------------------
# Wrappers
# ---------------------------------------------------------------------------

def conv3x3(x, w_oihw, bias, mask, geom, residual=None):
    cout, cin = w_oihw.shape[0], w_oihw.shape[1]
    tn, nt, hb, wp, halo, mpt = (geom["tn"], geom["nt"], geom["hb"],
                                 geom["Wp"], geom["halo"], geom["MpT"])
    w2 = jnp.transpose(w_oihw, (0, 2, 3, 1)).reshape(cout, 9 * cin).astype(jnp.bfloat16)
    b2 = bias.reshape(cout, 1).astype(jnp.float32)
    prev, cur, nxt = _halo_specs(cin, tn, hb, nt)
    in_specs = [prev, cur, nxt,
                pl.BlockSpec((cout, 9 * cin), lambda i: (0, 0)),
                pl.BlockSpec((cout, 1), lambda i: (0, 0)),
                pl.BlockSpec((1, tn), lambda i: (0, i))]
    args = [x, x, x, w2, b2, mask]
    if residual is not None:
        in_specs.append(pl.BlockSpec((cout, tn), lambda i: (0, i)))
        args.append(residual)
    kern = functools.partial(_conv3x3_kernel, wp=wp, halo=halo,
                             has_res=residual is not None)
    return pl.pallas_call(
        kern,
        out_shape=jax.ShapeDtypeStruct((cout, mpt), jnp.bfloat16),
        grid=(nt,),
        in_specs=in_specs,
        out_specs=pl.BlockSpec((cout, tn), lambda i: (0, i)),
        compiler_params=_cparams(),
    )(*args)


def offset_conv(x, d, dcn_p, geom):
    c = x.shape[0]
    tn, nt, hb, wp, halo, mpt = (geom["tn"], geom["nt"], geom["hb"],
                                 geom["Wp"], geom["halo"], geom["MpT"])
    off_w = dcn_p["off_w"]                           # (27, 2C, 3, 3)
    wx = jnp.transpose(off_w[:, :c], (0, 2, 3, 1)).reshape(27, 9 * c).astype(jnp.bfloat16)
    wd = jnp.transpose(off_w[:, c:], (0, 2, 3, 1)).reshape(27, 9 * c).astype(jnp.bfloat16)
    b2 = dcn_p["off_b"].reshape(27, 1).astype(jnp.float32)
    xprev, xcur, xnxt = _halo_specs(c, tn, hb, nt)
    dprev, dcur, dnxt = _halo_specs(c, tn, hb, nt)
    kern = functools.partial(_offset_conv_kernel, wp=wp, halo=halo)
    shp = jax.ShapeDtypeStruct((9, mpt), jnp.float32)
    return pl.pallas_call(
        kern,
        out_shape=(shp, shp, shp),
        grid=(nt,),
        in_specs=[xprev, xcur, xnxt, dprev, dcur, dnxt,
                  pl.BlockSpec((27, 9 * c), lambda i: (0, 0)),
                  pl.BlockSpec((27, 9 * c), lambda i: (0, 0)),
                  pl.BlockSpec((27, 1), lambda i: (0, 0))],
        out_specs=(pl.BlockSpec((9, tn), lambda i: (0, i)),
                   pl.BlockSpec((9, tn), lambda i: (0, i)),
                   pl.BlockSpec((9, tn), lambda i: (0, i))),
        compiler_params=_cparams(),
    )(x, x, x, d, d, d, wx, wd, b2)


def fused_dgm(x, d, patches, mask, p, geom, act):
    c = x.shape[0]
    tn, nt, mpt = geom["tn"], geom["nt"], geom["MpT"]
    sft = p["sft"]
    wa = jnp.concatenate([sft["g1"], sft["b1"]], axis=0).astype(jnp.bfloat16)      # (2C, C)
    z = jnp.zeros((c, c), jnp.float32)
    wgb2 = jnp.concatenate(
        [jnp.concatenate([sft["g2"], z], axis=1),
         jnp.concatenate([z, sft["b2"]], axis=1)], axis=0).astype(jnp.bfloat16)    # (2C, 2C)
    wd = p["dcn"]["w"].reshape(c, 9 * c).astype(jnp.bfloat16)                      # (C, 9C)
    bd = p["dcn"]["b"].reshape(c, 1).astype(jnp.float32)
    kern = functools.partial(_dgm_kernel, c=c, act=act)
    return pl.pallas_call(
        kern,
        out_shape=jax.ShapeDtypeStruct((c, mpt), jnp.bfloat16),
        grid=(nt,),
        in_specs=[pl.BlockSpec((c, tn), lambda i: (0, i)),
                  pl.BlockSpec((c, tn), lambda i: (0, i)),
                  pl.BlockSpec((9 * c, tn), lambda i: (0, i)),
                  pl.BlockSpec((1, tn), lambda i: (0, i)),
                  pl.BlockSpec((2 * c, c), lambda i: (0, 0)),
                  pl.BlockSpec((2 * c, 2 * c), lambda i: (0, 0)),
                  pl.BlockSpec((c, 9 * c), lambda i: (0, 0)),
                  pl.BlockSpec((c, 1), lambda i: (0, 0))],
        out_specs=pl.BlockSpec((c, tn), lambda i: (0, i)),
        compiler_params=_cparams(),
    )(x, d, patches, mask, wa, wgb2, wd, bd)


# ---------------------------------------------------------------------------
# JAX glue: deformable bilinear sampling (XLA gather) at the padded flat width
# ---------------------------------------------------------------------------

def deform_sample(x_flat, dy, dx, ms, geom):
    """Bilinear sampling at (pixel + tap + learned offset) with the modulation mask
    folded in; returns bf16 patches (C*9, MpT).  The zero halo ring of the padded
    image implements the zero-outside-image boundary (clip lands on zeros)."""
    # TODO(synk): the data-dependent 2D gather has no clean Pallas TPU equivalent;
    # it stays in plain JAX (XLA gather).
    c = x_flat.shape[0]
    B, Hp, Wp, Mp, MpT = geom["B"], geom["Hp"], geom["Wp"], geom["Mp"], geom["MpT"]
    x_img = x_flat[:, :Mp].reshape(c, B, Hp, Wp)
    p = jnp.arange(MpT, dtype=jnp.int32)
    bidx = jnp.minimum(p // (Hp * Wp), B - 1)
    r = p % (Hp * Wp)
    h = (r // Wp).astype(jnp.float32)
    w = (r % Wp).astype(jnp.float32)
    ky = jnp.repeat(jnp.arange(-1.0, 2.0), 3).reshape(9, 1)
    kx = jnp.tile(jnp.arange(-1.0, 2.0), 3).reshape(9, 1)
    py = h[None, :] + ky + dy                                  # (9, MpT)
    px = w[None, :] + kx + dx
    y0 = jnp.floor(py)
    x0 = jnp.floor(px)
    wy1, wx1 = py - y0, px - x0
    wy0, wx0 = 1.0 - wy1, 1.0 - wx1
    bg = bidx[None, :]

    def gather(yi, xi):
        yc = jnp.clip(yi, 0, Hp - 1).astype(jnp.int32)
        xc = jnp.clip(xi, 0, Wp - 1).astype(jnp.int32)
        return x_img[:, bg, yc, xc].astype(jnp.float32)        # (C, 9, MpT)

    val = (gather(y0, x0) * (wy0 * wx0)[None]
           + gather(y0, x0 + 1) * (wy0 * wx1)[None]
           + gather(y0 + 1, x0) * (wy1 * wx0)[None]
           + gather(y0 + 1, x0 + 1) * (wy1 * wx1)[None])
    val = val * ms[None]                                       # modulation mask
    return val.reshape(c * 9, MpT).astype(jnp.bfloat16)


# ---------------------------------------------------------------------------
# Module forwards (DGM -> DGB -> DGG), all in padded (C, MpT) bf16 layout
# ---------------------------------------------------------------------------

def dgm_forward(x, d, p, mask, geom, act):
    dy, dx, ms = offset_conv(x, d, p["dcn"], geom)             # (9, MpT) f32 each
    patches = deform_sample(x, dy, dx, ms, geom)               # (C*9, MpT) bf16
    return fused_dgm(x, d, patches, mask, p, geom, act)


def dgb_forward(feat, d, bp, mask, geom):
    out = dgm_forward(feat, d, bp["dgm1"], mask, geom, act="relu")
    out = conv3x3(out, bp["conv1_w"], bp["conv1_b"], mask, geom)
    out = dgm_forward(out, d, bp["dgm2"], mask, geom, act="relu")
    out = conv3x3(out, bp["conv2_w"], bp["conv2_b"], mask, geom, residual=feat)
    return out


def _interior_mask(geom):
    B, H, W, Hp, Wp, Mp, MpT = (geom["B"], geom["H"], geom["W"], geom["Hp"],
                                geom["Wp"], geom["Mp"], geom["MpT"])
    m = jnp.zeros((B, Hp, Wp), jnp.float32).at[:, 1:H + 1, 1:W + 1].set(1.0)
    m = m.reshape(1, Mp)
    if MpT > Mp:
        m = jnp.pad(m, ((0, 0), (0, MpT - Mp)))
    return m


def dgg_forward(params, input_feat, degrad_repr):
    """input_feat, degrad_repr: (B, C, H, W) float32 (NCHW, as in PyTorch)."""
    b, c, h, w = input_feat.shape
    hp, wp = h + 2, w + 2
    mp = b * hp * wp
    halo = wp + 1
    hb = _round_up(halo, 128)
    tn, mpt = _tiles(mp, hb)
    nt = mpt // tn
    geom = dict(B=b, C=c, H=h, W=w, Hp=hp, Wp=wp, Mp=mp, MpT=mpt,
                tn=tn, nt=nt, hb=hb, halo=halo)

    def prep(t):   # pad spatially once, transpose to (C, B*Hp*Wp), pad to MpT, bf16
        tp = jnp.pad(t, ((0, 0), (0, 0), (1, 1), (1, 1)))
        tf = jnp.transpose(tp, (1, 0, 2, 3)).reshape(c, mp)
        if mpt > mp:
            tf = jnp.pad(tf, ((0, 0), (0, mpt - mp)))
        return tf.astype(jnp.bfloat16)

    x_flat = prep(input_feat)
    d_flat = prep(degrad_repr)                 # degradation reused by every DGM: cast once
    mask = _interior_mask(geom)

    feat = x_flat
    for bp in params["blocks"]:
        feat = dgb_forward(feat, d_flat, bp, mask, geom)
    out = conv3x3(feat, params["final_w"], params["final_b"], mask, geom,
                  residual=x_flat)             # x (clone) + final conv, fused residual
    out_img = out[:, :mp].reshape(c, b, hp, wp)[:, :, 1:h + 1, 1:w + 1]
    return jnp.transpose(out_img, (1, 0, 2, 3)).astype(jnp.float32)


# ---------------------------------------------------------------------------
# Deterministic parameter init (PyTorch-like fan_in uniform bounds)
# ---------------------------------------------------------------------------

def _uniform(key, shape, fan_in):
    bound = 1.0 / math.sqrt(fan_in)
    return jax.random.uniform(key, shape, jnp.float32, -bound, bound)


def init_dgm(key, feat):
    ks = jax.random.split(key, 7)
    sft = {
        "g1": _uniform(ks[0], (feat, feat), feat),
        "g2": _uniform(ks[1], (feat, feat), feat),
        "b1": _uniform(ks[2], (feat, feat), feat),
        "b2": _uniform(ks[3], (feat, feat), feat),
    }
    # NOTE: the real DCN zero-inits its offset/mask conv; small random values are used
    # here so the bilinear-sampling path is actually exercised.
    dcn = {
        "off_w": 0.01 * jax.random.normal(ks[4], (27, 2 * feat, 3, 3), jnp.float32),
        "off_b": jnp.zeros((27,), jnp.float32),
        "w": _uniform(ks[5], (feat, feat, 3, 3), feat * 9),
        "b": _uniform(ks[6], (feat,), feat * 9),
    }
    return {"sft": sft, "dcn": dcn}


def init_dgb(key, feat):
    ks = jax.random.split(key, 6)
    return {
        "dgm1": init_dgm(ks[0], feat),
        "dgm2": init_dgm(ks[1], feat),
        "conv1_w": _uniform(ks[2], (feat, feat, 3, 3), feat * 9),
        "conv1_b": _uniform(ks[3], (feat,), feat * 9),
        "conv2_w": _uniform(ks[4], (feat, feat, 3, 3), feat * 9),
        "conv2_b": _uniform(ks[5], (feat,), feat * 9),
    }


def init_dgg(key, feat, block_n):
    ks = jax.random.split(key, block_n + 2)
    return {
        "blocks": [init_dgb(ks[i], feat) for i in range(block_n)],
        "final_w": _uniform(ks[block_n], (feat, feat, 3, 3), feat * 9),
        "final_b": _uniform(ks[block_n + 1], (feat,), feat * 9),
    }


# ---------------------------------------------------------------------------

if __name__ == "__main__":
    B, C, H, W = 2, 8, 16, 16          # feat = 8; block_n = 2 (module default is 5)
    key = jax.random.PRNGKey(0)
    kp, kx, kd = jax.random.split(key, 3)
    params = init_dgg(kp, feat=C, block_n=2)
    x = jax.random.normal(kx, (B, C, H, W), jnp.float32)
    degrad = jax.random.normal(kd, (B, C, H, W), jnp.float32)

    out = jax.jit(dgg_forward)(params, x, degrad)
    jax.block_until_ready(out)
    assert out.shape == (B, C, H, W) and out.dtype == jnp.float32
    assert bool(jnp.isfinite(out).all())
    print("KERNEL_OK")
</pallas_src>

<mosaic_0001>
module attributes {stable_mosaic.version = 11 : i64} {
  func.func @_offset_conv_kernel(%arg0: i32, %arg1: memref<8x128xbf16, #tpu.memory_space<vmem>>, %arg2: memref<8x384xbf16, #tpu.memory_space<vmem>>, %arg3: memref<8x128xbf16, #tpu.memory_space<vmem>>, %arg4: memref<8x128xbf16, #tpu.memory_space<vmem>>, %arg5: memref<8x384xbf16, #tpu.memory_space<vmem>>, %arg6: memref<8x128xbf16, #tpu.memory_space<vmem>>, %arg7: memref<27x72xbf16, #tpu.memory_space<vmem>>, %arg8: memref<27x72xbf16, #tpu.memory_space<vmem>>, %arg9: memref<27x1xf32, #tpu.memory_space<vmem>>, %arg10: memref<9x384xf32, #tpu.memory_space<vmem>>, %arg11: memref<9x384xf32, #tpu.memory_space<vmem>>, %arg12: memref<9x384xf32, #tpu.memory_space<vmem>>) attributes {dimension_semantics = [#tpu.dimension_semantics<parallel>], iteration_bounds = array<i64: 2>, scalar_prefetch = 0 : i64, scratch_operands = 0 : i64, tpu.core_type = #tpu.core_type<tc>, window_params = [{transform_indices = @transform_0, window_bounds = array<i64: 8, 128>}, {transform_indices = @transform_1, window_bounds = array<i64: 8, 384>}, {transform_indices = @transform_2, window_bounds = array<i64: 8, 128>}, {transform_indices = @transform_3, window_bounds = array<i64: 8, 128>}, {transform_indices = @transform_4, window_bounds = array<i64: 8, 384>}, {transform_indices = @transform_5, window_bounds = array<i64: 8, 128>}, {pipeline_mode = #tpu.pipeline_mode<synchronous>, transform_indices = @transform_6, window_bounds = array<i64: 27, 72>}, {pipeline_mode = #tpu.pipeline_mode<synchronous>, transform_indices = @transform_7, window_bounds = array<i64: 27, 72>}, {pipeline_mode = #tpu.pipeline_mode<synchronous>, transform_indices = @transform_8, window_bounds = array<i64: 27, 1>}, {transform_indices = @transform_9, window_bounds = array<i64: 9, 384>}, {transform_indices = @transform_10, window_bounds = array<i64: 9, 384>}, {transform_indices = @transform_11, window_bounds = array<i64: 9, 384>}]} {
    %c0 = arith.constant 0 : index
    %c109 = arith.constant 109 : index
    %0 = vector.load %arg1[%c0, %c109] : memref<8x128xbf16, #tpu.memory_space<vmem>>, vector<8x19xbf16>
    %c0_0 = arith.constant 0 : index
    %c0_1 = arith.constant 0 : index
    %1 = vector.load %arg2[%c0_0, %c0_1] : memref<8x384xbf16, #tpu.memory_space<vmem>>, vector<8x384xbf16>
    %c0_2 = arith.constant 0 : index
    %c0_3 = arith.constant 0 : index
    %2 = vector.load %arg3[%c0_2, %c0_3] : memref<8x128xbf16, #tpu.memory_space<vmem>>, vector<8x19xbf16>
    %3 = tpu.concatenate %0, %1, %2 in 1 : vector<8x19xbf16>, vector<8x384xbf16>, vector<8x19xbf16> -> vector<8x422xbf16>
    %c0_4 = arith.constant 0 : index
    %c109_5 = arith.constant 109 : index
    %4 = vector.load %arg4[%c0_4, %c109_5] : memref<8x128xbf16, #tpu.memory_space<vmem>>, vector<8x19xbf16>
    %c0_6 = arith.constant 0 : index
    %c0_7 = arith.constant 0 : index
    %5 = vector.load %arg5[%c0_6, %c0_7] : memref<8x384xbf16, #tpu.memory_space<vmem>>, vector<8x384xbf16>
    %c0_8 = arith.constant 0 : index
    %c0_9 = arith.constant 0 : index
    %6 = vector.load %arg6[%c0_8, %c0_9] : memref<8x128xbf16, #tpu.memory_space<vmem>>, vector<8x19xbf16>
    %7 = tpu.concatenate %4, %5, %6 in 1 : vector<8x19xbf16>, vector<8x384xbf16>, vector<8x19xbf16> -> vector<8x422xbf16>
    %c0_10 = arith.constant 0 : index
    %c0_11 = arith.constant 0 : index
    %8 = vector.load %arg7[%c0_10, %c0_11] : memref<27x72xbf16, #tpu.memory_space<vmem>>, vector<27x8xbf16>
    %9 = vector.extract_strided_slice %3 {offsets = [0, 0], sizes = [8, 384], strides = [1, 1]} : vector<8x422xbf16> to vector<8x384xbf16>
    %cst = arith.constant dense<0.000000e+00> : vector<27x384xf32>
    %10 = tpu.matmul %8, %9, %cst {dimension_numbers = #tpu.dot_dimension_numbers<[1], [0], [0], [1], [0, 0, 1, 1], [], []>} : vector<27x8xbf16>, vector<8x384xbf16>, vector<27x384xf32> -> vector<27x384xf32>
    %c0_12 = arith.constant 0 : index
    %c0_13 = arith.constant 0 : index
    %11 = vector.load %arg8[%c0_12, %c0_13] : memref<27x72xbf16, #tpu.memory_space<vmem>>, vector<27x8xbf16>
    %12 = vector.extract_strided_slice %7 {offsets = [0, 0], sizes = [8, 384], strides = [1, 1]} : vector<8x422xbf16> to vector<8x384xbf16>
    %cst_14 = arith.constant dense<0.000000e+00> : vector<27x384xf32>
    %13 = tpu.matmul %11, %12, %cst_14 {dimension_numbers = #tpu.dot_dimension_numbers<[1], [0], [0], [1], [0, 0, 1, 1], [], []>} : vector<27x8xbf16>, vector<8x384xbf16>, vector<27x384xf32> -> vector<27x384xf32>
    %14 = arith.addf %10, %13 : vector<27x384xf32>
    %c0_15 = arith.constant 0 : index
    %c8 = arith.constant 8 : index
    %15 = vector.load %arg7[%c0_15, %c8] : memref<27x72xbf16, #tpu.memory_space<vmem>>, vector<27x8xbf16>
    %16 = vector.extract_strided_slice %3 {offsets = [0, 1], sizes = [8, 384], strides = [1, 1]} : vector<8x422xbf16> to vector<8x384xbf16>
    %cst_16 = arith.constant dense<0.000000e+00> : vector<27x384xf32>
    %17 = tpu.matmul %15, %16, %cst_16 {dimension_numbers = #tpu.dot_dimension_numbers<[1], [0], [0], [1], [0, 0, 1, 1], [], []>} : vector<27x8xbf16>, vector<8x384xbf16>, vector<27x384xf32> -> vector<27x384xf32>
    %c0_17 = arith.constant 0 : index
    %c8_18 = arith.constant 8 : index
    %18 = vector.load %arg8[%c0_17, %c8_18] : memref<27x72xbf16, #tpu.memory_space<vmem>>, vector<27x8xbf16>
    %19 = vector.extract_strided_slice %7 {offsets = [0, 1], sizes = [8, 384], strides = [1, 1]} : vector<8x422xbf16> to vector<8x384xbf16>
    %cst_19 = arith.constant dense<0.000000e+00> : vector<27x384xf32>
    %20 = tpu.matmul %18, %19, %cst_19 {dimension_numbers = #tpu.dot_dimension_numbers<[1], [0], [0], [1], [0, 0, 1, 1], [], []>} : vector<27x8xbf16>, vector<8x384xbf16>, vector<27x384xf32> -> vector<27x384xf32>
    %21 = arith.addf %17, %20 : vector<27x384xf32>
    %22 = arith.addf %14, %21 : vector<27x384xf32>
    %c0_20 = arith.constant 0 : index
    %c16 = arith.constant 16 : index
    %23 = vector.load %arg7[%c0_20, %c16] : memref<27x72xbf16, #tpu.memory_space<vmem>>, vector<27x8xbf16>
    %24 = vector.extract_strided_slice %3 {offsets = [0, 2], sizes = [8, 384], strides = [1, 1]} : vector<8x422xbf16> to vector<8x384xbf16>
    %cst_21 = arith.constant dense<0.000000e+00> : vector<27x384xf32>
    %25 = tpu.matmul %23, %24, %cst_21 {dimension_numbers = #tpu.dot_dimension_numbers<[1], [0], [0], [1], [0, 0, 1, 1], [], []>} : vector<27x8xbf16>, vector<8x384xbf16>, vector<27x384xf32> -> vector<27x384xf32>
    %c0_22 = arith.constant 0 : index
    %c16_23 = arith.constant 16 : index
    %26 = vector.load %arg8[%c0_22, %c16_23] : memref<27x72xbf16, #tpu.memory_space<vmem>>, vector<27x8xbf16>
    %27 = vector.extract_strided_slice %7 {offsets = [0, 2], sizes = [8, 384], strides = [1, 1]} : vector<8x422xbf16> to vector<8x384xbf16>
    %cst_24 = arith.constant dense<0.000000e+00> : vector<27x384xf32>
    %28 = tpu.matmul %26, %27, %cst_24 {dimension_numbers = #tpu.dot_dimension_numbers<[1], [0], [0], [1], [0, 0, 1, 1], [], []>} : vector<27x8xbf16>, vector<8x384xbf16>, vector<27x384xf32> -> vector<27x384xf32>
    %29 = arith.addf %25, %28 : vector<27x384xf32>
    %30 = arith.addf %22, %29 : vector<27x384xf32>
    %c0_25 = arith.constant 0 : index
    %c24 = arith.constant 24 : index
    %31 = vector.load %arg7[%c0_25, %c24] : memref<27x72xbf16, #tpu.memory_space<vmem>>, vector<27x8xbf16>
    %32 = vector.extract_strided_slice %3 {offsets = [0, 18], sizes = [8, 384], strides = [1, 1]} : vector<8x422xbf16> to vector<8x384xbf16>
    %cst_26 = arith.constant dense<0.000000e+00> : vector<27x384xf32>
    %33 = tpu.matmul %31, %32, %cst_26 {dimension_numbers = #tpu.dot_dimension_numbers<[1], [0], [0], [1], [0, 0, 1, 1], [], []>} : vector<27x8xbf16>, vector<8x384xbf16>, vector<27x384xf32> -> vector<27x384xf32>
    %c0_27 = arith.constant 0 : index
    %c24_28 = arith.constant 24 : index
    %34 = vector.load %arg8[%c0_27, %c24_28] : memref<27x72xbf16, #tpu.memory_space<vmem>>, vector<27x8xbf16>
    %35 = vector.extract_strided_slice %7 {offsets = [0, 18], sizes = [8, 384], strides = [1, 1]} : vector<8x422xbf16> to vector<8x384xbf16>
    %cst_29 = arith.constant dense<0.000000e+00> : vector<27x384xf32>
    %36 = tpu.matmul %34, %35, %cst_29 {dimension_numbers = #tpu.dot_dimension_numbers<[1], [0], [0], [1], [0, 0, 1, 1], [], []>} : vector<27x8xbf16>, vector<8x384xbf16>, vector<27x384xf32> -> vector<27x384xf32>
    %37 = arith.addf %33, %36 : vector<27x384xf32>
    %38 = arith.addf %30, %37 : vector<27x384xf32>
    %c0_30 = arith.constant 0 : index
    %c32 = arith.constant 32 : index
    %39 = vector.load %arg7[%c0_30, %c32] : memref<27x72xbf16, #tpu.memory_space<vmem>>, vector<27x8xbf16>
    %40 = vector.extract_strided_slice %3 {offsets = [0, 19], sizes = [8, 384], strides = [1, 1]} : vector<8x422xbf16> to vector<8x384xbf16>
    %cst_31 = arith.constant dense<0.000000e+00> : vector<27x384xf32>
    %41 = tpu.matmul %39, %40, %cst_31 {dimension_numbers = #tpu.dot_dimension_numbers<[1], [0], [0], [1], [0, 0, 1, 1], [], []>} : vector<27x8xbf16>, vector<8x384xbf16>, vector<27x384xf32> -> vector<27x384xf32>
    %c0_32 = arith.constant 0 : index
    %c32_33 = arith.constant 32 : index
    %42 = vector.load %arg8[%c0_32, %c32_33] : memref<27x72xbf16, #tpu.memory_space<vmem>>, vector<27x8xbf16>
    %43 = vector.extract_strided_slice %7 {offsets = [0, 19], sizes = [8, 384], strides = [1, 1]} : vector<8x422xbf16> to vector<8x384xbf16>
    %cst_34 = arith.constant dense<0.000000e+00> : vector<27x384xf32>
    %44 = tpu.matmul %42, %43, %cst_34 {dimension_numbers = #tpu.dot_dimension_numbers<[1], [0], [0], [1], [0, 0, 1, 1], [], []>} : vector<27x8xbf16>, vector<8x384xbf16>, vector<27x384xf32> -> vector<27x384xf32>
    %45 = arith.addf %41, %44 : vector<27x384xf32>
    %46 = arith.addf %38, %45 : vector<27x384xf32>
    %c0_35 = arith.constant 0 : index
    %c40 = arith.constant 40 : index
    %47 = vector.load %arg7[%c0_35, %c40] : memref<27x72xbf16, #tpu.memory_space<vmem>>, vector<27x8xbf16>
    %48 = vector.extract_strided_slice %3 {offsets = [0, 20], sizes = [8, 384], strides = [1, 1]} : vector<8x422xbf16> to vector<8x384xbf16>
    %cst_36 = arith.constant dense<0.000000e+00> : vector<27x384xf32>
    %49 = tpu.matmul %47, %48, %cst_36 {dimension_numbers = #tpu.dot_dimension_numbers<[1], [0], [0], [1], [0, 0, 1, 1], [], []>} : vector<27x8xbf16>, vector<8x384xbf16>, vector<27x384xf32> -> vector<27x384xf32>
    %c0_37 = arith.constant 0 : index
    %c40_38 = arith.constant 40 : index
    %50 = vector.load %arg8[%c0_37, %c40_38] : memref<27x72xbf16, #tpu.memory_space<vmem>>, vector<27x8xbf16>
    %51 = vector.extract_strided_slice %7 {offsets = [0, 20], sizes = [8, 384], strides = [1, 1]} : vector<8x422xbf16> to vector<8x384xbf16>
    %cst_39 = arith.constant dense<0.000000e+00> : vector<27x384xf32>
    %52 = tpu.matmul %50, %51, %cst_39 {dimension_numbers = #tpu.dot_dimension_numbers<[1], [0], [0], [1], [0, 0, 1, 1], [], []>} : vector<27x8xbf16>, vector<8x384xbf16>, vector<27x384xf32> -> vector<27x384xf32>
    %53 = arith.addf %49, %52 : vector<27x384xf32>
    %54 = arith.addf %46, %53 : vector<27x384xf32>
    %c0_40 = arith.constant 0 : index
    %c48 = arith.constant 48 : index
    %55 = vector.load %arg7[%c0_40, %c48] : memref<27x72xbf16, #tpu.memory_space<vmem>>, vector<27x8xbf16>
    %56 = vector.extract_strided_slice %3 {offsets = [0, 36], sizes = [8, 384], strides = [1, 1]} : vector<8x422xbf16> to vector<8x384xbf16>
    %cst_41 = arith.constant dense<0.000000e+00> : vector<27x384xf32>
    %57 = tpu.matmul %55, %56, %cst_41 {dimension_numbers = #tpu.dot_dimension_numbers<[1], [0], [0], [1], [0, 0, 1, 1], [], []>} : vector<27x8xbf16>, vector<8x384xbf16>, vector<27x384xf32> -> vector<27x384xf32>
    %c0_42 = arith.constant 0 : index
    %c48_43 = arith.constant 48 : index
    %58 = vector.load %arg8[%c0_42, %c48_43] : memref<27x72xbf16, #tpu.memory_space<vmem>>, vector<27x8xbf16>
    %59 = vector.extract_strided_slice %7 {offsets = [0, 36], sizes = [8, 384], strides = [1, 1]} : vector<8x422xbf16> to vector<8x384xbf16>
    %cst_44 = arith.constant dense<0.000000e+00> : vector<27x384xf32>
    %60 = tpu.matmul %58, %59, %cst_44 {dimension_numbers = #tpu.dot_dimension_numbers<[1], [0], [0], [1], [0, 0, 1, 1], [], []>} : vector<27x8xbf16>, vector<8x384xbf16>, vector<27x384xf32> -> vector<27x384xf32>
    %61 = arith.addf %57, %60 : vector<27x384xf32>
    %62 = arith.addf %54, %61 : vector<27x384xf32>
    %c0_45 = arith.constant 0 : index
    %c56 = arith.constant 56 : index
    %63 = vector.load %arg7[%c0_45, %c56] : memref<27x72xbf16, #tpu.memory_space<vmem>>, vector<27x8xbf16>
    %64 = vector.extract_strided_slice %3 {offsets = [0, 37], sizes = [8, 384], strides = [1, 1]} : vector<8x422xbf16> to vector<8x384xbf16>
    %cst_46 = arith.constant dense<0.000000e+00> : vector<27x384xf32>
    %65 = tpu.matmul %63, %64, %cst_46 {dimension_numbers = #tpu.dot_dimension_numbers<[1], [0], [0], [1], [0, 0, 1, 1], [], []>} : vector<27x8xbf16>, vector<8x384xbf16>, vector<27x384xf32> -> vector<27x384xf32>
    %c0_47 = arith.constant 0 : index
    %c56_48 = arith.constant 56 : index
    %66 = vector.load %arg8[%c0_47, %c56_48] : memref<27x72xbf16, #tpu.memory_space<vmem>>, vector<27x8xbf16>
    %67 = vector.extract_strided_slice %7 {offsets = [0, 37], sizes = [8, 384], strides = [1, 1]} : vector<8x422xbf16> to vector<8x384xbf16>
    %cst_49 = arith.constant dense<0.000000e+00> : vector<27x384xf32>
    %68 = tpu.matmul %66, %67, %cst_49 {dimension_numbers = #tpu.dot_dimension_numbers<[1], [0], [0], [1], [0, 0, 1, 1], [], []>} : vector<27x8xbf16>, vector<8x384xbf16>, vector<27x384xf32> -> vector<27x384xf32>
    %69 = arith.addf %65, %68 : vector<27x384xf32>
    %70 = arith.addf %62, %69 : vector<27x384xf32>
    %c0_50 = arith.constant 0 : index
    %c64 = arith.constant 64 : index
    %71 = vector.load %arg7[%c0_50, %c64] : memref<27x72xbf16, #tpu.memory_space<vmem>>, vector<27x8xbf16>
    %72 = vector.extract_strided_slice %3 {offsets = [0, 38], sizes = [8, 384], strides = [1, 1]} : vector<8x422xbf16> to vector<8x384xbf16>
    %cst_51 = arith.constant dense<0.000000e+00> : vector<27x384xf32>
    %73 = tpu.matmul %71, %72, %cst_51 {dimension_numbers = #tpu.dot_dimension_numbers<[1], [0], [0], [1], [0, 0, 1, 1], [], []>} : vector<27x8xbf16>, vector<8x384xbf16>, vector<27x384xf32> -> vector<27x384xf32>
    %c0_52 = arith.constant 0 : index
    %c64_53 = arith.constant 64 : index
    %74 = vector.load %arg8[%c0_52, %c64_53] : memref<27x72xbf16, #tpu.memory_space<vmem>>, vector<27x8xbf16>
    %75 = vector.extract_strided_slice %7 {offsets = [0, 38], sizes = [8, 384], strides = [1, 1]} : vector<8x422xbf16> to vector<8x384xbf16>
    %cst_54 = arith.constant dense<0.000000e+00> : vector<27x384xf32>
    %76 = tpu.matmul %74, %75, %cst_54 {dimension_numbers = #tpu.dot_dimension_numbers<[1], [0], [0], [1], [0, 0, 1, 1], [], []>} : vector<27x8xbf16>, vector<8x384xbf16>, vector<27x384xf32> -> vector<27x384xf32>
    %77 = arith.addf %73, %76 : vector<27x384xf32>
    %78 = arith.addf %70, %77 : vector<27x384xf32>
    %c0_55 = arith.constant 0 : index
    %c0_56 = arith.constant 0 : index
    %79 = vector.load %arg9[%c0_55, %c0_56] : memref<27x1xf32, #tpu.memory_space<vmem>>, vector<27x1xf32>
    %80 = vector.broadcast %79 : vector<27x1xf32> to vector<27x384xf32>
    %81 = arith.addf %78, %80 : vector<27x384xf32>
    %82 = vector.extract_strided_slice %81 {offsets = [0, 0], sizes = [9, 384], strides = [1, 1]} : vector<27x384xf32> to vector<9x384xf32>
    %c0_57 = arith.constant 0 : index
    %c0_58 = arith.constant 0 : index
    %83 = vector.load %arg10[%c0_57, %c0_58] : memref<9x384xf32, #tpu.memory_space<vmem>>, vector<9x384xf32>
    tpu.vector_store %arg10[%c0_57, %c0_58], %82 {strides = array<i32>} : memref<9x384xf32, #tpu.memory_space<vmem>>, vector<9x384xf32>,
    %84 = vector.extract_strided_slice %81 {offsets = [9, 0], sizes = [9, 384], strides = [1, 1]} : vector<27x384xf32> to vector<9x384xf32>
    %c0_59 = arith.constant 0 : index
    %c0_60 = arith.constant 0 : index
    %85 = vector.load %arg11[%c0_59, %c0_60] : memref<9x384xf32, #tpu.memory_space<vmem>>, vector<9x384xf32>
    tpu.vector_store %arg11[%c0_59, %c0_60], %84 {strides = array<i32>} : memref<9x384xf32, #tpu.memory_space<vmem>>, vector<9x384xf32>,
    %86 = vector.extract_strided_slice %81 {offsets = [18, 0], sizes = [9, 384], strides = [1, 1]} : vector<27x384xf32> to vector<9x384xf32>
    %87 = arith.negf %86 : vector<9x384xf32>
    %88 = math.exp %87 : vector<9x384xf32>
    %cst_61 = arith.constant 1.000000e+00 : f32
    %89 = vector.broadcast %cst_61 : f32 to vector<9x384xf32>
    %90 = arith.addf %89, %88 : vector<9x384xf32>
    %91 = arith.divf %89, %90 : vector<9x384xf32>
    %c0_62 = arith.constant 0 : index
    %c0_63 = arith.constant 0 : index
    %92 = vector.load %arg12[%c0_62, %c0_63] : memref<9x384xf32, #tpu.memory_space<vmem>>, vector<9x384xf32>
    tpu.vector_store %arg12[%c0_62, %c0_63], %91 {strides = array<i32>} : memref<9x384xf32, #tpu.memory_space<vmem>>, vector<9x384xf32>,
    return
  }
  func.func @transform_0(%arg0: i32) -> (i32, i32) {
    %c3_i32 = arith.constant 3 : i32
    %0 = arith.muli %arg0, %c3_i32 : i32
    %c1_i32 = arith.constant 1 : i32
    %1 = arith.subi %0, %c1_i32 : i32
    %c0_i32 = arith.constant 0 : i32
    %2 = arith.maxsi %1, %c0_i32 : i32
    %c0_i32_0 = arith.constant 0 : i32
    %c0_i32_1 = arith.constant 0 : i32
    return %c0_i32_0, %2 : i32, i32
  }
  func.func @transform_1(%arg0: i32) -> (i32, i32) {
    %c0_i32 = arith.constant 0 : i32
    %c0_i32_0 = arith.constant 0 : i32
    return %c0_i32, %arg0 : i32, i32
  }
  func.func @transform_2(%arg0: i32) -> (i32, i32) {
    %c1_i32 = arith.constant 1 : i32
    %0 = arith.addi %arg0, %c1_i32 : i32
    %c3_i32 = arith.constant 3 : i32
    %1 = arith.muli %0, %c3_i32 : i32
    %c5_i32 = arith.constant 5 : i32
    %2 = arith.minsi %1, %c5_i32 : i32
    %c0_i32 = arith.constant 0 : i32
    %c0_i32_0 = arith.constant 0 : i32
    return %c0_i32, %2 : i32, i32
  }
  func.func @transform_3(%arg0: i32) -> (i32, i32) {
    %c3_i32 = arith.constant 3 : i32
    %0 = arith.muli %arg0, %c3_i32 : i32
    %c1_i32 = arith.constant 1 : i32
    %1 = arith.subi %0, %c1_i32 : i32
    %c0_i32 = arith.constant 0 : i32
    %2 = arith.maxsi %1, %c0_i32 : i32
    %c0_i32_0 = arith.constant 0 : i32
    %c0_i32_1 = arith.constant 0 : i32
    return %c0_i32_0, %2 : i32, i32
  }
  func.func @transform_4(%arg0: i32) -> (i32, i32) {
    %c0_i32 = arith.constant 0 : i32
    %c0_i32_0 = arith.constant 0 : i32
    return %c0_i32, %arg0 : i32, i32
  }
  func.func @transform_5(%arg0: i32) -> (i32, i32) {
    %c1_i32 = arith.constant 1 : i32
    %0 = arith.addi %arg0, %c1_i32 : i32
    %c3_i32 = arith.constant 3 : i32
    %1 = arith.muli %0, %c3_i32 : i32
    %c5_i32 = arith.constant 5 : i32
    %2 = arith.minsi %1, %c5_i32 : i32
    %c0_i32 = arith.constant 0 : i32
    %c0_i32_0 = arith.constant 0 : i32
    return %c0_i32, %2 : i32, i32
  }
  func.func @transform_6(%arg0: i32) -> (i32, i32) {
    %c0_i32 = arith.constant 0 : i32
    %c0_i32_0 = arith.constant 0 : i32
    %c0_i32_1 = arith.constant 0 : i32
    return %c0_i32, %c0_i32_0 : i32, i32
  }
  func.func @transform_7(%arg0: i32) -> (i32, i32) {
    %c0_i32 = arith.constant 0 : i32
    %c0_i32_0 = arith.constant 0 : i32
    %c0_i32_1 = arith.constant 0 : i32
    return %c0_i32, %c0_i32_0 : i32, i32
  }
  func.func @transform_8(%arg0: i32) -> (i32, i32) {
    %c0_i32 = arith.constant 0 : i32
    %c0_i32_0 = arith.constant 0 : i32
    %c0_i32_1 = arith.constant 0 : i32
    return %c0_i32, %c0_i32_0 : i32, i32
  }
  func.func @transform_9(%arg0: i32) -> (i32, i32) {
    %c0_i32 = arith.constant 0 : i32
    %c0_i32_0 = arith.constant 0 : i32
    return %c0_i32, %arg0 : i32, i32
  }
  func.func @transform_10(%arg0: i32) -> (i32, i32) {
    %c0_i32 = arith.constant 0 : i32
    %c0_i32_0 = arith.constant 0 : i32
    return %c0_i32, %arg0 : i32, i32
  }
  func.func @transform_11(%arg0: i32) -> (i32, i32) {
    %c0_i32 = arith.constant 0 : i32
    %c0_i32_0 = arith.constant 0 : i32
    return %c0_i32, %arg0 : i32, i32
  }
}

module attributes {stable_mosaic.version = 11 : i64} {
  func.func @_dgm_kernel(%arg0: i32, %arg1: memref<8x384xbf16, #tpu.memory_space<vmem>>, %arg2: memref<8x384xbf16, #tpu.memory_space<vmem>>, %arg3: memref<72x384xbf16, #tpu.memory_space<vmem>>, %arg4: memref<1x384xf32, #tpu.memory_space<vmem>>, %arg5: memref<16x8xbf16, #tpu.memory_space<vmem>>, %arg6: memref<16x16xbf16, #tpu.memory_space<vmem>>, %arg7: memref<8x72xbf16, #tpu.memory_space<vmem>>, %arg8: memref<8x1xf32, #tpu.memory_space<vmem>>, %arg9: memref<8x384xbf16, #tpu.memory_space<vmem>>) attributes {dimension_semantics = [#tpu.dimension_semantics<parallel>], iteration_bounds = array<i64: 2>, scalar_prefetch = 0 : i64, scratch_operands = 0 : i64, tpu.core_type = #tpu.core_type<tc>, window_params = [{transform_indices = @transform_0, window_bounds = array<i64: 8, 384>}, {transform_indices = @transform_1, window_bounds = array<i64: 8, 384>}, {transform_indices = @transform_2, window_bounds = array<i64: 72, 384>}, {transform_indices = @transform_3, window_bounds = array<i64: 1, 384>}, {pipeline_mode = #tpu.pipeline_mode<synchronous>, transform_indices = @transform_4, window_bounds = array<i64: 16, 8>}, {pipeline_mode = #tpu.pipeline_mode<synchronous>, transform_indices = @transform_5, window_bounds = array<i64: 16, 16>}, {pipeline_mode = #tpu.pipeline_mode<synchronous>, transform_indices = @transform_6, window_bounds = array<i64: 8, 72>}, {pipeline_mode = #tpu.pipeline_mode<synchronous>, transform_indices = @transform_7, window_bounds = array<i64: 8, 1>}, {transform_indices = @transform_8, window_bounds = array<i64: 8, 384>}]} {
    %c0 = arith.constant 0 : index
    %c0_0 = arith.constant 0 : index
    %0 = vector.load %arg5[%c0, %c0_0] : memref<16x8xbf16, #tpu.memory_space<vmem>>, vector<16x8xbf16>
    %c0_1 = arith.constant 0 : index
    %c0_2 = arith.constant 0 : index
    %1 = vector.load %arg2[%c0_1, %c0_2] : memref<8x384xbf16, #tpu.memory_space<vmem>>, vector<8x384xbf16>
    %cst = arith.constant dense<0.000000e+00> : vector<16x384xf32>
    %2 = tpu.matmul %0, %1, %cst {dimension_numbers = #tpu.dot_dimension_numbers<[1], [0], [0], [1], [0, 0, 1, 1], [], []>} : vector<16x8xbf16>, vector<8x384xbf16>, vector<16x384xf32> -> vector<16x384xf32>
    %cst_3 = arith.constant 0.000000e+00 : f32
    %3 = vector.broadcast %cst_3 : f32 to vector<16x384xf32>
    %4 = arith.cmpf ogt, %2, %3 : vector<16x384xf32>
    %cst_4 = arith.constant 1.000000e-01 : f32
    %5 = vector.broadcast %cst_4 : f32 to vector<16x384xf32>
    %6 = arith.mulf %5, %2 : vector<16x384xf32>
    %7 = arith.select %4, %2, %6 : vector<16x384xi1>, vector<16x384xf32>
    %c0_5 = arith.constant 0 : index
    %c0_6 = arith.constant 0 : index
    %8 = vector.load %arg6[%c0_5, %c0_6] : memref<16x16xbf16, #tpu.memory_space<vmem>>, vector<16x16xbf16>
    %9 = arith.truncf %7 : vector<16x384xf32> to vector<16x384xbf16>
    %cst_7 = arith.constant dense<0.000000e+00> : vector<16x384xf32>
    %10 = tpu.matmul %8, %9, %cst_7 {dimension_numbers = #tpu.dot_dimension_numbers<[1], [0], [0], [1], [0, 0, 1, 1], [], []>} : vector<16x16xbf16>, vector<16x384xbf16>, vector<16x384xf32> -> vector<16x384xf32>
    %11 = vector.extract_strided_slice %10 {offsets = [0, 0], sizes = [8, 384], strides = [1, 1]} : vector<16x384xf32> to vector<8x384xf32>
    %12 = vector.extract_strided_slice %10 {offsets = [8, 0], sizes = [8, 384], strides = [1, 1]} : vector<16x384xf32> to vector<8x384xf32>
    %c0_8 = arith.constant 0 : index
    %c0_9 = arith.constant 0 : index
    %13 = vector.load %arg7[%c0_8, %c0_9] : memref<8x72xbf16, #tpu.memory_space<vmem>>, vector<8x72xbf16>
    %c0_10 = arith.constant 0 : index
    %c0_11 = arith.constant 0 : index
    %14 = vector.load %arg3[%c0_10, %c0_11] : memref<72x384xbf16, #tpu.memory_space<vmem>>, vector<72x384xbf16>
    %cst_12 = arith.constant dense<0.000000e+00> : vector<8x384xf32>
    %15 = tpu.matmul %13, %14, %cst_12 {dimension_numbers = #tpu.dot_dimension_numbers<[1], [0], [0], [1], [0, 0, 1, 1], [], []>} : vector<8x72xbf16>, vector<72x384xbf16>, vector<8x384xf32> -> vector<8x384xf32>
    %c0_13 = arith.constant 0 : index
    %c0_14 = arith.constant 0 : index
    %16 = vector.load %arg8[%c0_13, %c0_14] : memref<8x1xf32, #tpu.memory_space<vmem>>, vector<8x1xf32>
    %17 = vector.broadcast %16 : vector<8x1xf32> to vector<8x384xf32>
    %18 = arith.addf %15, %17 : vector<8x384xf32>
    %c0_15 = arith.constant 0 : index
    %c0_16 = arith.constant 0 : index
    %19 = vector.load %arg1[%c0_15, %c0_16] : memref<8x384xbf16, #tpu.memory_space<vmem>>, vector<8x384xbf16>
    %20 = arith.extf %19 : vector<8x384xbf16> to vector<8x384xf32>
    %cst_17 = arith.constant 1.000000e+00 : f32
    %21 = vector.broadcast %cst_17 : f32 to vector<8x384xf32>
    %22 = arith.addf %11, %21 : vector<8x384xf32>
    %23 = arith.mulf %20, %22 : vector<8x384xf32>
    %24 = arith.addf %12, %18 : vector<8x384xf32>
    %25 = arith.addf %23, %24 : vector<8x384xf32>
    %cst_18 = arith.constant 0.000000e+00 : f32
    %26 = vector.broadcast %cst_18 : f32 to vector<8x384xf32>
    %27 = arith.maximumf %25, %26 : vector<8x384xf32>
    %c0_19 = arith.constant 0 : index
    %c0_20 = arith.constant 0 : index
    %28 = vector.load %arg4[%c0_19, %c0_20] : memref<1x384xf32, #tpu.memory_space<vmem>>, vector<1x384xf32>
    %29 = vector.broadcast %28 : vector<1x384xf32> to vector<8x384xf32>
    %30 = arith.mulf %27, %29 : vector<8x384xf32>
    %31 = arith.truncf %30 : vector<8x384xf32> to vector<8x384xbf16>
    %c0_21 = arith.constant 0 : index
    %c0_22 = arith.constant 0 : index
    %32 = vector.load %arg9[%c0_21, %c0_22] : memref<8x384xbf16, #tpu.memory_space<vmem>>, vector<8x384xbf16>
    tpu.vector_store %arg9[%c0_21, %c0_22], %31 {strides = array<i32>} : memref<8x384xbf16, #tpu.memory_space<vmem>>, vector<8x384xbf16>,
    return
  }
  func.func @transform_0(%arg0: i32) -> (i32, i32) {
    %c0_i32 = arith.constant 0 : i32
    %c0_i32_0 = arith.constant 0 : i32
    return %c0_i32, %arg0 : i32, i32
  }
  func.func @transform_1(%arg0: i32) -> (i32, i32) {
    %c0_i32 = arith.constant 0 : i32
    %c0_i32_0 = arith.constant 0 : i32
    return %c0_i32, %arg0 : i32, i32
  }
  func.func @transform_2(%arg0: i32) -> (i32, i32) {
    %c0_i32 = arith.constant 0 : i32
    %c0_i32_0 = arith.constant 0 : i32
    return %c0_i32, %arg0 : i32, i32
  }
  func.func @transform_3(%arg0: i32) -> (i32, i32) {
    %c0_i32 = arith.constant 0 : i32
    %c0_i32_0 = arith.constant 0 : i32
    return %c0_i32, %arg0 : i32, i32
  }
  func.func @transform_4(%arg0: i32) -> (i32, i32) {
    %c0_i32 = arith.constant 0 : i32
    %c0_i32_0 = arith.constant 0 : i32
    %c0_i32_1 = arith.constant 0 : i32
    return %c0_i32, %c0_i32_0 : i32, i32
  }
  func.func @transform_5(%arg0: i32) -> (i32, i32) {
    %c0_i32 = arith.constant 0 : i32
    %c0_i32_0 = arith.constant 0 : i32
    %c0_i32_1 = arith.constant 0 : i32
    return %c0_i32, %c0_i32_0 : i32, i32
  }
  func.func @transform_6(%arg0: i32) -> (i32, i32) {
    %c0_i32 = arith.constant 0 : i32
    %c0_i32_0 = arith.constant 0 : i32
    %c0_i32_1 = arith.constant 0 : i32
    return %c0_i32, %c0_i32_0 : i32, i32
  }
  func.func @transform_7(%arg0: i32) -> (i32, i32) {
    %c0_i32 = arith.constant 0 : i32
    %c0_i32_0 = arith.constant 0 : i32
    %c0_i32_1 = arith.constant 0 : i32
    return %c0_i32, %c0_i32_0 : i32, i32
  }
  func.func @transform_8(%arg0: i32) -> (i32, i32) {
    %c0_i32 = arith.constant 0 : i32
    %c0_i32_0 = arith.constant 0 : i32
    return %c0_i32, %arg0 : i32, i32
  }
}

module attributes {stable_mosaic.version = 11 : i64} {
  func.func @_conv3x3_kernel(%arg0: i32, %arg1: memref<8x128xbf16, #tpu.memory_space<vmem>>, %arg2: memref<8x384xbf16, #tpu.memory_space<vmem>>, %arg3: memref<8x128xbf16, #tpu.memory_space<vmem>>, %arg4: memref<8x72xbf16, #tpu.memory_space<vmem>>, %arg5: memref<8x1xf32, #tpu.memory_space<vmem>>, %arg6: memref<1x384xf32, #tpu.memory_space<vmem>>, %arg7: memref<8x384xbf16, #tpu.memory_space<vmem>>) attributes {dimension_semantics = [#tpu.dimension_semantics<parallel>], iteration_bounds = array<i64: 2>, scalar_prefetch = 0 : i64, scratch_operands = 0 : i64, tpu.core_type = #tpu.core_type<tc>, window_params = [{transform_indices = @transform_0, window_bounds = array<i64: 8, 128>}, {transform_indices = @transform_1, window_bounds = array<i64: 8, 384>}, {transform_indices = @transform_2, window_bounds = array<i64: 8, 128>}, {pipeline_mode = #tpu.pipeline_mode<synchronous>, transform_indices = @transform_3, window_bounds = array<i64: 8, 72>}, {pipeline_mode = #tpu.pipeline_mode<synchronous>, transform_indices = @transform_4, window_bounds = array<i64: 8, 1>}, {transform_indices = @transform_5, window_bounds = array<i64: 1, 384>}, {transform_indices = @transform_6, window_bounds = array<i64: 8, 384>}]} {
    %c0 = arith.constant 0 : index
    %c109 = arith.constant 109 : index
    %0 = vector.load %arg1[%c0, %c109] : memref<8x128xbf16, #tpu.memory_space<vmem>>, vector<8x19xbf16>
    %c0_0 = arith.constant 0 : index
    %c0_1 = arith.constant 0 : index
    %1 = vector.load %arg2[%c0_0, %c0_1] : memref<8x384xbf16, #tpu.memory_space<vmem>>, vector<8x384xbf16>
    %c0_2 = arith.constant 0 : index
    %c0_3 = arith.constant 0 : index
    %2 = vector.load %arg3[%c0_2, %c0_3] : memref<8x128xbf16, #tpu.memory_space<vmem>>, vector<8x19xbf16>
    %3 = tpu.concatenate %0, %1, %2 in 1 : vector<8x19xbf16>, vector<8x384xbf16>, vector<8x19xbf16> -> vector<8x422xbf16>
    %4 = vector.extract_strided_slice %3 {offsets = [0, 0], sizes = [8, 384], strides = [1, 1]} : vector<8x422xbf16> to vector<8x384xbf16>
    %c0_4 = arith.constant 0 : index
    %c0_5 = arith.constant 0 : index
    %5 = vector.load %arg4[%c0_4, %c0_5] : memref<8x72xbf16, #tpu.memory_space<vmem>>, vector<8x8xbf16>
    %cst = arith.constant dense<0.000000e+00> : vector<8x384xf32>
    %6 = tpu.matmul %5, %4, %cst {dimension_numbers = #tpu.dot_dimension_numbers<[1], [0], [0], [1], [0, 0, 1, 1], [], []>} : vector<8x8xbf16>, vector<8x384xbf16>, vector<8x384xf32> -> vector<8x384xf32>
    %7 = vector.extract_strided_slice %3 {offsets = [0, 1], sizes = [8, 384], strides = [1, 1]} : vector<8x422xbf16> to vector<8x384xbf16>
    %c0_6 = arith.constant 0 : index
    %c8 = arith.constant 8 : index
    %8 = vector.load %arg4[%c0_6, %c8] : memref<8x72xbf16, #tpu.memory_space<vmem>>, vector<8x8xbf16>
    %cst_7 = arith.constant dense<0.000000e+00> : vector<8x384xf32>
    %9 = tpu.matmul %8, %7, %cst_7 {dimension_numbers = #tpu.dot_dimension_numbers<[1], [0], [0], [1], [0, 0, 1, 1], [], []>} : vector<8x8xbf16>, vector<8x384xbf16>, vector<8x384xf32> -> vector<8x384xf32>
    %10 = arith.addf %6, %9 : vector<8x384xf32>
    %11 = vector.extract_strided_slice %3 {offsets = [0, 2], sizes = [8, 384], strides = [1, 1]} : vector<8x422xbf16> to vector<8x384xbf16>
    %c0_8 = arith.constant 0 : index
    %c16 = arith.constant 16 : index
    %12 = vector.load %arg4[%c0_8, %c16] : memref<8x72xbf16, #tpu.memory_space<vmem>>, vector<8x8xbf16>
    %cst_9 = arith.constant dense<0.000000e+00> : vector<8x384xf32>
    %13 = tpu.matmul %12, %11, %cst_9 {dimension_numbers = #tpu.dot_dimension_numbers<[1], [0], [0], [1], [0, 0, 1, 1], [], []>} : vector<8x8xbf16>, vector<8x384xbf16>, vector<8x384xf32> -> vector<8x384xf32>
    %14 = arith.addf %10, %13 : vector<8x384xf32>
    %15 = vector.extract_strided_slice %3 {offsets = [0, 18], sizes = [8, 384], strides = [1, 1]} : vector<8x422xbf16> to vector<8x384xbf16>
    %c0_10 = arith.constant 0 : index
    %c24 = arith.constant 24 : index
    %16 = vector.load %arg4[%c0_10, %c24] : memref<8x72xbf16, #tpu.memory_space<vmem>>, vector<8x8xbf16>
    %cst_11 = arith.constant dense<0.000000e+00> : vector<8x384xf32>
    %17 = tpu.matmul %16, %15, %cst_11 {dimension_numbers = #tpu.dot_dimension_numbers<[1], [0], [0], [1], [0, 0, 1, 1], [], []>} : vector<8x8xbf16>, vector<8x384xbf16>, vector<8x384xf32> -> vector<8x384xf32>
    %18 = arith.addf %14, %17 : vector<8x384xf32>
    %19 = vector.extract_strided_slice %3 {offsets = [0, 19], sizes = [8, 384], strides = [1, 1]} : vector<8x422xbf16> to vector<8x384xbf16>
    %c0_12 = arith.constant 0 : index
    %c32 = arith.constant 32 : index
    %20 = vector.load %arg4[%c0_12, %c32] : memref<8x72xbf16, #tpu.memory_space<vmem>>, vector<8x8xbf16>
    %cst_13 = arith.constant dense<0.000000e+00> : vector<8x384xf32>
    %21 = tpu.matmul %20, %19, %cst_13 {dimension_numbers = #tpu.dot_dimension_numbers<[1], [0], [0], [1], [0, 0, 1, 1], [], []>} : vector<8x8xbf16>, vector<8x384xbf16>, vector<8x384xf32> -> vector<8x384xf32>
    %22 = arith.addf %18, %21 : vector<8x384xf32>
    %23 = vector.extract_strided_slice %3 {offsets = [0, 20], sizes = [8, 384], strides = [1, 1]} : vector<8x422xbf16> to vector<8x384xbf16>
    %c0_14 = arith.constant 0 : index
    %c40 = arith.constant 40 : index
    %24 = vector.load %arg4[%c0_14, %c40] : memref<8x72xbf16, #tpu.memory_space<vmem>>, vector<8x8xbf16>
    %cst_15 = arith.constant dense<0.000000e+00> : vector<8x384xf32>
    %25 = tpu.matmul %24, %23, %cst_15 {dimension_numbers = #tpu.dot_dimension_numbers<[1], [0], [0], [1], [0, 0, 1, 1], [], []>} : vector<8x8xbf16>, vector<8x384xbf16>, vector<8x384xf32> -> vector<8x384xf32>
    %26 = arith.addf %22, %25 : vector<8x384xf32>
    %27 = vector.extract_strided_slice %3 {offsets = [0, 36], sizes = [8, 384], strides = [1, 1]} : vector<8x422xbf16> to vector<8x384xbf16>
    %c0_16 = arith.constant 0 : index
    %c48 = arith.constant 48 : index
    %28 = vector.load %arg4[%c0_16, %c48] : memref<8x72xbf16, #tpu.memory_space<vmem>>, vector<8x8xbf16>
    %cst_17 = arith.constant dense<0.000000e+00> : vector<8x384xf32>
    %29 = tpu.matmul %28, %27, %cst_17 {dimension_numbers = #tpu.dot_dimension_numbers<[1], [0], [0], [1], [0, 0, 1, 1], [], []>} : vector<8x8xbf16>, vector<8x384xbf16>, vector<8x384xf32> -> vector<8x384xf32>
    %30 = arith.addf %26, %29 : vector<8x384xf32>
    %31 = vector.extract_strided_slice %3 {offsets = [0, 37], sizes = [8, 384], strides = [1, 1]} : vector<8x422xbf16> to vector<8x384xbf16>
    %c0_18 = arith.constant 0 : index
    %c56 = arith.constant 56 : index
    %32 = vector.load %arg4[%c0_18, %c56] : memref<8x72xbf16, #tpu.memory_space<vmem>>, vector<8x8xbf16>
    %cst_19 = arith.constant dense<0.000000e+00> : vector<8x384xf32>
    %33 = tpu.matmul %32, %31, %cst_19 {dimension_numbers = #tpu.dot_dimension_numbers<[1], [0], [0], [1], [0, 0, 1, 1], [], []>} : vector<8x8xbf16>, vector<8x384xbf16>, vector<8x384xf32> -> vector<8x384xf32>
    %34 = arith.addf %30, %33 : vector<8x384xf32>
    %35 = vector.extract_strided_slice %3 {offsets = [0, 38], sizes = [8, 384], strides = [1, 1]} : vector<8x422xbf16> to vector<8x384xbf16>
    %c0_20 = arith.constant 0 : index
    %c64 = arith.constant 64 : index
    %36 = vector.load %arg4[%c0_20, %c64] : memref<8x72xbf16, #tpu.memory_space<vmem>>, vector<8x8xbf16>
    %cst_21 = arith.constant dense<0.000000e+00> : vector<8x384xf32>
    %37 = tpu.matmul %36, %35, %cst_21 {dimension_numbers = #tpu.dot_dimension_numbers<[1], [0], [0], [1], [0, 0, 1, 1], [], []>} : vector<8x8xbf16>, vector<8x384xbf16>, vector<8x384xf32> -> vector<8x384xf32>
    %38 = arith.addf %34, %37 : vector<8x384xf32>
    %c0_22 = arith.constant 0 : index
    %c0_23 = arith.constant 0 : index
    %39 = vector.load %arg5[%c0_22, %c0_23] : memref<8x1xf32, #tpu.memory_space<vmem>>, vector<8x1xf32>
    %40 = vector.broadcast %39 : vector<8x1xf32> to vector<8x384xf32>
    %41 = arith.addf %38, %40 : vector<8x384xf32>
    %c0_24 = arith.constant 0 : index
    %c0_25 = arith.constant 0 : index
    %42 = vector.load %arg6[%c0_24, %c0_25] : memref<1x384xf32, #tpu.memory_space<vmem>>, vector<1x384xf32>
    %43 = vector.broadcast %42 : vector<1x384xf32> to vector<8x384xf32>
    %44 = arith.mulf %41, %43 : vector<8x384xf32>
    %45 = arith.truncf %44 : vector<8x384xf32> to vector<8x384xbf16>
    %c0_26 = arith.constant 0 : index
    %c0_27 = arith.constant 0 : index
    %46 = vector.load %arg7[%c0_26, %c0_27] : memref<8x384xbf16, #tpu.memory_space<vmem>>, vector<8x384xbf16>
    tpu.vector_store %arg7[%c0_26, %c0_27], %45 {strides = array<i32>} : memref<8x384xbf16, #tpu.memory_space<vmem>>, vector<8x384xbf16>,
    return
  }
  func.func @transform_0(%arg0: i32) -> (i32, i32) {
    %c3_i32 = arith.constant 3 : i32
    %0 = arith.muli %arg0, %c3_i32 : i32
    %c1_i32 = arith.constant 1 : i32
    %1 = arith.subi %0, %c1_i32 : i32
    %c0_i32 = arith.constant 0 : i32
    %2 = arith.maxsi %1, %c0_i32 : i32
    %c0_i32_0 = arith.constant 0 : i32
    %c0_i32_1 = arith.constant 0 : i32
    return %c0_i32_0, %2 : i32, i32
  }
  func.func @transform_1(%arg0: i32) -> (i32, i32) {
    %c0_i32 = arith.constant 0 : i32
    %c0_i32_0 = arith.constant 0 : i32
    return %c0_i32, %arg0 : i32, i32
  }
  func.func @transform_2(%arg0: i32) -> (i32, i32) {
    %c1_i32 = arith.constant 1 : i32
    %0 = arith.addi %arg0, %c1_i32 : i32
    %c3_i32 = arith.constant 3 : i32
    %1 = arith.muli %0, %c3_i32 : i32
    %c5_i32 = arith.constant 5 : i32
    %2 = arith.minsi %1, %c5_i32 : i32
    %c0_i32 = arith.constant 0 : i32
    %c0_i32_0 = arith.constant 0 : i32
    return %c0_i32, %2 : i32, i32
  }
  func.func @transform_3(%arg0: i32) -> (i32, i32) {
    %c0_i32 = arith.constant 0 : i32
    %c0_i32_0 = arith.constant 0 : i32
    %c0_i32_1 = arith.constant 0 : i32
    return %c0_i32, %c0_i32_0 : i32, i32
  }
  func.func @transform_4(%arg0: i32) -> (i32, i32) {
    %c0_i32 = arith.constant 0 : i32
    %c0_i32_0 = arith.constant 0 : i32
    %c0_i32_1 = arith.constant 0 : i32
    return %c0_i32, %c0_i32_0 : i32, i32
  }
  func.func @transform_5(%arg0: i32) -> (i32, i32) {
    %c0_i32 = arith.constant 0 : i32
    %c0_i32_0 = arith.constant 0 : i32
    return %c0_i32, %arg0 : i32, i32
  }
  func.func @transform_6(%arg0: i32) -> (i32, i32) {
    %c0_i32 = arith.constant 0 : i32
    %c0_i32_0 = arith.constant 0 : i32
    return %c0_i32, %arg0 : i32, i32
  }
}

module attributes {stable_mosaic.version = 11 : i64} {
  func.func @_conv3x3_kernel(%arg0: i32, %arg1: memref<8x128xbf16, #tpu.memory_space<vmem>>, %arg2: memref<8x384xbf16, #tpu.memory_space<vmem>>, %arg3: memref<8x128xbf16, #tpu.memory_space<vmem>>, %arg4: memref<8x72xbf16, #tpu.memory_space<vmem>>, %arg5: memref<8x1xf32, #tpu.memory_space<vmem>>, %arg6: memref<1x384xf32, #tpu.memory_space<vmem>>, %arg7: memref<8x384xbf16, #tpu.memory_space<vmem>>, %arg8: memref<8x384xbf16, #tpu.memory_space<vmem>>) attributes {dimension_semantics = [#tpu.dimension_semantics<parallel>], iteration_bounds = array<i64: 2>, scalar_prefetch = 0 : i64, scratch_operands = 0 : i64, tpu.core_type = #tpu.core_type<tc>, window_params = [{transform_indices = @transform_0, window_bounds = array<i64: 8, 128>}, {transform_indices = @transform_1, window_bounds = array<i64: 8, 384>}, {transform_indices = @transform_2, window_bounds = array<i64: 8, 128>}, {pipeline_mode = #tpu.pipeline_mode<synchronous>, transform_indices = @transform_3, window_bounds = array<i64: 8, 72>}, {pipeline_mode = #tpu.pipeline_mode<synchronous>, transform_indices = @transform_4, window_bounds = array<i64: 8, 1>}, {transform_indices = @transform_5, window_bounds = array<i64: 1, 384>}, {transform_indices = @transform_6, window_bounds = array<i64: 8, 384>}, {transform_indices = @transform_7, window_bounds = array<i64: 8, 384>}]} {
    %c0 = arith.constant 0 : index
    %c109 = arith.constant 109 : index
    %0 = vector.load %arg1[%c0, %c109] : memref<8x128xbf16, #tpu.memory_space<vmem>>, vector<8x19xbf16>
    %c0_0 = arith.constant 0 : index
    %c0_1 = arith.constant 0 : index
    %1 = vector.load %arg2[%c0_0, %c0_1] : memref<8x384xbf16, #tpu.memory_space<vmem>>, vector<8x384xbf16>
    %c0_2 = arith.constant 0 : index
    %c0_3 = arith.constant 0 : index
    %2 = vector.load %arg3[%c0_2, %c0_3] : memref<8x128xbf16, #tpu.memory_space<vmem>>, vector<8x19xbf16>
    %3 = tpu.concatenate %0, %1, %2 in 1 : vector<8x19xbf16>, vector<8x384xbf16>, vector<8x19xbf16> -> vector<8x422xbf16>
    %4 = vector.extract_strided_slice %3 {offsets = [0, 0], sizes = [8, 384], strides = [1, 1]} : vector<8x422xbf16> to vector<8x384xbf16>
    %c0_4 = arith.constant 0 : index
    %c0_5 = arith.constant 0 : index
    %5 = vector.load %arg4[%c0_4, %c0_5] : memref<8x72xbf16, #tpu.memory_space<vmem>>, vector<8x8xbf16>
    %cst = arith.constant dense<0.000000e+00> : vector<8x384xf32>
    %6 = tpu.matmul %5, %4, %cst {dimension_numbers = #tpu.dot_dimension_numbers<[1], [0], [0], [1], [0, 0, 1, 1], [], []>} : vector<8x8xbf16>, vector<8x384xbf16>, vector<8x384xf32> -> vector<8x384xf32>
    %7 = vector.extract_strided_slice %3 {offsets = [0, 1], sizes = [8, 384], strides = [1, 1]} : vector<8x422xbf16> to vector<8x384xbf16>
    %c0_6 = arith.constant 0 : index
    %c8 = arith.constant 8 : index
    %8 = vector.load %arg4[%c0_6, %c8] : memref<8x72xbf16, #tpu.memory_space<vmem>>, vector<8x8xbf16>
    %cst_7 = arith.constant dense<0.000000e+00> : vector<8x384xf32>
    %9 = tpu.matmul %8, %7, %cst_7 {dimension_numbers = #tpu.dot_dimension_numbers<[1], [0], [0], [1], [0, 0, 1, 1], [], []>} : vector<8x8xbf16>, vector<8x384xbf16>, vector<8x384xf32> -> vector<8x384xf32>
    %10 = arith.addf %6, %9 : vector<8x384xf32>
    %11 = vector.extract_strided_slice %3 {offsets = [0, 2], sizes = [8, 384], strides = [1, 1]} : vector<8x422xbf16> to vector<8x384xbf16>
    %c0_8 = arith.constant 0 : index
    %c16 = arith.constant 16 : index
    %12 = vector.load %arg4[%c0_8, %c16] : memref<8x72xbf16, #tpu.memory_space<vmem>>, vector<8x8xbf16>
    %cst_9 = arith.constant dense<0.000000e+00> : vector<8x384xf32>
    %13 = tpu.matmul %12, %11, %cst_9 {dimension_numbers = #tpu.dot_dimension_numbers<[1], [0], [0], [1], [0, 0, 1, 1], [], []>} : vector<8x8xbf16>, vector<8x384xbf16>, vector<8x384xf32> -> vector<8x384xf32>
    %14 = arith.addf %10, %13 : vector<8x384xf32>
    %15 = vector.extract_strided_slice %3 {offsets = [0, 18], sizes = [8, 384], strides = [1, 1]} : vector<8x422xbf16> to vector<8x384xbf16>
    %c0_10 = arith.constant 0 : index
    %c24 = arith.constant 24 : index
    %16 = vector.load %arg4[%c0_10, %c24] : memref<8x72xbf16, #tpu.memory_space<vmem>>, vector<8x8xbf16>
    %cst_11 = arith.constant dense<0.000000e+00> : vector<8x384xf32>
    %17 = tpu.matmul %16, %15, %cst_11 {dimension_numbers = #tpu.dot_dimension_numbers<[1], [0], [0], [1], [0, 0, 1, 1], [], []>} : vector<8x8xbf16>, vector<8x384xbf16>, vector<8x384xf32> -> vector<8x384xf32>
    %18 = arith.addf %14, %17 : vector<8x384xf32>
    %19 = vector.extract_strided_slice %3 {offsets = [0, 19], sizes = [8, 384], strides = [1, 1]} : vector<8x422xbf16> to vector<8x384xbf16>
    %c0_12 = arith.constant 0 : index
    %c32 = arith.constant 32 : index
    %20 = vector.load %arg4[%c0_12, %c32] : memref<8x72xbf16, #tpu.memory_space<vmem>>, vector<8x8xbf16>
    %cst_13 = arith.constant dense<0.000000e+00> : vector<8x384xf32>
    %21 = tpu.matmul %20, %19, %cst_13 {dimension_numbers = #tpu.dot_dimension_numbers<[1], [0], [0], [1], [0, 0, 1, 1], [], []>} : vector<8x8xbf16>, vector<8x384xbf16>, vector<8x384xf32> -> vector<8x384xf32>
    %22 = arith.addf %18, %21 : vector<8x384xf32>
    %23 = vector.extract_strided_slice %3 {offsets = [0, 20], sizes = [8, 384], strides = [1, 1]} : vector<8x422xbf16> to vector<8x384xbf16>
    %c0_14 = arith.constant 0 : index
    %c40 = arith.constant 40 : index
    %24 = vector.load %arg4[%c0_14, %c40] : memref<8x72xbf16, #tpu.memory_space<vmem>>, vector<8x8xbf16>
    %cst_15 = arith.constant dense<0.000000e+00> : vector<8x384xf32>
    %25 = tpu.matmul %24, %23, %cst_15 {dimension_numbers = #tpu.dot_dimension_numbers<[1], [0], [0], [1], [0, 0, 1, 1], [], []>} : vector<8x8xbf16>, vector<8x384xbf16>, vector<8x384xf32> -> vector<8x384xf32>
    %26 = arith.addf %22, %25 : vector<8x384xf32>
    %27 = vector.extract_strided_slice %3 {offsets = [0, 36], sizes = [8, 384], strides = [1, 1]} : vector<8x422xbf16> to vector<8x384xbf16>
    %c0_16 = arith.constant 0 : index
    %c48 = arith.constant 48 : index
    %28 = vector.load %arg4[%c0_16, %c48] : memref<8x72xbf16, #tpu.memory_space<vmem>>, vector<8x8xbf16>
    %cst_17 = arith.constant dense<0.000000e+00> : vector<8x384xf32>
    %29 = tpu.matmul %28, %27, %cst_17 {dimension_numbers = #tpu.dot_dimension_numbers<[1], [0], [0], [1], [0, 0, 1, 1], [], []>} : vector<8x8xbf16>, vector<8x384xbf16>, vector<8x384xf32> -> vector<8x384xf32>
    %30 = arith.addf %26, %29 : vector<8x384xf32>
    %31 = vector.extract_strided_slice %3 {offsets = [0, 37], sizes = [8, 384], strides = [1, 1]} : vector<8x422xbf16> to vector<8x384xbf16>
    %c0_18 = arith.constant 0 : index
    %c56 = arith.constant 56 : index
    %32 = vector.load %arg4[%c0_18, %c56] : memref<8x72xbf16, #tpu.memory_space<vmem>>, vector<8x8xbf16>
    %cst_19 = arith.constant dense<0.000000e+00> : vector<8x384xf32>
    %33 = tpu.matmul %32, %31, %cst_19 {dimension_numbers = #tpu.dot_dimension_numbers<[1], [0], [0], [1], [0, 0, 1, 1], [], []>} : vector<8x8xbf16>, vector<8x384xbf16>, vector<8x384xf32> -> vector<8x384xf32>
    %34 = arith.addf %30, %33 : vector<8x384xf32>
    %35 = vector.extract_strided_slice %3 {offsets = [0, 38], sizes = [8, 384], strides = [1, 1]} : vector<8x422xbf16> to vector<8x384xbf16>
    %c0_20 = arith.constant 0 : index
    %c64 = arith.constant 64 : index
    %36 = vector.load %arg4[%c0_20, %c64] : memref<8x72xbf16, #tpu.memory_space<vmem>>, vector<8x8xbf16>
    %cst_21 = arith.constant dense<0.000000e+00> : vector<8x384xf32>
    %37 = tpu.matmul %36, %35, %cst_21 {dimension_numbers = #tpu.dot_dimension_numbers<[1], [0], [0], [1], [0, 0, 1, 1], [], []>} : vector<8x8xbf16>, vector<8x384xbf16>, vector<8x384xf32> -> vector<8x384xf32>
    %38 = arith.addf %34, %37 : vector<8x384xf32>
    %c0_22 = arith.constant 0 : index
    %c0_23 = arith.constant 0 : index
    %39 = vector.load %arg5[%c0_22, %c0_23] : memref<8x1xf32, #tpu.memory_space<vmem>>, vector<8x1xf32>
    %40 = vector.broadcast %39 : vector<8x1xf32> to vector<8x384xf32>
    %41 = arith.addf %38, %40 : vector<8x384xf32>
    %c0_24 = arith.constant 0 : index
    %c0_25 = arith.constant 0 : index
    %42 = vector.load %arg7[%c0_24, %c0_25] : memref<8x384xbf16, #tpu.memory_space<vmem>>, vector<8x384xbf16>
    %43 = arith.extf %42 : vector<8x384xbf16> to vector<8x384xf32>
    %44 = arith.addf %41, %43 : vector<8x384xf32>
    %c0_26 = arith.constant 0 : index
    %c0_27 = arith.constant 0 : index
    %45 = vector.load %arg6[%c0_26, %c0_27] : memref<1x384xf32, #tpu.memory_space<vmem>>, vector<1x384xf32>
    %46 = vector.broadcast %45 : vector<1x384xf32> to vector<8x384xf32>
    %47 = arith.mulf %44, %46 : vector<8x384xf32>
    %48 = arith.truncf %47 : vector<8x384xf32> to vector<8x384xbf16>
    %c0_28 = arith.constant 0 : index
    %c0_29 = arith.constant 0 : index
    %49 = vector.load %arg8[%c0_28, %c0_29] : memref<8x384xbf16, #tpu.memory_space<vmem>>, vector<8x384xbf16>
    tpu.vector_store %arg8[%c0_28, %c0_29], %48 {strides = array<i32>} : memref<8x384xbf16, #tpu.memory_space<vmem>>, vector<8x384xbf16>,
    return
  }
  func.func @transform_0(%arg0: i32) -> (i32, i32) {
    %c3_i32 = arith.constant 3 : i32
    %0 = arith.muli %arg0, %c3_i32 : i32
    %c1_i32 = arith.constant 1 : i32
    %1 = arith.subi %0, %c1_i32 : i32
    %c0_i32 = arith.constant 0 : i32
    %2 = arith.maxsi %1, %c0_i32 : i32
    %c0_i32_0 = arith.constant 0 : i32
    %c0_i32_1 = arith.constant 0 : i32
    return %c0_i32_0, %2 : i32, i32
  }
  func.func @transform_1(%arg0: i32) -> (i32, i32) {
    %c0_i32 = arith.constant 0 : i32
    %c0_i32_0 = arith.constant 0 : i32
    return %c0_i32, %arg0 : i32, i32
  }
  func.func @transform_2(%arg0: i32) -> (i32, i32) {
    %c1_i32 = arith.constant 1 : i32
    %0 = arith.addi %arg0, %c1_i32 : i32
    %c3_i32 = arith.constant 3 : i32
    %1 = arith.muli %0, %c3_i32 : i32
    %c5_i32 = arith.constant 5 : i32
    %2 = arith.minsi %1, %c5_i32 : i32
    %c0_i32 = arith.constant 0 : i32
    %c0_i32_0 = arith.constant 0 : i32
    return %c0_i32, %2 : i32, i32
  }
  func.func @transform_3(%arg0: i32) -> (i32, i32) {
    %c0_i32 = arith.constant 0 : i32
    %c0_i32_0 = arith.constant 0 : i32
    %c0_i32_1 = arith.constant 0 : i32
    return %c0_i32, %c0_i32_0 : i32, i32
  }
  func.func @transform_4(%arg0: i32) -> (i32, i32) {
    %c0_i32 = arith.constant 0 : i32
    %c0_i32_0 = arith.constant 0 : i32
    %c0_i32_1 = arith.constant 0 : i32
    return %c0_i32, %c0_i32_0 : i32, i32
  }
  func.func @transform_5(%arg0: i32) -> (i32, i32) {
    %c0_i32 = arith.constant 0 : i32
    %c0_i32_0 = arith.constant 0 : i32
    return %c0_i32, %arg0 : i32, i32
  }
  func.func @transform_6(%arg0: i32) -> (i32, i32) {
    %c0_i32 = arith.constant 0 : i32
    %c0_i32_0 = arith.constant 0 : i32
    return %c0_i32, %arg0 : i32, i32
  }
  func.func @transform_7(%arg0: i32) -> (i32, i32) {
    %c0_i32 = arith.constant 0 : i32
    %c0_i32_0 = arith.constant 0 : i32
    return %c0_i32, %arg0 : i32, i32
  }
}

</mosaic_0001>

<bundles_post_ra>
// kernel: tile.23
= control target key start
LH: loop header
LB: loop body
LE: loop exit
PB: predicated region body
PF: predicated region fallthrough
CT: control target
= control target key end

     0   :  { %s22_s0 = inlined_call_operand.vmem [shape: f32[3], index: 0, kind: input, shape index: {}]   ;;  %s23_s1 = inlined_call_operand.vmem [shape: f32[3,3], index: 1, kind: output, shape index: {}]  }
   0x1   :  { %v4_v0 = vld [vmem:[%s22_s0] ss:$0 sm:$0xff] }
   0x2   :  { %5 = vst [vmem:[%s23_s1] sm:$0xf] %v4_v0 }

// kernel: dgg_forward.13
= control target key start
LH: loop header
LB: loop body
LE: loop exit
PB: predicated region body
PF: predicated region fallthrough
CT: control target
= control target key end

     0   :  { %s5033_s0 = inlined_call_operand.vmem [shape: bf16[8,768], index: 0, kind: input, shape index: {}, may-alias: {0,1,2}]   ;;  %s5034_s1 = inlined_call_operand.vmem [shape: bf16[8,768], index: 1, kind: input, shape index: {}, may-alias: {0,1,2}]   ;;  %s5035_s2 = inlined_call_operand.vmem [shape: bf16[8,768], index: 2, kind: input, shape index: {}, may-alias: {0,1,2}]   ;;  %s5036_s3 = inlined_call_operand.vmem [shape: bf16[8,768], index: 3, kind: input, shape index: {}, may-alias: {3,4,5}]   ;;  %s5037_s4 = inlined_call_operand.vmem [shape: bf16[8,768], index: 4, kind: input, shape index: {}, may-alias: {3,4,5}]   ;;  %s5038_s5 = inlined_call_operand.vmem [shape: bf16[8,768], index: 5, kind: input, shape index: {}, may-alias: {3,4,5}]   ;;  %s5039_s6 = inlined_call_operand.vmem [shape: bf16[27,72], index: 6, kind: input, shape index: {}]   ;;  %s5040_s7 = inlined_call_operand.vmem [shape: bf16[27,72], index: 7, kind: input, shape index: {}]   ;;  %s5041_s8 = inlined_call_operand.vmem [shape: f32[27,1], index: 8, kind: input, shape index: {}]   ;;  %s5042_s9 = inlined_call_operand.vmem [shape: f32[9,768], index: 9, kind: output, shape index: {0}]   ;;  %s5043_s10 = inlined_call_operand.vmem [shape: f32[9,768], index: 10, kind: output, shape index: {1}]   ;;  %s5044_s11 = inlined_call_operand.vmem [shape: f32[9,768], index: 11, kind: output, shape index: {2}]  }
   0x1   :  { %5045 = sst [smem:[#allocation6_spill]] %s5037_s4 }
   0x2   :  { %s4295_s17 = smov 0   ;;  %s4297_s18 = smov 0  }
   0x3   :  { %s4299_s19 = smov 0  }
   0x4 LB: > { %s4308_s20 = sadd.s32 4294967295, %s4215_s19   ;;  %s4310_s21 = sadd.s32 1, %s4215_s19   ;;  %s4215_s19 = sphi %s4299_s19, %s5052_s19   ;;  %s4211_s18 = sphi %s4297_s18, %s5051_s18   ;;  %s4207_s17 = sphi %s4295_s17, %s5050_s17  }
   0x5   : > { %s277_s22 = ssub.s32 %s4215_s19, %s4310_s21  ;;  %s280_s23 = sadd.s32 1, %s4211_s18 }
   0x6   : > { %p278_p0 = scmp.eq.s32.totalorder %s277_s22, 0  ;;  %p290_p1 = scmp.ne.s32.totalorder %s4211_s18, %s4207_s17 }
   0x7   : > { %p291_p2 = scmp.eq.s32.totalorder %s4308_s20, 1  ;;  %p3577_p3 = scmp.ge.s32.totalorder %s4215_s19, 1 }
   0x8   : > { %s4318_s24 = scalar_select %p278_p0, %s4211_s18, %s280_s23  }
   0x9   : > { %p4320_p4 = por %p291_p2, %p290_p1  ;;  %p454_p5 = scmp.lt.s32.totalorder %s4215_s19, 3 }
   0xa   : > { %5046 = sst [smem:[#allocation5_spill]] %s4318_s24 }
   0xb   : > { %p455_p6 = pnand %p3577_p3, %p454_p5 }
   0xc   : > { %s538_s26 = smul.u32 (!%p455_p6), 3, %s4308_s20  ;;  %s556_s27 = sadd.s32 (!%p455_p6), 1, %s4308_s20  ;;  %v4218_v4 = vmov (!%p455_p6), 0   ;;  %v4367_v13 = vld [vmem:[%s5040_s7] sm:$0xff] (!%p455_p6)   ;;  %vm625_vm0 = vcmask (!%p455_p6), 154624   ;;  %vm701_vm1 = vcmask (!%p455_p6), 1043456  }
   0xd   : > { %458 = sbr.rel (%p455_p6) target bundleno = 753 (0x2f1), region = 56  ;;  %s5048_s4 = sld [smem:[#allocation6_spill]] (!%p455_p6)  ;;  %742 = vmatprep.mubr.bf16.mxu1 (!%p455_p6), %v4218_v4  ;;  %1282 = vmatprep.mubr.bf16.mxu0 (!%p455_p6), %v4218_v4  ;;  %vm694_vm2 = vcmask (!%p455_p6), 64512   ;;  %v4414_v29 = vld [vmem:[%s5040_s7 + $0x8] sm:$0x3f] (!%p455_p6)   ;;  %v4421_v30 = vld [vmem:[%s5039_s6] sm:$0xff] (!%p455_p6)  }
   0xe   : > { %p551_p7 = scmp.lt.s32.totalorder (!%p455_p6), %s538_s26, 5  ;;  %s3578_s28 = sadd.s32 (!%p455_p6), 4294967295, %s538_s26  ;;  %4153 = vset.pattern.permute.xlu0 (!%p455_p6), %v4218_v4  ;;  %4154 = vset.pattern.permute.xlu1 (!%p455_p6), %v4218_v4  ;;  %v4441_v32 = vld [vmem:[%s5039_s6 + $0x8] sm:$0x3f] (!%p455_p6)   ;;  %vm1231_vm3 = vcmask (!%p455_p6), 1031168   ;;  %vm952_vm4 = vcmask (!%p455_p6), 1039360  }
   0xf   : > { %p540_p8 = scmp.gt.s32.totalorder (!%p455_p6), %s3578_s28, 0  ;;  %p3579_p9 = scmp.lt.s32.totalorder (!%p455_p6), %s3578_s28, 5  ;;  %vm1508_vm5 = vcmask (!%p455_p6), 900096   ;;  %vm1785_vm6 = vcmask (!%p455_p6), 891904   ;;  %vm2062_vm7 = vcmask (!%p455_p6), 883712   ;;  %vm2339_vm8 = vcmask (!%p455_p6), 752640  }
  0x10   : > { %s557_s30 = smul.u32 (!%p455_p6), 3, %s556_s27  ;;  %s4217_s23 = smov (!%p455_p6), 19   ;;  %vm2616_vm9 = vcmask (!%p455_p6), 744448   ;;  %vm2893_vm10 = vcmask (!%p455_p6), 736256   ;;  %vm3206_vm11 = vcmask (!%p455_p6), 1046528   ;;  %vm3270_vm12 = vcmask (!%p455_p6), 1045504  }
  0x11   : > { %s4219_s27 = smov (!%p455_p6), 112   ;;  %s4223_s16 = smov (!%p455_p6), 110  }
  0x12   : > { %p558_p10 = scmp.lt.s32.totalorder (!%p455_p6), %s557_s30, 5  ;;  %s4231_s12 = smov (!%p455_p6), 91  }
  0x13   : > { %s4232_s13 = smov (!%p455_p6), 72  }
  0x14   : > { %s5054_s26 = smov (!%p551_p7, %s538_s26), 5  ;;  %s5056_s28 = smov (!%p540_p8, %s3578_s28), 0 }
  0x15   : > { %s3585_s29 = sshll.u32 %s5054_s26, 2  ;;  %s5058_s28 = smov (!%p3579_p9, %s5056_s28), 5 }
  0x16   : > { %s584_s14 = scalar_lea.vmem %s5048_s4, %s3585_s29  ;;  %s4332_s19 = scalar_lea.vmem %s5034_s1, %s3585_s29 }
  0x17   : > { %v641_v0 = vld [vmem:[%s584_s14] sm:$0xff]  ;;  %s3584_s22 = sshll.u32 %s5058_s28, 2  ;;  %v4158_v2 = vld [vmem:[%s584_s14 + $0x8] ss:$0 sps:$4 sm:$0xff]  }
  0x18   : > { %v3609_v1 = vcombine.high %v641_v0, %v641_v0  ;;  %s575_s24 = scalar_lea.vmem %s5036_s3, %s3584_s22  ;;  %s545_s4 = scalar_lea.vmem %s5033_s0, %s3584_s22  ;;  %v603_v3 = vld [vmem:[%s4332_s19] sm:$0xff]  ;;  %v3608_v6 = vcombine.low %v641_v0, %v641_v0  ;;  %v4161_v9 = vld [vmem:[%s4332_s19 + $0x8] ss:$0 sps:$4 sm:$0xff]  }
  0x19   : > { %v4157_v5 = vld [vmem:[%s575_s24] ss:$0 sps:$4 sm:$0xff]   ;;  %s559_s28 = scalar_select %p558_p10, %s557_s30, 5  ;;  %v3603_v7 = vcombine.low %v603_v3, %v603_v3  ;;  %v3604_v10 = vcombine.high %v603_v3, %v603_v3 }
  0x1a   : > { %659 = vrot.lane.b32.xlu1 %v3609_v1, %s4217_s23  ;;  %647 = vrot.lane.b32.xlu0 %v4157_v5, %s4217_s23  ;;  %v4160_v8 = vld [vmem:[%s545_s4] ss:$0 sps:$4 sm:$0xff]   ;;  %s4220_s19 = smov 126   ;;  %s4222_s24 = smov 120  }
  0x1b   : > { %s5060_s28 = smov (!%p558_p10, %s559_s28), 5  ;;  %s4224_s22 = smov 104  }
  0x1c   : > { %s3589_s29 = sshll.u32 %s5060_s28, 2  ;;  %s4226_s4 = smov 96  }
  0x1d   : > { %s563_s15 = scalar_lea.vmem %s5035_s2, %s3589_s29  ;;  %s593_s26 = scalar_lea.vmem %s5038_s5, %s3589_s29 }
  0x1e   : > { %661 = vrot.lane.b32.xlu1 %v4158_v2, %s4217_s23  ;;  %657 = vrot.lane.b32.xlu0 %v3608_v6, %s4217_s23  ;;  %v4163_v11 = vld [vmem:[%s563_s15] ss:$0 sps:$4 sm:$0xff]   ;;  %s4227_s30 = smov 108   ;;  %s4233_s28 = smov 90  }
  0x1f   : > { %v4164_v12 = vld [vmem:[%s593_s26] ss:$0 sps:$4 sm:$0xff]   ;;  %s4225_s26 = smov 109   ;;  %s4234_s29 = smov 64  }
  0x22   : > { %619 = vrot.lane.b32.xlu1 %v3603_v7, %s4217_s23  ;;  %609 = vrot.lane.b32.xlu0 %v4160_v8, %s4217_s23 }
  0x26   : > { %623 = vrot.lane.b32.xlu1 %v4161_v9, %s4217_s23  ;;  %621 = vrot.lane.b32.xlu0 %v3604_v10, %s4217_s23 }
  0x2a   : > { %631 = vrot.lane.b32.xlu1 %v4163_v11, %s4217_s23  ;;  %668 = vrot.lane.b32.xlu0 %v4164_v12, %s4217_s23  ;;  %s4221_s23 = smov 127  }
  0x2e   : > { %1219 = vrot.lane.b32.xlu0 %v4367_v13, %s4219_s27 }
  0x8c   : > { %v660_v14 = vpop.permute.xlu1 %659  ;;  %v648_v15 = vpop.permute.xlu0 %647 }
  0x90   : > { %v662_v16 = vpop.permute.xlu1 %661  ;;  %v658_v18 = vpop.permute.xlu0 %657 }
  0x91   : > { %v4372_v17 = vsel %vm625_vm0, %v660_v14, %v662_v16  ;;  %v4377_v19 = vsel %vm625_vm0, %v658_v18, %v660_v14  ;;  %v4380_v20 = vsel %vm625_vm0, %v648_v15, %v658_v18 }
  0x92   : > { %1227 = vrot.lane.b32.xlu0 %v4372_v17, %s4220_s19  ;;  %1225 = vrot.lane.b32.xlu1 %v4377_v19, %s4220_s19  ;;  %v702_v21 = vsel %vm701_vm1, %v4380_v20, 0  ;;  %v708_v24 = vsel %vm701_vm1, %v4372_v17, 0 }
  0x93   : > { %3614 = vmatprep.subr.msk.bf16.mxu1 %vm701_vm1, %v4377_v19 }
  0x94   : > { %v620_v22 = vpop.permute.xlu1 %619  ;;  %711 = vmatpush1.bf16.msra.mxu1 %v702_v21  ;;  %v610_v23 = vpop.permute.xlu0 %609 }
  0x95   : > { %4092 = vmatprep.subr.msk.bf16.mxu1 %vm701_vm1, %v4372_v17  ;;  %v4432_v31 = vsel %vm625_vm0, %v610_v23, %v620_v22 }
  0x96   : > { %946 = vrot.lane.b32.xlu0 %v4377_v19, %s4221_s23  ;;  %948 = vrot.lane.b32.xlu1 %v4372_v17, %s4221_s23  ;;  %v828_v34 = vsel %vm701_vm1, %v4432_v31, 0 }
  0x97   : > { %3615 = vmatmul.mubr.msk.bf16.vlgmr.msra.gmra.mrb[0].mxu1 %vm694_vm2, %v4367_v13 }
  0x98   : > { %3779 = vmatpush3.bf16.msra.mxu1 %v708_v24  ;;  %v624_v25 = vpop.permute.xlu1 %623  ;;  %v622_v26 = vpop.permute.xlu0 %621  ;;  %752 = vmatprep.mubr.bf16.mxu1 %v4218_v4 }
  0x99   : > { %v4402_v27 = vsel %vm625_vm0, %v620_v22, %v622_v26  ;;  %v4405_v28 = vsel %vm625_vm0, %v622_v26, %v624_v25 }
  0x9a   : > { %1223 = vrot.lane.b32.xlu0 %v4380_v20, %s4220_s19  ;;  %944 = vrot.lane.b32.xlu1 %v4380_v20, %s4221_s23  ;;  %v834_v36 = vsel %vm701_vm1, %v4405_v28, 0 }
  0x9b   : > { %3621 = vmatprep.subr.msk.bf16.mxu1 %vm701_vm1, %v4402_v27 }
  0x9c   : > { %v669_v33 = vpop.permute.xlu0 %668  ;;  %v632_v37 = vpop.permute.xlu1 %631 }
  0x9d   : > { %v4455_v35 = vsel %vm625_vm0, %v662_v16, %v669_v33  ;;  %v4492_v38 = vsel %vm625_vm0, %v624_v25, %v632_v37 }
  0x9e   : > { %1360 = vrot.lane.b32.xlu0 %v4405_v28, %s4220_s19  ;;  %938 = vrot.lane.b32.xlu1 %v4367_v13, %s4222_s24 }
  0x9f   : > { %3616 = vmatmul.mubr.msk.bf16.gmra.mrb[4].mxu1 %vm694_vm2, %v4414_v29 }
  0xa0   : > { %3780 = vmatprep.mubr.msk.bf16.mxu1 %vm694_vm2, %v4367_v13  ;;  %v4538_v39 = vpop.permute.xlu0 %1219 }
  0xa2   : > { %1352 = vrot.lane.b32.xlu0 %v4421_v30, %s4219_s27  ;;  %1358 = vrot.lane.b32.xlu1 %v4402_v27, %s4220_s19 }
  0xa6   : > { %1356 = vrot.lane.b32.xlu0 %v4432_v31, %s4220_s19  ;;  %940 = vrot.lane.b32.xlu1 %v4414_v29, %s4222_s24 }
  0xa7   : > { %3781 = vmatmul.mubr.msk.bf16.vlgmr.msra.gmra.mrb[8].mxu1 %vm694_vm2, %v4414_v29 }
  0xa8   : > { %837 = vmatpush1.bf16.msra.mxu1 %v828_v34  ;;  %868 = vmatprep.mubr.bf16.mxu1 %v4218_v4 }
  0xa9   : > { %4093 = vmatprep.subr.msk.bf16.mxu1 %vm701_vm1, %v4405_v28 }
  0xaa   : > { %1354 = vrot.lane.b32.xlu0 %v4441_v32, %s4219_s27  ;;  %950 = vrot.lane.b32.xlu1 %v4455_v35, %s4221_s23 }
  0xae   : > { %1081 = vrot.lane.b32.xlu0 %v4402_v27, %s4221_s23  ;;  %1083 = vrot.lane.b32.xlu1 %v4405_v28, %s4221_s23 }
  0xaf   : > { %3622 = vmatmul.mubr.msk.bf16.vlgmr.msra.gmra.mrb[0].mxu1 %vm694_vm2, %v4421_v30 }
  0xb0   : > { %3785 = vmatpush3.bf16.msra.mxu1 %v834_v36  ;;  %878 = vmatprep.mubr.bf16.mxu1 %v4218_v4 }
  0xb2   : > { %1504 = vrot.lane.b32.xlu0 %v4372_v17, %s4223_s16  ;;  %1079 = vrot.lane.b32.xlu1 %v4432_v31, %s4221_s23 }
  0xb6   : > { %1500 = vrot.lane.b32.xlu0 %v4380_v20, %s4223_s16  ;;  %1502 = vrot.lane.b32.xlu1 %v4377_v19, %s4223_s16 }
  0xb7   : > { %3623 = vmatmul.mubr.msk.bf16.gmra.mrb[4].mxu1 %vm694_vm2, %v4441_v32 }
  0xb8   : > { %3786 = vmatprep.mubr.msk.bf16.mxu1 %vm694_vm2, %v4421_v30 }
  0xba   : > { %1496 = vrot.lane.b32.xlu0 %v4367_v13, %s4224_s22  ;;  %1073 = vrot.lane.b32.xlu1 %v4421_v30, %s4222_s24 }
  0xbe   : > { %1498 = vrot.lane.b32.xlu0 %v4414_v29, %s4224_s22  ;;  %1075 = vrot.lane.b32.xlu1 %v4441_v32, %s4222_s24 }
  0xbf   : > { %3787 = vmatmul.mubr.msk.bf16.vlgmr.msra.gmra.mrb[8].mxu1 %vm694_vm2, %v4441_v32 }
  0xc0   : > { %1003 = vmatprep.mubr.bf16.mxu1 %v4218_v4 }
  0xc2   : > { %1633 = vrot.lane.b32.xlu0 %v4432_v31, %s4223_s16  ;;  %1085 = vrot.lane.b32.xlu1 %v4492_v38, %s4221_s23  ;;  %s4230_s23 = smov 80  }
  0xc6   : > { %1637 = vrot.lane.b32.xlu0 %v4405_v28, %s4223_s16  ;;  %1635 = vrot.lane.b32.xlu1 %v4402_v27, %s4223_s16 }
  0xca   : > { %1221 = vrot.lane.b32.xlu0 %v4414_v29, %s4219_s27  ;;  %1629 = vrot.lane.b32.xlu1 %v4421_v30, %s4224_s22  ;;  %s4228_s27 = smov 88  }
  0xce   : > { %1229 = vrot.lane.b32.xlu0 %v4455_v35, %s4220_s19  ;;  %1631 = vrot.lane.b32.xlu1 %v4441_v32, %s4224_s22 }
  0xd2   : > { %1779 = vrot.lane.b32.xlu0 %v4377_v19, %s4225_s26  ;;  %1777 = vrot.lane.b32.xlu1 %v4380_v20, %s4225_s26 }
  0xd6   : > { %1773 = vrot.lane.b32.xlu0 %v4367_v13, %s4226_s4  ;;  %1781 = vrot.lane.b32.xlu1 %v4372_v17, %s4225_s26 }
  0xda   : > { %1775 = vrot.lane.b32.xlu0 %v4414_v29, %s4226_s4  ;;  %1362 = vrot.lane.b32.xlu1 %v4492_v38, %s4220_s19  ;;  %s4229_s19 = smov 92  }
  0xde   : > { %1912 = vrot.lane.b32.xlu0 %v4402_v27, %s4225_s26  ;;  %1910 = vrot.lane.b32.xlu1 %v4432_v31, %s4225_s26 }
  0xe2   : > { %1906 = vrot.lane.b32.xlu0 %v4421_v30, %s4226_s4  ;;  %1914 = vrot.lane.b32.xlu1 %v4405_v28, %s4225_s26 }
  0xe6   : > { %1908 = vrot.lane.b32.xlu0 %v4441_v32, %s4226_s4  ;;  %1506 = vrot.lane.b32.xlu1 %v4455_v35, %s4223_s16 }
  0xea   : > { %2056 = vrot.lane.b32.xlu0 %v4377_v19, %s4227_s30  ;;  %2054 = vrot.lane.b32.xlu1 %v4380_v20, %s4227_s30 }
  0xee   : > { %1639 = vrot.lane.b32.xlu0 %v4492_v38, %s4223_s16  ;;  %2058 = vrot.lane.b32.xlu1 %v4372_v17, %s4227_s30 }
  0xf2   : > { %2052 = vrot.lane.b32.xlu0 %v4414_v29, %s4228_s27  ;;  %2050 = vrot.lane.b32.xlu1 %v4367_v13, %s4228_s27 }
  0xf6   : > { %2187 = vrot.lane.b32.xlu0 %v4432_v31, %s4227_s30  ;;  %1783 = vrot.lane.b32.xlu1 %v4455_v35, %s4225_s26 }
  0xfa   : > { %2191 = vrot.lane.b32.xlu0 %v4405_v28, %s4227_s30  ;;  %2189 = vrot.lane.b32.xlu1 %v4402_v27, %s4227_s30 }
  0xfe   : > { %1916 = vrot.lane.b32.xlu0 %v4492_v38, %s4225_s26  ;;  %2183 = vrot.lane.b32.xlu1 %v4421_v30, %s4228_s27 }
 0x102   : > { %2331 = vrot.lane.b32.xlu0 %v4380_v20, %s4229_s19  ;;  %2185 = vrot.lane.b32.xlu1 %v4441_v32, %s4228_s27  ;;  %s523_s27 = sand.u32 1, %s4207_s17  }
 0x104   : > { %v4543_v40 = vpop.permute.xlu0 %1227  ;;  %v1226_v41 = vpop.permute.xlu1 %1225 }
 0x105   : > { %v4550_v43 = vsel %vm1231_vm3, %v1226_v41, %v4543_v40 }
 0x106   : > { %2335 = vrot.lane.b32.xlu0 %v4372_v17, %s4229_s19  ;;  %2333 = vrot.lane.b32.xlu1 %v4377_v19, %s4229_s19 }
 0x107   : > { %3636 = vmatprep.subr.msk.bf16.mxu0 %vm701_vm1, %v4550_v43 }
 0x108   : > { %v947_v42 = vpop.permute.xlu0 %946  ;;  %v949_v44 = vpop.permute.xlu1 %948 }
 0x109   : > { %v954_v45 = vsel %vm952_vm4, %v947_v42, %v949_v44 }
 0x10a   : > { %2060 = vrot.lane.b32.xlu0 %v4455_v35, %s4227_s30  ;;  %2327 = vrot.lane.b32.xlu1 %v4367_v13, %s4230_s23 }
 0x10b   : > { %3626 = vmatprep.subr.msk.bf16.mxu1 %vm701_vm1, %v954_v45 }
 0x10c   : > { %v1224_v46 = vpop.permute.xlu0 %1223  ;;  %v945_v49 = vpop.permute.xlu1 %944 }
 0x10d   : > { %v1232_v47 = vsel %vm1231_vm3, %v1224_v46, %v1226_v41  ;;  %v953_v50 = vsel %vm952_vm4, %v945_v49, %v947_v42 }
 0x10e   : > { %2464 = vrot.lane.b32.xlu0 %v4432_v31, %s4229_s19  ;;  %v4566_v48 = vsel %vm701_vm1, %v1232_v47, 0  ;;  %v963_v52 = vsel %vm701_vm1, %v953_v50, 0  ;;  %2329 = vrot.lane.b32.xlu1 %v4414_v29, %s4230_s23 }
 0x10f   : > { %1251 = vmatpush1.bf16.msra.mxu0 %v4566_v48  ;;  %972 = vmatpush1.bf16.msra.mxu1 %v963_v52 }
 0x110   : > { %v4570_v51 = vpop.permute.xlu0 %1360  ;;  %v939_v53 = vpop.permute.xlu1 %938 }
 0x112   : > { %2468 = vrot.lane.b32.xlu0 %v4405_v28, %s4229_s19  ;;  %3637 = vmatmul.mubr.msk.bf16.vlgmr.msra.gmra.mrb[0].mxu0 %vm694_vm2, %v4538_v39 }
 0x113   : > { %1414 = vmatprep.mubr.bf16.mxu0 %v4218_v4  ;;  %2466 = vrot.lane.b32.xlu1 %v4402_v27, %s4229_s19 }
 0x114   : > { %v4579_v54 = vpop.permute.xlu0 %1352  ;;  %3627 = vmatmul.mubr.msk.bf16.vlgmr.msra.gmra.mrb[0].mxu1 %vm694_vm2, %v939_v53  ;;  %v1359_v55 = vpop.permute.xlu1 %1358 }
 0x115   : > { %1013 = vmatprep.mubr.bf16.mxu1 %v4218_v4  ;;  %v1365_v56 = vsel %vm1231_vm3, %v1359_v55, %v4570_v51 }
 0x116   : > { %2460 = vrot.lane.b32.xlu0 %v4421_v30, %s4230_s23  ;;  %3641 = vmatprep.subr.msk.bf16.mxu0 %vm701_vm1, %v1365_v56 }
 0x117   : > { %2193 = vrot.lane.b32.xlu1 %v4492_v38, %s4227_s30 }
 0x118   : > { %v1357_v57 = vpop.permute.xlu0 %1356  ;;  %v941_v60 = vpop.permute.xlu1 %940 }
 0x119   : > { %v1364_v58 = vsel %vm1231_vm3, %v1357_v57, %v1359_v55 }
 0x11a   : > { %v1374_v59 = vsel %vm701_vm1, %v1364_v58, 0  ;;  %2337 = vrot.lane.b32.xlu0 %v4455_v35, %s4229_s19 }
 0x11b   : > { %1383 = vmatpush1.bf16.msra.mxu0 %v1374_v59  ;;  %2462 = vrot.lane.b32.xlu1 %v4441_v32, %s4230_s23 }
 0x11c   : > { %v4597_v61 = vpop.permute.xlu0 %1354  ;;  %3628 = vmatmul.mubr.msk.bf16.gmra.mrb[4].mxu1 %vm694_vm2, %v941_v60  ;;  %v951_v62 = vpop.permute.xlu1 %950 }
 0x11d   : > { %3792 = vmatprep.mubr.msk.bf16.mxu1 %vm694_vm2, %v939_v53  ;;  %v955_v63 = vsel %vm952_vm4, %v949_v44, %v951_v62 }
 0x11e   : > { %2610 = vrot.lane.b32.xlu0 %v4377_v19, %s4231_s12  ;;  %3642 = vmatmul.mubr.msk.bf16.vlgmr.msra.gmra.mrb[0].mxu0 %vm694_vm2, %v4579_v54  ;;  %v969_v1 = vsel %vm701_vm1, %v955_v63, 0 }
 0x11f   : > { %1424 = vmatprep.mubr.bf16.mxu0 %v4218_v4  ;;  %2608 = vrot.lane.b32.xlu1 %v4380_v20, %s4231_s12 }
 0x120   : > { %v1082_v0 = vpop.permute.xlu0 %1081  ;;  %4094 = vmatprep.subr.msk.bf16.mxu1 %vm701_vm1, %v955_v63  ;;  %v1084_v2 = vpop.permute.xlu1 %1083 }
 0x121   : > { %3791 = vmatpush3.bf16.msra.mxu1 %v969_v1  ;;  %v1088_v3 = vsel %vm952_vm4, %v1082_v0, %v1084_v2 }
 0x122   : > { %2604 = vrot.lane.b32.xlu0 %v4367_v13, %s4232_s13  ;;  %3631 = vmatprep.subr.msk.bf16.mxu1 %vm701_vm1, %v1088_v3 }
 0x123   : > { %2612 = vrot.lane.b32.xlu1 %v4372_v17, %s4231_s12 }
 0x124   : > { %v4616_v5 = vpop.permute.xlu0 %1504  ;;  %3793 = vmatmul.mubr.msk.bf16.vlgmr.msra.gmra.mrb[8].mxu1 %vm694_vm2, %v941_v60  ;;  %v1080_v6 = vpop.permute.xlu1 %1079 }
 0x125   : > { %1137 = vmatprep.mubr.bf16.mxu1 %v4218_v4  ;;  %v1087_v7 = vsel %vm952_vm4, %v1080_v6, %v1082_v0 }
 0x126   : > { %2606 = vrot.lane.b32.xlu0 %v4414_v29, %s4232_s13  ;;  %3643 = vmatmul.mubr.msk.bf16.gmra.mrb[4].mxu0 %vm694_vm2, %v4597_v61  ;;  %v1097_v9 = vsel %vm701_vm1, %v1087_v7, 0 }
 0x127   : > { %1559 = vmatprep.mubr.bf16.mxu0 %v4218_v4  ;;  %2470 = vrot.lane.b32.xlu1 %v4492_v38, %s4229_s19  ;;  %s4952_s19 = smul.u32 48, %s523_s27 }
 0x128   : > { %v1501_v8 = vpop.permute.xlu0 %1500  ;;  %1106 = vmatpush1.bf16.msra.mxu1 %v1097_v9  ;;  %v1503_v10 = vpop.permute.xlu1 %1502 }
 0x129   : > { %v1509_v11 = vsel %vm1508_vm5, %v1501_v8, %v1503_v10  ;;  %v1510_v12 = vsel %vm1508_vm5, %v1503_v10, %v4616_v5  ;;  %s4955_s23 = scalar_lea.vmem [#allocation2], %s4952_s19  ;;  %s4964_s17 = scalar_lea.vmem [#allocation3], %s4952_s19 }
 0x12a   : > { %2743 = vrot.lane.b32.xlu0 %v4402_v27, %s4231_s12  ;;  %v1519_v15 = vsel %vm701_vm1, %v1509_v11, 0  ;;  %3646 = vmatprep.subr.msk.bf16.mxu0 %vm701_vm1, %v1510_v12 }
 0x12b   : > { %2741 = vrot.lane.b32.xlu1 %v4432_v31, %s4231_s12  ;;  %1528 = vmatpush1.bf16.msra.mxu0 %v1519_v15 }
 0x12c   : > { %v4637_v14 = vpop.permute.xlu0 %1496  ;;  %v1074_v16 = vpop.permute.xlu1 %1073 }
 0x12d   : > { %3632 = vmatmul.mubr.msk.bf16.vlgmr.msra.gmra.mrb[0].mxu1 %vm694_vm2, %v1074_v16 }
 0x12e   : > { %2737 = vrot.lane.b32.xlu0 %v4421_v30, %s4232_s13  ;;  %3647 = vmatmul.mubr.msk.bf16.vlgmr.msra.gmra.mrb[0].mxu0 %vm694_vm2, %v4637_v14 }
 0x12f   : > { %2745 = vrot.lane.b32.xlu1 %v4405_v28, %s4231_s12  ;;  %1147 = vmatprep.mubr.bf16.mxu1 %v4218_v4 }
 0x130   : > { %v4646_v18 = vpop.permute.xlu0 %1498  ;;  %v1076_v21 = vpop.permute.xlu1 %1075  ;;  %1569 = vmatprep.mubr.bf16.mxu0 %v4218_v4 }
 0x132   : > { %2739 = vrot.lane.b32.xlu0 %v4441_v32, %s4232_s13  ;;  %s3721_s13 = smul.u32 (%p4320_p4), 24, %s4308_s20 }
 0x133   : > { %2614 = vrot.lane.b32.xlu1 %v4455_v35, %s4231_s12 }
 0x134   : > { %v1634_v22 = vpop.permute.xlu0 %1633  ;;  %v1086_v23 = vpop.permute.xlu1 %1085  ;;  %s3309_s24 = scalar_lea.vmem (%p4320_p4), %s5042_s9, %s3721_s13 }
 0x135   : > { %v1089_v24 = vsel %vm952_vm4, %v1084_v2, %v1086_v23  ;;  %3633 = vmatmul.mubr.msk.bf16.gmra.mrb[4].mxu1 %vm694_vm2, %v1076_v21 }
 0x136   : > { %2887 = vrot.lane.b32.xlu0 %v4377_v19, %s4233_s28  ;;  %v1103_v26 = vsel %vm701_vm1, %v1089_v24, 0  ;;  %4095 = vmatprep.subr.msk.bf16.mxu1 %vm701_vm1, %v1089_v24 }
 0x137   : > { %2885 = vrot.lane.b32.xlu1 %v4380_v20, %s4233_s28  ;;  %3798 = vmatprep.mubr.msk.bf16.mxu1 %vm694_vm2, %v1074_v16 }
 0x138   : > { %v4662_v25 = vpop.permute.xlu0 %1637  ;;  %3648 = vmatmul.mubr.msk.bf16.gmra.mrb[4].mxu0 %vm694_vm2, %v4646_v18  ;;  %3797 = vmatpush3.bf16.msra.mxu1 %v1103_v26  ;;  %v1636_v19 = vpop.permute.xlu1 %1635 }
 0x139   : > { %v1641_v33 = vsel %vm1508_vm5, %v1634_v22, %v1636_v19  ;;  %v1642_v34 = vsel %vm1508_vm5, %v1636_v19, %v4662_v25  ;;  %3886 = vmatprep.subr.msk.bf16.mxu1 %vm701_vm1, %v4550_v43  ;;  %1691 = vmatprep.mubr.bf16.mxu0 %v4218_v4 }
 0x13a   : > { %2747 = vrot.lane.b32.xlu0 %v4492_v38, %s4231_s12  ;;  %v1651_v36 = vsel %vm701_vm1, %v1641_v33, 0  ;;  %3651 = vmatprep.subr.msk.bf16.mxu0 %vm701_vm1, %v1642_v34  ;;  %s4977_s12 = scalar_lea.vmem [#allocation4], %s4952_s19 }
 0x13b   : > { %2889 = vrot.lane.b32.xlu1 %v4372_v17, %s4233_s28  ;;  %1660 = vmatpush1.bf16.msra.mxu0 %v1651_v36 }
 0x13c   : > { %v1222_v20 = vpop.permute.xlu0 %1221  ;;  %v4685_v37 = vpop.permute.xlu1 %1629 }
 0x13d   : > { %3799 = vmatmul.mubr.msk.bf16.vlgmr.msra.gmra.mrb[8].mxu1 %vm694_vm2, %v1076_v21 }
 0x13e   : > { %2883 = vrot.lane.b32.xlu0 %v4414_v29, %s4234_s29  ;;  %3887 = vmatpush1.bf16.msra.mxu1 %v4566_v48 }
 0x13f   : > { %2881 = vrot.lane.b32.xlu1 %v4367_v13, %s4234_s29  ;;  %1292 = vmatprep.mubr.bf16.mxu1 %v4218_v4 }
 0x140   : > { %v1230_v41 = vpop.permute.xlu0 %1229  ;;  %3652 = vmatmul.mubr.msk.bf16.vlgmr.msra.gmra.mrb[0].mxu0 %vm694_vm2, %v4685_v37  ;;  %v4698_v17 = vpop.permute.xlu1 %1631 }
 0x141   : > { %v1234_v42 = vsel %vm1231_vm3, %v4543_v40, %v1230_v41  ;;  %1701 = vmatprep.mubr.bf16.mxu0 %v4218_v4 }
 0x142   : > { %4096 = vmatprep.subr.msk.bf16.mxu1 %vm701_vm1, %v1234_v42  ;;  %3018 = vrot.lane.b32.xlu0 %v4432_v31, %s4233_s28  ;;  %v1248_v40 = vsel %vm701_vm1, %v1234_v42, 0 }
 0x143   : > { %2891 = vrot.lane.b32.xlu1 %v4455_v35, %s4233_s28 }
 0x144   : > { %v1780_v29 = vpop.permute.xlu0 %1779  ;;  %v1778_v13 = vpop.permute.xlu1 %1777 }
 0x145   : > { %3638 = vmatmul.mubr.msk.bf16.vlgmr.msra.gmra.mrb[4].mxu1 %vm694_vm2, %v1222_v20  ;;  %v1786_v43 = vsel %vm1785_vm6, %v1778_v13, %v1780_v29 }
 0x146   : > { %3022 = vrot.lane.b32.xlu0 %v4405_v28, %s4233_s28  ;;  %3803 = vmatpush3.bf16.msra.mxu1 %v1248_v40 }
 0x147   : > { %3020 = vrot.lane.b32.xlu1 %v4402_v27, %s4233_s28  ;;  %3804 = vmatprep.mubr.msk.bf16.mxu1 %vm694_vm2, %v4538_v39  ;;  %v1796_v27 = vsel %vm701_vm1, %v1786_v43, 0 }
 0x148   : > { %v4708_v31 = vpop.permute.xlu0 %1773  ;;  %3653 = vmatmul.mubr.msk.bf16.gmra.mrb[4].mxu0 %vm694_vm2, %v4698_v17  ;;  %v1782_v28 = vpop.permute.xlu1 %1781 }
 0x149   : > { %1836 = vmatprep.mubr.bf16.mxu0 %v4218_v4  ;;  %v1787_v35 = vsel %vm1785_vm6, %v1780_v29, %v1782_v28 }
 0x14a   : > { %3024 = vrot.lane.b32.xlu0 %v4492_v38, %s4233_s28  ;;  %3656 = vmatprep.subr.msk.bf16.mxu0 %vm701_vm1, %v1787_v35 }
 0x14b   : > { %3014 = vrot.lane.b32.xlu1 %v4421_v30, %s4234_s29  ;;  %1805 = vmatpush1.bf16.msra.mxu0 %v1796_v27 }
 0x14c   : > { %v4721_v44 = vpop.permute.xlu0 %1775  ;;  %v1363_v39 = vpop.permute.xlu1 %1362 }
 0x14d   : > { %v1366_v45 = vsel %vm1231_vm3, %v4570_v51, %v1363_v39  ;;  %3805 = vmatmul.mubr.msk.bf16.vlgmr.msra.gmra.mrb[8].mxu1 %vm694_vm2, %v1222_v20 }
 0x14e   : > { %v1380_v46 = vsel %vm701_vm1, %v1366_v45, 0  ;;  %4097 = vmatprep.subr.msk.bf16.mxu1 %vm701_vm1, %v1366_v45  ;;  %3810 = vmatprep.mubr.msk.bf16.mxu1 %vm694_vm2, %v4579_v54 }
 0x14f   : > { %3809 = vmatpush3.bf16.msra.mxu1 %v1380_v46  ;;  %3016 = vrot.lane.b32.xlu1 %v4441_v32, %s4234_s29 }
 0x150   : > { %v1913_v38 = vpop.permute.xlu0 %1912  ;;  %3657 = vmatmul.mubr.msk.bf16.vlgmr.msra.gmra.mrb[0].mxu0 %vm694_vm2, %v4708_v31  ;;  %v1911_v30 = vpop.permute.xlu1 %1910 }
 0x151   : > { %1846 = vmatprep.mubr.bf16.mxu0 %v4218_v4  ;;  %v1918_v48 = vsel %vm1785_vm6, %v1911_v30, %v1913_v38 }
 0x152   : > { %v1928_v52 = vsel %vm701_vm1, %v1918_v48, 0 }
 0x154   : > { %v4739_v47 = vpop.permute.xlu0 %1906  ;;  %v1915_v49 = vpop.permute.xlu1 %1914 }
 0x155   : > { %v1919_v50 = vsel %vm1785_vm6, %v1913_v38, %v1915_v49 }
 0x156   : > { %3661 = vmatprep.subr.msk.bf16.mxu0 %vm701_vm1, %v1919_v50  ;;  %v3160_v50 = vld [vmem:[%s5041_s8 + $0x10] sm:$0xff] }
 0x157   : > { %1937 = vmatpush1.bf16.msra.mxu0 %v1928_v52  ;;  %3174 = vperm.xlu0 %4153, %v3160_v50  }
 0x158   : > { %v4743_v51 = vpop.permute.xlu0 %1908  ;;  %3658 = vmatmul.mubr.msk.bf16.gmra.mrb[4].mxu0 %vm694_vm2, %v4721_v44  ;;  %v1507_v53 = vpop.permute.xlu1 %1506 }
 0x159   : > { %1968 = vmatprep.mubr.bf16.mxu0 %v4218_v4  ;;  %v1511_v32 = vsel %vm1508_vm5, %v4616_v5, %v1507_v53  ;;  %3811 = vmatmul.mubr.msk.bf16.vlgmr.msra.gmra.mrb[8].mxu1 %vm694_vm2, %v4597_v61 }
 0x15a   : > { %v1525_v55 = vsel %vm701_vm1, %v1511_v32, 0  ;;  %4098 = vmatprep.subr.msk.bf16.mxu1 %vm701_vm1, %v1511_v32  ;;  %3816 = vmatprep.mubr.msk.bf16.mxu1 %vm694_vm2, %v4637_v14 }
 0x15b   : > { %3815 = vmatpush3.bf16.msra.mxu1 %v1525_v55 }
 0x15c   : > { %v2057_v54 = vpop.permute.xlu0 %2056  ;;  %v2055_v56 = vpop.permute.xlu1 %2054 }
 0x15d   : > { %v2063_v59 = vsel %vm2062_vm7, %v2055_v56, %v2057_v54 }
 0x15e   : > { %v2073_v63 = vsel %vm701_vm1, %v2063_v59, 0 }
 0x160   : > { %v1640_v57 = vpop.permute.xlu0 %1639  ;;  %3662 = vmatmul.mubr.msk.bf16.vlgmr.msra.gmra.mrb[0].mxu0 %vm694_vm2, %v4739_v47  ;;  %v2059_v60 = vpop.permute.xlu1 %2058 }
 0x161   : > { %v1643_v58 = vsel %vm1508_vm5, %v4662_v25, %v1640_v57  ;;  %1978 = vmatprep.mubr.bf16.mxu0 %v4218_v4  ;;  %v2064_v61 = vsel %vm2062_vm7, %v2057_v54, %v2059_v60  ;;  %v3158_v54 = vld [vmem:[%s5041_s8] sm:$0xff] }
 0x162   : > { %4099 = vmatprep.subr.msk.bf16.mxu1 %vm701_vm1, %v1643_v58  ;;  %3666 = vmatprep.subr.msk.bf16.mxu0 %vm701_vm1, %v2064_v61  ;;  %v1657_v1 = vsel %vm701_vm1, %v1643_v58, 0 }
 0x163   : > { %2082 = vmatpush1.bf16.msra.mxu0 %v2073_v63  ;;  %3164 = vperm.xlu0 %4153, %v3158_v54  }
 0x164   : > { %v4766_v62 = vpop.permute.xlu0 %2052  ;;  %v4770_v0 = vpop.permute.xlu1 %2050 }
 0x165   : > { %3817 = vmatmul.mubr.msk.bf16.vlgmr.msra.gmra.mrb[8].mxu1 %vm694_vm2, %v4646_v18 }
 0x166   : > { %3821 = vmatpush3.bf16.msra.mxu1 %v1657_v1  ;;  %3822 = vmatprep.mubr.msk.bf16.mxu1 %vm694_vm2, %v4685_v37 }
 0x168   : > { %v2188_v2 = vpop.permute.xlu0 %2187  ;;  %3663 = vmatmul.mubr.msk.bf16.gmra.mrb[4].mxu0 %vm694_vm2, %v4743_v51  ;;  %v1784_v3 = vpop.permute.xlu1 %1783 }
 0x169   : > { %2113 = vmatprep.mubr.bf16.mxu0 %v4218_v4  ;;  %v1788_v5 = vsel %vm1785_vm6, %v1782_v28, %v1784_v3 }
 0x16a   : > { %4100 = vmatprep.subr.msk.bf16.mxu1 %vm701_vm1, %v1788_v5  ;;  %v1802_v14 = vsel %vm701_vm1, %v1788_v5, 0 }
 0x16c   : > { %v2192_v6 = vpop.permute.xlu0 %2191  ;;  %v2190_v7 = vpop.permute.xlu1 %2189 }
 0x16d   : > { %v2195_v8 = vsel %vm2062_vm7, %v2188_v2, %v2190_v7  ;;  %v2196_v9 = vsel %vm2062_vm7, %v2190_v7, %v2192_v6 }
 0x16e   : > { %v2205_v11 = vsel %vm701_vm1, %v2195_v8, 0  ;;  %3671 = vmatprep.subr.msk.bf16.mxu0 %vm701_vm1, %v2196_v9 }
 0x170   : > { %v1917_v10 = vpop.permute.xlu0 %1916  ;;  %3667 = vmatmul.mubr.msk.bf16.vlgmr.msra.gmra.mrb[0].mxu0 %vm694_vm2, %v4770_v0  ;;  %v4788_v12 = vpop.permute.xlu1 %2183 }
 0x171   : > { %2214 = vmatpush1.bf16.msra.mxu0 %v2205_v11  ;;  %2123 = vmatprep.mubr.bf16.mxu0 %v4218_v4  ;;  %v1920_v16 = vsel %vm1785_vm6, %v1915_v49, %v1917_v10 }
 0x172   : > { %3823 = vmatmul.mubr.msk.bf16.vlgmr.msra.gmra.mrb[8].mxu1 %vm694_vm2, %v4698_v17  ;;  %v1934_v19 = vsel %vm701_vm1, %v1920_v16, 0 }
 0x173   : > { %3827 = vmatpush3.bf16.msra.mxu1 %v1802_v14  ;;  %3828 = vmatprep.mubr.msk.bf16.mxu1 %vm694_vm2, %v4708_v31 }
 0x174   : > { %v2332_v15 = vpop.permute.xlu0 %2331  ;;  %4101 = vmatprep.subr.msk.bf16.mxu1 %vm701_vm1, %v1920_v16  ;;  %v4798_v18 = vpop.permute.xlu1 %2185 }
 0x178   : > { %v2336_v21 = vpop.permute.xlu0 %2335  ;;  %3668 = vmatmul.mubr.msk.bf16.gmra.mrb[4].mxu0 %vm694_vm2, %v4766_v62  ;;  %v2334_v22 = vpop.permute.xlu1 %2333 }
 0x179   : > { %2245 = vmatprep.mubr.bf16.mxu0 %v4218_v4  ;;  %v2341_v23 = vsel %vm2339_vm8, %v2334_v22, %v2336_v21  ;;  %v2340_v25 = vsel %vm2339_vm8, %v2332_v15, %v2334_v22 }
 0x17a   : > { %3676 = vmatprep.subr.msk.bf16.mxu0 %vm701_vm1, %v2341_v23  ;;  %v2350_v20 = vsel %vm701_vm1, %v2340_v25, 0 }
 0x17c   : > { %v2061_v24 = vpop.permute.xlu0 %2060  ;;  %v4806_v26 = vpop.permute.xlu1 %2327 }
 0x17d   : > { %v2065_v34 = vsel %vm2062_vm7, %v2059_v60, %v2061_v24  ;;  %v3159_v60 = vld [vmem:[%s5041_s8 + $0x8] sm:$0xff] }
 0x17e   : > { %3829 = vmatmul.mubr.msk.bf16.vlgmr.msra.gmra.mrb[8].mxu1 %vm694_vm2, %v4721_v44  ;;  %v2079_v13 = vsel %vm701_vm1, %v2065_v34, 0 }
 0x17f   : > { %3833 = vmatpush3.bf16.msra.mxu1 %v1934_v19  ;;  %3834 = vmatprep.mubr.msk.bf16.mxu1 %vm694_vm2, %v4739_v47 }
 0x180   : > { %v2465_v33 = vpop.permute.xlu0 %2464  ;;  %4102 = vmatprep.subr.msk.bf16.mxu1 %vm701_vm1, %v2065_v34  ;;  %3672 = vmatmul.mubr.msk.bf16.vlgmr.msra.gmra.mrb[0].mxu0 %vm694_vm2, %v4788_v12  ;;  %v4818_v36 = vpop.permute.xlu1 %2329 }
 0x181   : > { %2359 = vmatpush1.bf16.msra.mxu0 %v2350_v20  ;;  %2255 = vmatprep.mubr.bf16.mxu0 %v4218_v4 }
 0x184   : > { %v2469_v37 = vpop.permute.xlu0 %2468 }
 0x185   : > { %v2467_v41 = vpop.permute.xlu1 %2466 }
 0x186   : > { %v2473_v42 = vsel %vm2339_vm8, %v2467_v41, %v2469_v37  ;;  %v2472_v43 = vsel %vm2339_vm8, %v2465_v33, %v2467_v41 }
 0x187   : > { %3681 = vmatprep.subr.msk.bf16.mxu0 %vm701_vm1, %v2473_v42  ;;  %v2482_v44 = vsel %vm701_vm1, %v2472_v43, 0 }
 0x188   : > { %v4822_v17 = vpop.permute.xlu0 %2460  ;;  %3673 = vmatmul.mubr.msk.bf16.gmra.mrb[4].mxu0 %vm694_vm2, %v4798_v18 }
 0x189   : > { %v2194_v29 = vpop.permute.xlu1 %2193  ;;  %2390 = vmatprep.mubr.bf16.mxu0 %v4218_v4 }
 0x18a   : > { %v2197_v40 = vsel %vm2062_vm7, %v2192_v6, %v2194_v29  ;;  %3835 = vmatmul.mubr.msk.bf16.vlgmr.msra.gmra.mrb[8].mxu1 %vm694_vm2, %v4743_v51  ;;  %v3161_v51 = vld [vmem:[%s5041_s8 + $0x18] sm:$0x7] }
 0x18b   : > { %3839 = vmatpush3.bf16.msra.mxu1 %v2079_v13  ;;  %3840 = vmatprep.mubr.msk.bf16.mxu1 %vm694_vm2, %v4770_v0  ;;  %v2211_v38 = vsel %vm701_vm1, %v2197_v40, 0 }
 0x18c   : > { %v2338_v31 = vpop.permute.xlu0 %2337  ;;  %4103 = vmatprep.subr.msk.bf16.mxu1 %vm701_vm1, %v2197_v40  ;;  %3179 = vperm.xlu1 %4154, %v3161_v51  }
 0x18d   : > { %v4836_v28 = vpop.permute.xlu1 %2462  ;;  %v2342_v47 = vsel %vm2339_vm8, %v2336_v21, %v2338_v31 }
 0x18e   : > { %v2356_v57 = vsel %vm701_vm1, %v2342_v47, 0 }
 0x190   : > { %v2611_v35 = vpop.permute.xlu0 %2610  ;;  %3677 = vmatmul.mubr.msk.bf16.vlgmr.msra.gmra.mrb[0].mxu0 %vm694_vm2, %v4806_v26  ;;  %3169 = vperm.xlu1 %4154, %v3159_v60  }
 0x191   : > { %2491 = vmatpush1.bf16.msra.mxu0 %v2482_v44  ;;  %v2609_v27 = vpop.permute.xlu1 %2608  ;;  %2400 = vmatprep.mubr.bf16.mxu0 %v4218_v4 }
 0x192   : > { %v2617_v52 = vsel %vm2616_vm9, %v2609_v27, %v2611_v35 }
 0x193   : > { %v2627_v55 = vsel %vm701_vm1, %v2617_v52, 0 }
 0x194   : > { %v4842_v39 = vpop.permute.xlu0 %2604 }
 0x195   : > { %v2613_v45 = vpop.permute.xlu1 %2612 }
 0x196   : > { %v2618_v46 = vsel %vm2616_vm9, %v2611_v35, %v2613_v45  ;;  %3841 = vmatmul.mubr.msk.bf16.vlgmr.msra.gmra.mrb[8].mxu1 %vm694_vm2, %v4766_v62 }
 0x197   : > { %3845 = vmatpush3.bf16.msra.mxu1 %v2211_v38  ;;  %3846 = vmatprep.mubr.msk.bf16.mxu1 %vm694_vm2, %v4788_v12 }
 0x198   : > { %v4848_v30 = vpop.permute.xlu0 %2606  ;;  %3678 = vmatmul.mubr.msk.bf16.gmra.mrb[4].mxu0 %vm694_vm2, %v4818_v36  ;;  %4104 = vmatprep.subr.msk.bf16.mxu1 %vm701_vm1, %v2342_v47 }
 0x199   : > { %3686 = vmatprep.subr.msk.bf16.mxu0 %vm701_vm1, %v2618_v46  ;;  %v2471_v48 = vpop.permute.xlu1 %2470  ;;  %2522 = vmatprep.mubr.bf16.mxu0 %v4218_v4 }
 0x19a   : > { %v2474_v61 = vsel %vm2339_vm8, %v2469_v37, %v2471_v48 }
 0x19b   : > { %v2488_v3 = vsel %vm701_vm1, %v2474_v61, 0 }
 0x19c   : > { %v2744_v49 = vpop.permute.xlu0 %2743 }
 0x19d   : > { %v2742_v53 = vpop.permute.xlu1 %2741 }
 0x19e   : > { %v2749_v1 = vsel %vm2616_vm9, %v2742_v53, %v2744_v49 }
 0x19f   : > { %v2759_v8 = vsel %vm701_vm1, %v2749_v1, 0 }
 0x1a0   : > { %v4865_v32 = vpop.permute.xlu0 %2737  ;;  %3682 = vmatmul.mubr.msk.bf16.vlgmr.msra.gmra.mrb[0].mxu0 %vm694_vm2, %v4822_v17 }
 0x1a1   : > { %2636 = vmatpush1.bf16.msra.mxu0 %v2627_v55  ;;  %v2746_v56 = vpop.permute.xlu1 %2745  ;;  %2532 = vmatprep.mubr.bf16.mxu0 %v4218_v4 }
 0x1a2   : > { %v2750_v58 = vsel %vm2616_vm9, %v2744_v49, %v2746_v56  ;;  %3847 = vmatmul.mubr.msk.bf16.vlgmr.msra.gmra.mrb[8].mxu1 %vm694_vm2, %v4798_v18 }
 0x1a3   : > { %3851 = vmatpush3.bf16.msra.mxu1 %v2356_v57  ;;  %3852 = vmatprep.mubr.msk.bf16.mxu1 %vm694_vm2, %v4806_v26 }
 0x1a4   : > { %v4878_v59 = vpop.permute.xlu0 %2739  ;;  %4105 = vmatprep.subr.msk.bf16.mxu1 %vm701_vm1, %v2474_v61  ;;  %3691 = vmatprep.subr.msk.bf16.mxu0 %vm701_vm1, %v2750_v58 }
 0x1a5   : > { %v2615_v62 = vpop.permute.xlu1 %2614 }
 0x1a6   : > { %v2619_v6 = vsel %vm2616_vm9, %v2613_v45, %v2615_v62 }
 0x1a7   : > { %v2633_v12 = vsel %vm701_vm1, %v2619_v6, 0 }
 0x1a8   : > { %v2888_v63 = vpop.permute.xlu0 %2887  ;;  %3683 = vmatmul.mubr.msk.bf16.gmra.mrb[4].mxu0 %vm694_vm2, %v4836_v28 }
 0x1a9   : > { %v2886_v0 = vpop.permute.xlu1 %2885  ;;  %2667 = vmatprep.mubr.bf16.mxu0 %v4218_v4 }
 0x1aa   : > { %v2894_v16 = vsel %vm2893_vm10, %v2886_v0, %v2888_v63 }
 0x1ab   : > { %v2904_v21 = vsel %vm701_vm1, %v2894_v16, 0 }
 0x1ac   : > { %v2748_v5 = vpop.permute.xlu0 %2747 }
 0x1ad   : > { %v2890_v2 = vpop.permute.xlu1 %2889  ;;  %v2751_v15 = vsel %vm2616_vm9, %v2746_v56, %v2748_v5 }
 0x1ae   : > { %3853 = vmatmul.mubr.msk.bf16.vlgmr.msra.gmra.mrb[8].mxu1 %vm694_vm2, %v4818_v36  ;;  %v2895_v7 = vsel %vm2893_vm10, %v2888_v63, %v2890_v2  ;;  %v2765_v24 = vsel %vm701_vm1, %v2751_v15, 0 }
 0x1af   : > { %3857 = vmatpush3.bf16.msra.mxu1 %v2488_v3  ;;  %3858 = vmatprep.mubr.msk.bf16.mxu1 %vm694_vm2, %v4822_v17 }
 0x1b0   : > { %3687 = vmatmul.mubr.msk.bf16.vlgmr.msra.gmra.mrb[0].mxu0 %vm694_vm2, %v4842_v39  ;;  %4106 = vmatprep.subr.msk.bf16.mxu1 %vm701_vm1, %v2619_v6  ;;  %v2884_v10 = vpop.permute.xlu0 %2883 }
 0x1b1   : > { %2768 = vmatpush1.bf16.msra.mxu0 %v2759_v8  ;;  %2677 = vmatprep.mubr.bf16.mxu0 %v4218_v4  ;;  %v2882_v9 = vpop.permute.xlu1 %2881 }
 0x1b2   : > { %3696 = vmatprep.subr.msk.bf16.mxu0 %vm701_vm1, %v2895_v7 }
 0x1b4   : > { %v3019_v14 = vpop.permute.xlu0 %3018 }
 0x1b5   : > { %v2892_v11 = vpop.permute.xlu1 %2891 }
 0x1b6   : > { %v2896_v25 = vsel %vm2893_vm10, %v2890_v2, %v2892_v11 }
 0x1b7   : > { %v2910_v34 = vsel %vm701_vm1, %v2896_v25, 0 }
 0x1b8   : > { %3688 = vmatmul.mubr.msk.bf16.gmra.mrb[4].mxu0 %vm694_vm2, %v4848_v30  ;;  %v3023_v22 = vpop.permute.xlu0 %3022 }
 0x1b9   : > { %2799 = vmatprep.mubr.bf16.mxu0 %v4218_v4  ;;  %v3021_v18 = vpop.permute.xlu1 %3020 }
 0x1ba   : > { %3859 = vmatmul.mubr.msk.bf16.vlgmr.msra.gmra.mrb[8].mxu1 %vm694_vm2, %v4836_v28  ;;  %v3027_v23 = vsel %vm2893_vm10, %v3021_v18, %v3023_v22  ;;  %v3026_v26 = vsel %vm2893_vm10, %v3019_v14, %v3021_v18 }
 0x1bb   : > { %3863 = vmatpush3.bf16.msra.mxu1 %v2633_v12  ;;  %3864 = vmatprep.mubr.msk.bf16.mxu1 %vm694_vm2, %v4842_v39  ;;  %v3036_v19 = vsel %vm701_vm1, %v3026_v26, 0 }
 0x1bc   : > { %4107 = vmatprep.subr.msk.bf16.mxu1 %vm701_vm1, %v2751_v15  ;;  %v3025_v33 = vpop.permute.xlu0 %3024 }
 0x1bd   : > { %v3028_v20 = vsel %vm2893_vm10, %v3023_v22, %v3025_v33  ;;  %v3015_v36 = vpop.permute.xlu1 %3014 }
 0x1be   : > { %v3042_v37 = vsel %vm701_vm1, %v3028_v20, 0 }
 0x1c0   : > { %3692 = vmatmul.mubr.msk.bf16.vlgmr.msra.gmra.mrb[0].mxu0 %vm694_vm2, %v4865_v32 }
 0x1c1   : > { %2913 = vmatpush1.bf16.msra.mxu0 %v2904_v21  ;;  %2809 = vmatprep.mubr.bf16.mxu0 %v4218_v4  ;;  %v3017_v41 = vpop.permute.xlu1 %3016 }
 0x1c2   : > { %3701 = vmatprep.subr.msk.bf16.mxu0 %vm701_vm1, %v3027_v23 }
 0x1c6   : > { %3865 = vmatmul.mubr.msk.bf16.vlgmr.msra.gmra.mrb[8].mxu1 %vm694_vm2, %v4848_v30 }
 0x1c7   : > { %3869 = vmatpush3.bf16.msra.mxu1 %v2765_v24  ;;  %3870 = vmatprep.mubr.msk.bf16.mxu1 %vm694_vm2, %v4865_v32 }
 0x1c8   : > { %3693 = vmatmul.mubr.msk.bf16.gmra.mrb[4].mxu0 %vm694_vm2, %v4878_v59  ;;  %4108 = vmatprep.subr.msk.bf16.mxu1 %vm701_vm1, %v2896_v25 }
 0x1c9   : > { %2944 = vmatprep.mubr.bf16.mxu0 %v4218_v4 }
 0x1d0   : > { %3697 = vmatmul.mubr.msk.bf16.vlgmr.msra.gmra.mrb[0].mxu0 %vm694_vm2, %v2882_v9 }
 0x1d1   : > { %3045 = vmatpush1.bf16.msra.mxu0 %v3036_v19  ;;  %2954 = vmatprep.mubr.bf16.mxu0 %v4218_v4 }
 0x1d2   : > { %3871 = vmatmul.mubr.msk.bf16.vlgmr.msra.gmra.mrb[8].mxu1 %vm694_vm2, %v4878_v59 }
 0x1d3   : > { %3875 = vmatpush3.bf16.msra.mxu1 %v2910_v34  ;;  %3876 = vmatprep.mubr.msk.bf16.mxu1 %vm694_vm2, %v2882_v9 }
 0x1d4   : > { %4109 = vmatprep.subr.msk.bf16.mxu1 %vm701_vm1, %v3028_v20 }
 0x1d6   : > { %v3175_v35 = vpop.permute.xlu0 %3174 }
 0x1d8   : > { %3698 = vmatmul.mubr.msk.bf16.gmra.mrb[4].mxu0 %vm694_vm2, %v2884_v10 }
 0x1d9   : > { %3076 = vmatprep.mubr.bf16.mxu0 %v4218_v4 }
 0x1de   : > { %3877 = vmatmul.mubr.msk.bf16.vlgmr.msra.gmra.mrb[8].mxu1 %vm694_vm2, %v2884_v10 }
 0x1df   : > { %3881 = vmatpush3.bf16.msra.mxu1 %v3042_v37  ;;  %3882 = vmatprep.mubr.msk.bf16.mxu1 %vm694_vm2, %v3015_v36 }
 0x1e0   : > { %3702 = vmatmul.mubr.msk.bf16.vlgmr.msra.gmra.mrb[0].mxu0 %vm694_vm2, %v3015_v36 }
 0x1e1   : > { %3086 = vmatprep.mubr.bf16.mxu0 %v4218_v4 }
 0x1e2   : > { %v3165_v27 = vpop.permute.xlu0 %3164 }
 0x1e8   : > { %3703 = vmatmul.mubr.msk.bf16.gmra.mrb[4].mxu0 %vm694_vm2, %v3017_v41 }
 0x1ea   : > { %3883 = vmatmul.mubr.msk.bf16.vlgmr.msra.gmra.mrb[8].mxu1 %vm694_vm2, %v3017_v41 }
 0x200   : > { %v1139_v42 = vpop.f32.mrb[0].mxu1 }
 0x201   : > { %v1141_v17 = vpop.f32.mrb[1].mxu1 }
 0x202   : > { %v1143_v29 = vpop.f32.mrb[2].mxu1 }
 0x203   : > { %v1145_v13 = vpop.f32.mrb[3].mxu1 }
 0x20b   : > { %v3180_v44 = vpop.permute.xlu1 %3179 }
 0x20f   : > { %v3170_v30 = vpop.permute.xlu1 %3169 }
 0x218   : > { %v1294_v40 = vpop.f32.mrb[4].mxu1 }
 0x219   : > { %v1296_v31 = vpop.f32.mrb[5].mxu1 }
 0x21a   : > { %v1298_v43 = vpop.f32.mrb[6].mxu1 }
 0x21b   : > { %v1300_v28 = vpop.f32.mrb[7].mxu1 }
 0x2b3   : > { %v3078_v4 = vpop.f32.mrb[0].mxu0 }
 0x2b4   : > { %v3888_v39 = vadd.f32 %v3078_v4, %v1139_v42  ;;  %v3080_v45 = vpop.f32.mrb[1].mxu0 }
 0x2b5   : > { %v3889_v38 = vadd.f32 %v3080_v45, %v1141_v17  ;;  %v3082_v46 = vpop.f32.mrb[2].mxu0 }
 0x2b6   : > { %v3890_v47 = vadd.f32 %v3082_v46, %v1143_v29  ;;  %v3182_v48 = vadd.f32 %v3888_v39, %v3165_v27  ;;  %v3084_v49 = vpop.f32.mrb[3].mxu0 }
 0x2b7   : > { %v3183_v50 = vadd.f32 %v3889_v38, %v3165_v27  ;;  %v3891_v51 = vadd.f32 %v3084_v49, %v1145_v13 }
 0x2b8   : > { %3194 = vst [vmem:[%s4955_s23] sm:$0xff] %v3182_v48  ;;  %v3185_v52 = vadd.f32 %v3890_v47, %v3170_v30 }
 0x2b9   : > { %3195 = vst [vmem:[%s4955_s23 + $0x8] sm:$0xff] %v3183_v50  ;;  %v3186_v53 = vadd.f32 %v3891_v51, %v3170_v30 }
 0x2ba   : > { %3197 = vst [vmem:[%s4955_s23 + $0x18] sm:$0x1] %v3185_v52  ;;  %v3207_v59 = vrot.slane %v3185_v52, 1 }
 0x2bb   : > { %3198 = vst [vmem:[%s4955_s23 + $0x20] sm:$0x1] %v3186_v53  ;;  %v3088_v32 = vpop.f32.mrb[4].mxu0  ;;  %v3210_v1 = vrot.slane %v3186_v53, 1 }
 0x2bc   : > { %v3892_v54 = vadd.f32 %v3088_v32, %v1294_v40  ;;  %v3090_v55 = vpop.f32.mrb[5].mxu0 }
 0x2bd   : > { %v3893_v56 = vadd.f32 %v3090_v55, %v1296_v31  ;;  %v3092_v57 = vpop.f32.mrb[6].mxu0  ;;  %v3884_v58 = vpop.f32.mrb[8].mxu1 }
 0x2be   : > { %v3188_v60 = vadd.f32 %v3892_v54, %v3175_v35  ;;  %v3894_v61 = vadd.f32 %v3092_v57, %v1298_v43  ;;  %v3094_v62 = vpop.f32.mrb[7].mxu0  ;;  %v3190_v63 = vadd.f32 %v3884_v58, %v3175_v35  ;;  %v3131_v0 = vpop.f32.mrb[9].mxu1 }
 0x2bf   : > { %v3189_v2 = vadd.f32 %v3893_v56, %v3175_v35  ;;  %v3895_v3 = vadd.f32 %v3094_v62, %v1300_v28  ;;  %v3184_v5 = vadd.f32 %v3165_v27, %v3131_v0  ;;  %v3885_v6 = vpop.f32.mrb[10].mxu1  ;;  %v3322_v52 = vld [vmem:[%s4955_s23] sm:$0xff] (%p4320_p4) }
 0x2c0   : > { %v3208_v7 = vrot.slane %v3188_v60, 1  ;;  %v3706_v8 = vmul.f32 -1.442695, %v3188_v60  ;;  %v3191_v9 = vadd.f32 %v3894_v61, %v3180_v44  ;;  %v3214_v10 = vrot.slane %v3190_v63, 1  ;;  %v3134_v11 = vpop.f32.mrb[11].mxu1  ;;  %v3324_v53 = vld [vmem:[%s4955_s23 + $0x8] sm:$0xff] (%p4320_p4)  ;;  %3323 = vst [vmem:[%s3309_s24] sm:$0xff] (%p4320_p4), %v3322_v52 }
 0x2c1   : > { %v3211_v12 = vrot.slane %v3189_v2, 1  ;;  %v3707_v14 = vmul.f32 -1.442695, %v3189_v2  ;;  %v3192_v15 = vadd.f32 %v3895_v3, %v3180_v44  ;;  %v3708_v16 = vmul.f32 -1.442695, %v3190_v63  ;;  %3196 = vst [vmem:[%s4955_s23 + $0x10] sm:$0xff] %v3184_v5 }
 0x2c2   : > { %v3209_v18 = vsel %vm3206_vm11, %v3207_v59, %v3208_v7  ;;  %3225 = vst [vmem:[%s4964_s17 + $0x18] sm:$0x1] %v3208_v7  ;;  %4169 = vpow2.f32 %v3706_v8  ;;  %v3709_v21 = vmul.f32 -1.442695, %v3191_v9  ;;  %3227 = vst [vmem:[%s4964_s17 + $0x28] sm:$0x1] %v3214_v10  ;;  %v3193_v22 = vadd.f32 %v3885_v6, %v3180_v44 }
 0x2c3   : > { %3222 = vst [vmem:[%s4964_s17] sm:$0xff] %v3209_v18  ;;  %v3212_v23 = vsel %vm3206_vm11, %v3210_v1, %v3211_v12  ;;  %3226 = vst [vmem:[%s4964_s17 + $0x20] sm:$0x1] %v3211_v12  ;;  %4171 = vpow2.f32 %v3707_v14  ;;  %v3710_v24 = vmul.f32 -1.442695, %v3192_v15  ;;  %v3187_v25 = vadd.f32 %v3170_v30, %v3134_v11  ;;  %v3328_v54 = vld [vmem:[%s4955_s23 + $0x18] sm:$0xff] (%p4320_p4)  ;;  %v3330_v55 = vld [vmem:[%s4955_s23 + $0x20] sm:$0xff] (%p4320_p4) }
 0x2c4   : > { %3223 = vst [vmem:[%s4964_s17 + $0x8] sm:$0xff] %v3212_v23  ;;  %4173 = vpow2.f32 %v3709_v21  ;;  %v3711_v26 = vmul.f32 -1.442695, %v3193_v22  ;;  %3325 = vst [vmem:[%s3309_s24 + $0x8] sm:$0xff] (%p4320_p4), %v3324_v53 }
 0x2c5   : > { %4175 = vpow2.f32 %v3710_v24  ;;  %3199 = vst [vmem:[%s4955_s23 + $0x28] sm:$0x1] %v3187_v25  ;;  %v3213_v19 = vrot.slane %v3187_v25, 1  ;;  %3329 = vst [vmem:[%s3309_s24 + $0x30] sm:$0xff] (%p4320_p4), %v3328_v54 }
 0x2c6   : > { %4177 = vpow2.f32 %v3708_v16  ;;  %3331 = vst [vmem:[%s3309_s24 + $0x38] sm:$0xff] (%p4320_p4), %v3330_v55 }
 0x2c7   : > { %4179 = vpow2.f32 %v3711_v26  ;;  %v3215_v33 = vsel %vm3206_vm11, %v3213_v19, %v3214_v10 }
 0x2c8   : > { %3224 = vst [vmem:[%s4964_s17 + $0x10] sm:$0xff] %v3215_v33  ;;  %v3326_v32 = vld [vmem:[%s4955_s23 + $0x10] sm:$0xff] (%p4320_p4) }
 0x2c9   : > { %3327 = vst [vmem:[%s3309_s24 + $0x10] sm:$0xff] (%p4320_p4), %v3326_v32 }
 0x2cc   : > { %v4170_v34 = vpop.eup %4169  ;;  %v3332_v56 = vld [vmem:[%s4955_s23 + $0x28] sm:$0xff] (%p4320_p4) }
 0x2cd   : > { %v4172_v20 = vpop.eup %4171  ;;  %v3246_v36 = vadd.f32 1.0, %v4170_v34  ;;  %3333 = vst [vmem:[%s3309_s24 + $0x40] sm:$0xff] (%p4320_p4), %v3332_v56 }
 0x2ce   : > { %v4174_v37 = vpop.eup %4173  ;;  %v3247_v41 = vadd.f32 1.0, %v4172_v20 }
 0x2cf   : > { %v4176_v42 = vpop.eup %4175  ;;  %4181 = vrcp.f32 %v3246_v36  ;;  %v3249_v17 = vadd.f32 1.0, %v4174_v37 }
 0x2d0   : > { %v4178_v29 = vpop.eup %4177  ;;  %4183 = vrcp.f32 %v3247_v41  ;;  %v3250_v13 = vadd.f32 1.0, %v4176_v42 }
 0x2d1   : > { %v4180_v40 = vpop.eup %4179  ;;  %4185 = vrcp.f32 %v3249_v17  ;;  %v3248_v31 = vadd.f32 1.0, %v4178_v29 }
 0x2d2   : > { %4187 = vrcp.f32 %v3250_v13  ;;  %v3251_v43 = vadd.f32 1.0, %v4180_v40 }
 0x2d3   : > { %4189 = vrcp.f32 %v3248_v31 }
 0x2d4   : > { %4191 = vrcp.f32 %v3251_v43 }
 0x2d9   : > { %v4182_v28 = vpop.eup %4181 }
 0x2da   : > { %v4184_v35 = vpop.eup %4183  ;;  %v3271_v27 = vrot.slane %v4182_v28, 2 }
 0x2db   : > { %v4186_v44 = vpop.eup %4185  ;;  %v3274_v38 = vrot.slane %v4184_v35, 2 }
 0x2dc   : > { %v4188_v4 = vpop.eup %4187  ;;  %v3272_v39 = vrot.slane %v4186_v44, 2  ;;  %3306 = sbr.rel (!%p4320_p4) target bundleno = 739 (0x2e3), region = 60 }
 0x2dd   : > { %v4190_v45 = vpop.eup %4189  ;;  %v3275_v46 = vrot.slane %v4188_v4, 2 }
 0x2de   : > { %v4192_v30 = vpop.eup %4191  ;;  %v3273_v47 = vsel %vm3270_vm12, %v3271_v27, %v3272_v39  ;;  %3289 = vst [vmem:[%s4977_s12 + $0x18] sm:$0x1] %v3272_v39  ;;  %v3277_v49 = vrot.slane %v4190_v45, 2 }
 0x2df   : > { %3286 = vst [vmem:[%s4977_s12] sm:$0xff] %v3273_v47  ;;  %v3276_v48 = vsel %vm3270_vm12, %v3274_v38, %v3275_v46  ;;  %3290 = vst [vmem:[%s4977_s12 + $0x20] sm:$0x1] %v3275_v46  ;;  %v3278_v50 = vrot.slane %v4192_v30, 2 }
 0x2e0   : > { %3287 = vst [vmem:[%s4977_s12 + $0x8] sm:$0xff] %v3276_v48 }
 0x2e1   : > { %v3279_v51 = vsel %vm3270_vm12, %v3277_v49, %v3278_v50  ;;  %3291 = vst [vmem:[%s4977_s12 + $0x28] sm:$0x1] %v3278_v50 }
 0x2e2   : > { %3288 = vst [vmem:[%s4977_s12 + $0x10] sm:$0xff] %v3279_v51 }
 0x2e3 PF: > { %3339 = sbr.rel (!%p4320_p4) target bundleno = 746 (0x2ea), region = 83  ;;  %v3355_v57 = vld [vmem:[%s4964_s17] sm:$0xff] (%p4320_p4)  ;;  %v3357_v58 = vld [vmem:[%s4964_s17 + $0x8] sm:$0xff] (%p4320_p4)  ;;  %v3359_v59 = vld [vmem:[%s4964_s17 + $0x10] sm:$0xff] (%p4320_p4) }
 0x2e4   : > { %s3722_s14 = smul.u32 (%p4320_p4), 24, %s4308_s20  ;;  %v3361_v60 = vld [vmem:[%s4964_s17 + $0x18] sm:$0xff] (%p4320_p4)  ;;  %v3363_v61 = vld [vmem:[%s4964_s17 + $0x20] sm:$0xff] (%p4320_p4)  ;;  %v3365_v62 = vld [vmem:[%s4964_s17 + $0x28] sm:$0xff] (%p4320_p4) }
 0x2e6   : > { %s3342_s22 = scalar_lea.vmem (%p4320_p4), %s5043_s10, %s3722_s14 }
 0x2e7   : > { %3356 = vst [vmem:[%s3342_s22] sm:$0xff] (%p4320_p4), %v3355_v57  ;;  %3358 = vst [vmem:[%s3342_s22 + $0x8] sm:$0xff] (%p4320_p4), %v3357_v58 }
 0x2e8   : > { %3360 = vst [vmem:[%s3342_s22 + $0x10] sm:$0xff] (%p4320_p4), %v3359_v59  ;;  %3362 = vst [vmem:[%s3342_s22 + $0x30] sm:$0xff] (%p4320_p4), %v3361_v60 }
 0x2e9   : > { %3364 = vst [vmem:[%s3342_s22 + $0x38] sm:$0xff] (%p4320_p4), %v3363_v61  ;;  %3366 = vst [vmem:[%s3342_s22 + $0x40] sm:$0xff] (%p4320_p4), %v3365_v62 }
 0x2ea PF: > { %3372 = sbr.rel (!%p4320_p4) target bundleno = 753 (0x2f1), region = 106  ;;  %v3388_v63 = vld [vmem:[%s4977_s12] sm:$0xff] (%p4320_p4)  ;;  %v3390_v0 = vld [vmem:[%s4977_s12 + $0x8] sm:$0xff] (%p4320_p4)  ;;  %v3392_v1 = vld [vmem:[%s4977_s12 + $0x10] sm:$0xff] (%p4320_p4) }
 0x2eb   : > { %s3723_s26 = smul.u32 (%p4320_p4), 24, %s4308_s20  ;;  %v3394_v2 = vld [vmem:[%s4977_s12 + $0x18] sm:$0xff] (%p4320_p4)  ;;  %v3396_v3 = vld [vmem:[%s4977_s12 + $0x20] sm:$0xff] (%p4320_p4)  ;;  %v3398_v5 = vld [vmem:[%s4977_s12 + $0x28] sm:$0xff] (%p4320_p4) }
 0x2ed   : > { %s3375_s27 = scalar_lea.vmem (%p4320_p4), %s5044_s11, %s3723_s26 }
 0x2ee   : > { %3389 = vst [vmem:[%s3375_s27] sm:$0xff] (%p4320_p4), %v3388_v63  ;;  %3391 = vst [vmem:[%s3375_s27 + $0x8] sm:$0xff] (%p4320_p4), %v3390_v0 }
 0x2ef   : > { %3393 = vst [vmem:[%s3375_s27 + $0x10] sm:$0xff] (%p4320_p4), %v3392_v1  ;;  %3395 = vst [vmem:[%s3375_s27 + $0x30] sm:$0xff] (%p4320_p4), %v3394_v2 }
 0x2f0   : > { %3397 = vst [vmem:[%s3375_s27 + $0x38] sm:$0xff] (%p4320_p4), %v3396_v3  ;;  %3399 = vst [vmem:[%s3375_s27 + $0x40] sm:$0xff] (%p4320_p4), %v3398_v5 }
 0x2f1 PF: > { %s5049_s20 = sld [smem:[#allocation5_spill]]  ;;  %p19_p11 = scmp.ge.s32.totalorder %s4310_s21, 4  }
 0x2f2   : > { %s5050_s17 = smov %s4211_s18  ;;  %s5052_s19 = smov %s4310_s21 }
 0x2f3   :  { %21 = sbr.rel (!%p19_p11) target bundleno = 4 (0x4), region = 194 }
 0x2f7   : > { %s5051_s18 = smov %s5049_s20 }

// kernel: dgg_forward.14
= control target key start
LH: loop header
LB: loop body
LE: loop exit
PB: predicated region body
PF: predicated region fallthrough
CT: control target
= control target key end

     0   :  { %s1235_s27 = smov 0   ;;  %s1237_s28 = smov 0   ;;  %s1397_s0 = inlined_call_operand.vmem [shape: bf16[8,768], index: 0, kind: input, shape index: {}]   ;;  %s1398_s1 = inlined_call_operand.vmem [shape: bf16[8,768], index: 1, kind: input, shape index: {}]   ;;  %s1399_s2 = inlined_call_operand.vmem [shape: bf16[72,768], index: 2, kind: input, shape index: {}]   ;;  %s1400_s3 = inlined_call_operand.vmem [shape: f32[1,768], index: 3, kind: input, shape index: {}]   ;;  %s1401_s4 = inlined_call_operand.vmem [shape: bf16[16,8], index: 4, kind: input, shape index: {}]   ;;  %s1402_s5 = inlined_call_operand.vmem [shape: bf16[16,16], index: 5, kind: input, shape index: {}]   ;;  %s1403_s6 = inlined_call_operand.vmem [shape: bf16[8,72], index: 6, kind: input, shape index: {}]   ;;  %s1404_s7 = inlined_call_operand.vmem [shape: f32[8,1], index: 7, kind: input, shape index: {}]   ;;  %s1405_s8 = inlined_call_operand.vmem [shape: bf16[8,768], index: 8, kind: output, shape index: {}]  }
   0x1   :  { %s1239_s29 = smov 0  }
   0x2 LB: > { %s1011_s30 = sadd.s32 4294967295, %s1185_s29   ;;  %s1252_s9 = sadd.s32 1, %s1185_s29   ;;  %s1185_s29 = sphi %s1239_s29, %s1408_s29   ;;  %s1181_s28 = sphi %s1237_s28, %s1407_s28   ;;  %s1177_s27 = sphi %s1235_s27, %s1406_s27  }
   0x3   : > { %s74_s10 = ssub.s32 %s1185_s29, %s1252_s9  ;;  %s77_s11 = sadd.s32 1, %s1181_s28 }
   0x4   : > { %p75_p0 = scmp.eq.s32.totalorder %s74_s10, 0  ;;  %p84_p1 = scmp.ne.s32.totalorder %s1181_s28, %s1177_s27 }
   0x5   : > { %p85_p2 = scmp.eq.s32.totalorder %s1185_s29, 0  ;;  %p1014_p4 = scmp.ge.s32.totalorder %s1185_s29, 2 }
   0x6   : > { %s1261_s12 = scalar_select %p75_p0, %s1181_s28, %s77_s11  }
   0x7   : > { %p86_p3 = por %p85_p2, %p84_p1  ;;  %258 = sbr.rel (%p1014_p4) target bundleno = 29 (0x1d), region = 32 }
   0xe   : > { %279 = sbr.rel (!%p86_p3) target bundleno = 29 (0x1d), region = 44  ;;  %s281_s13 = sand.u32 (%p86_p3), 1, %s1181_s28  }
   0xf   : > { %s1070_s14 = smul.u32 (%p86_p3), 12, %s1185_s29 }
  0x10   : > { %s1109_s15 = smul.u32 (%p86_p3), 108, %s281_s13 }
  0x11   : > { %s1269_s18 = scalar_lea.vmem (%p86_p3), %s1399_s2, %s1070_s14 }
  0x12   : > { %v301_v0 = vld [vmem:[%s1269_s18] sm:$0xff] (%p86_p3)  ;;  %v303_v1 = vld [vmem:[%s1269_s18 + $0x18] sm:$0xff] (%p86_p3)  ;;  %v305_v2 = vld [vmem:[%s1269_s18 + $0x30] sm:$0xff] (%p86_p3)  ;;  %s1274_s19 = scalar_lea.vmem (%p86_p3), [#allocation2], %s1109_s15 }
  0x13   : > { %302 = vst [vmem:[%s1274_s19] sm:$0xff] (%p86_p3), %v301_v0  ;;  %304 = vst [vmem:[%s1274_s19 + $0xc] sm:$0xff] (%p86_p3), %v303_v1  ;;  %v307_v3 = vld [vmem:[%s1269_s18 + $0x48] sm:$0xff] (%p86_p3)  ;;  %v309_v4 = vld [vmem:[%s1269_s18 + $0x60] sm:$0xff] (%p86_p3) }
  0x14   : > { %306 = vst [vmem:[%s1274_s19 + $0x18] sm:$0xff] (%p86_p3), %v305_v2  ;;  %v311_v5 = vld [vmem:[%s1269_s18 + $0x78] sm:$0xff] (%p86_p3)  ;;  %308 = vst [vmem:[%s1274_s19 + $0x24] sm:$0xff] (%p86_p3), %v307_v3  ;;  %v313_v6 = vld [vmem:[%s1269_s18 + $0x90] sm:$0xff] (%p86_p3) }
  0x15   : > { %310 = vst [vmem:[%s1274_s19 + $0x30] sm:$0xff] %v309_v4  ;;  %312 = vst [vmem:[%s1274_s19 + $0x3c] sm:$0xff] %v311_v5  ;;  %v315_v7 = vld [vmem:[%s1269_s18 + $0xa8] sm:$0xff]  ;;  %v317_v8 = vld [vmem:[%s1269_s18 + $0xc0] sm:$0xff] }
  0x16   : > { %314 = vst [vmem:[%s1274_s19 + $0x48] sm:$0xff] %v313_v6  ;;  %316 = vst [vmem:[%s1274_s19 + $0x54] sm:$0xff] %v315_v7  ;;  %v1016_v9 = vld [vmem:[%s1269_s18 + $0x8] sm:$0xf]  ;;  %v1018_v10 = vld [vmem:[%s1269_s18 + $0x20] sm:$0xf] }
  0x17   : > { %318 = vst [vmem:[%s1274_s19 + $0x60] sm:$0xff] %v317_v8  ;;  %v1020_v11 = vld [vmem:[%s1269_s18 + $0x38] sm:$0xf]  ;;  %1017 = vst [vmem:[%s1274_s19 + $0x8] sm:$0xf] %v1016_v9 }
  0x18   : > { %1019 = vst [vmem:[%s1274_s19 + $0x14] sm:$0xf] %v1018_v10  ;;  %1021 = vst [vmem:[%s1274_s19 + $0x20] sm:$0xf] %v1020_v11  ;;  %v1022_v12 = vld [vmem:[%s1269_s18 + $0x50] sm:$0xf] }
  0x19   : > { %v1024_v13 = vld [vmem:[%s1269_s18 + $0x68] sm:$0xf]  ;;  %v1026_v14 = vld [vmem:[%s1269_s18 + $0x80] sm:$0xf]  ;;  %1023 = vst [vmem:[%s1274_s19 + $0x2c] sm:$0xf] %v1022_v12 }
  0x1a   : > { %1025 = vst [vmem:[%s1274_s19 + $0x38] sm:$0xf] %v1024_v13  ;;  %1027 = vst [vmem:[%s1274_s19 + $0x44] sm:$0xf] %v1026_v14  ;;  %v1028_v15 = vld [vmem:[%s1269_s18 + $0x98] sm:$0xf] }
  0x1b   : > { %v1030_v16 = vld [vmem:[%s1269_s18 + $0xb0] sm:$0xf]  ;;  %v1032_v17 = vld [vmem:[%s1269_s18 + $0xc8] sm:$0xf]  ;;  %1029 = vst [vmem:[%s1274_s19 + $0x50] sm:$0xf] %v1028_v15 }
  0x1c   : > { %1031 = vst [vmem:[%s1274_s19 + $0x5c] sm:$0xf] %v1030_v16  ;;  %1033 = vst [vmem:[%s1274_s19 + $0x68] sm:$0xf] %v1032_v17 }
  0x1d PF: > { %p1034_p5 = scmp.ge.s32.totalorder %s1185_s29, 1  ;;  %p356_p6 = scmp.lt.s32.totalorder %s1185_s29, 3 }
  0x1f   : > { %p357_p7 = pnand %p1034_p5, %p356_p6 }
  0x20   : > { %s410_s20 = smul.u32 (!%p357_p7), 3, %s1011_s30  ;;  %v1187_v18 = vmov (!%p357_p7), 0.0   ;;  %v1188_v19 = vmov (!%p357_p7), 0   ;;  %vm1189_vm0 = vmmov (!%p357_p7), 0   ;;  %vm456_vm1 = vcmask (!%p357_p7), 1043456   ;;  %v1142_v25 = vld [vmem:[%s1401_s4] sm:$0xff] (!%p357_p7)  }
  0x21   : > { %360 = sbr.rel (%p357_p7) target bundleno = 520 (0x208), region = 74  ;;  %1083 = vmatprep.subr.bf16.mxu1 (!%p357_p7), %v1187_v18  ;;  %498 = vmatprep.mubr.bf16.mxu0 (!%p357_p7), %v1188_v19  ;;  %vm452_vm2 = vcmask (!%p357_p7), 64512   ;;  %s363_s29 = sand.u32 (!%p357_p7), 1, %s1177_s27   ;;  %v685_v27 = vld [vmem:[%s1404_s7] sm:$0xff] (!%p357_p7)  ;;  %vm578_vm9 = vcmask (!%p357_p7), 130048   ;;  %vm763_vm10 = vcmask (!%p357_p7), 588800   ;;  %v879_v15 = vlaneseq (!%p357_p7) }
  0x22   : > { %p411_p8 = scmp.lt.s32.totalorder (!%p357_p7), %s410_s20, 5  ;;  %1085 = vmatprep.mubr.msk.bf16.mxu1 (!%p357_p7), %vm1189_vm0, %v1187_v18  ;;  %1138 = vset.pattern.permute.xlu0 (!%p357_p7), %v1188_v19  ;;  %s1110_s30 = smul.u32 (!%p357_p7), 108, %s363_s29  ;;  %v1143_v51 = vld [vmem:[%s1402_s5] sm:$0xff] (!%p357_p7)  }
  0x23   : > { %688 = vperm.xlu0 (!%p357_p7), %1138, %v685_v27   ;;  %v666_v6 = vld [vmem:[%s1403_s6] sm:$0xf] (!%p357_p7)  ;;  %v880_v17 = vshrl.u32 (!%p357_p7), %v879_v15, 7 }
  0x24   : > { %s1338_s10 = scalar_lea.vmem (!%p357_p7), [#allocation2], %s1110_s30 }
  0x25   : > { %v1147_v52 = vld [vmem:[%s1338_s10 + $0x4] ss:$12 sps:$4 sm:$0xff] (!%p357_p7)   ;;  %v1144_v53 = vld [vmem:[%s1338_s10 + $0x8] ss:$12 sps:$4 sm:$0xff] (!%p357_p7)   ;;  %v1145_v54 = vld [vmem:[%s1338_s10] ss:$12 sps:$4 sm:$0xff] (!%p357_p7)  }
  0x26   : > { %v1151_v55 = vld [vmem:[%s1338_s10 + $0x1c] ss:$12 sps:$4 sm:$0xff] (!%p357_p7)   ;;  %v1148_v56 = vld [vmem:[%s1338_s10 + $0x20] ss:$12 sps:$4 sm:$0xff] (!%p357_p7)   ;;  %v1149_v57 = vld [vmem:[%s1338_s10 + $0x18] ss:$12 sps:$4 sm:$0xff] (!%p357_p7)  }
  0x27   : > { %v1155_v58 = vld [vmem:[%s1338_s10 + $0x34] ss:$12 sps:$4 sm:$0xff] (!%p357_p7)   ;;  %v1152_v59 = vld [vmem:[%s1338_s10 + $0x38] ss:$12 sps:$4 sm:$0xff] (!%p357_p7)   ;;  %v1153_v60 = vld [vmem:[%s1338_s10 + $0x30] ss:$12 sps:$4 sm:$0xff] (!%p357_p7)  }
  0x28   : > { %s1410_s20 = smov (!%p411_p8, %s410_s20), 5  ;;  %v1159_v61 = vld [vmem:[%s1338_s10 + $0x4c] ss:$12 sps:$4 sm:$0xff]   ;;  %v1156_v62 = vld [vmem:[%s1338_s10 + $0x50] ss:$12 sps:$4 sm:$0xff]   ;;  %v683_v63 = vld [vmem:[%s1338_s10 + $0x60] sm:$0xff] }
  0x29   : > { %s1321_s21 = sshll.u32 %s1410_s20, 2  ;;  %v1160_v0 = vld [vmem:[%s1338_s10 + $0x68] ss:$0 sps:$4 sm:$0xff]   ;;  %v1061_v2 = vcombine.high %v683_v63, %v683_v63  ;;  %v1060_v3 = vcombine.low %v683_v63, %v683_v63 }
  0x2a   : > { %s420_s24 = scalar_lea.vmem %s1398_s1, %s1321_s21  ;;  %v1157_v1 = vld [vmem:[%s1338_s10 + $0x48] ss:$12 sps:$4 sm:$0xff]   ;;  %v774_v4 = vsel %vm456_vm1, %v1160_v0, 0  ;;  %s414_s19 = scalar_lea.vmem %s1397_s0, %s1321_s21 }
  0x2b   : > { %v437_v20 = vld [vmem:[%s420_s24] sm:$0xff]  ;;  %v1141_v21 = vld [vmem:[%s420_s24 + $0x8] ss:$0 sps:$4 sm:$0xff]   ;;  %v768_v5 = vsel %vm456_vm1, %v1060_v3, 0  ;;  %s426_s24 = scalar_lea.vmem %s1400_s3, %s1410_s20  ;;  %s432_s26 = scalar_lea.vmem %s1405_s8, %s1321_s21 }
  0x2c   : > { %v1040_v22 = vcombine.high %v437_v20, %v437_v20  ;;  %v1039_v23 = vcombine.low %v437_v20, %v437_v20  ;;  %v464_v24 = vsel %vm456_vm1, %v1141_v21, 0  ;;  %v858_v16 = vld [vmem:[%s414_s19 + $0x8] sm:$0xf] }
  0x2d   : > { %1084 = vmatpush3.bf16.msra.mxu1 %v464_v24  ;;  %v861_v20 = vunpack.c.l.bf16 %v858_v16 }
  0x2e   : > { %1042 = vmatprep.subr.msk.bf16.mxu0 %vm456_vm1, %v1040_v22  ;;  %v458_v26 = vsel %vm456_vm1, %v1039_v23, 0  ;;  %1089 = vmatprep.subr.bf16.mxu1 %v1187_v18 }
  0x2f   : > { %467 = vmatpush1.bf16.msra.mxu0 %v458_v26  ;;  %v889_v26 = vsub.s32 2, %v880_v17 }
  0x30   : > { %1086 = vmatmul.mubr.msk.bf16.vlgmr.msra.gmra.mrb[0].mxu1 %vm452_vm2, %v1142_v25 }
  0x31   : > { %1091 = vmatprep.mubr.msk.bf16.mxu1 %vm1189_vm0, %v1187_v18 }
  0x32   : > { %1043 = vmatmul.mubr.msk.bf16.vlgmr.msra.gmra.mrb[0].mxu0 %vm452_vm2, %v1142_v25 }
  0x33   : > { %614 = vmatprep.mubr.bf16.mxu0 %v1188_v19 }
 0x103   : > { %v543_v28 = vpop.f32.mrb[0].mxu1 }
 0x104   : > { %vm552_vm3 = vcmp.gt.f32.partialorder %v543_v28, 0.0  ;;  %v558_v30 = vmul.f32 0.1, %v543_v28  ;;  %v1087_v31 = vpop.f32.mrb[1].mxu1 }
 0x105   : > { %v500_v29 = vpop.f32.mrb[0].mxu0  ;;  %v546_v34 = vpop.f32.mrb[2].mxu1 }
 0x106   : > { %vm550_vm4 = vcmp.gt.f32.partialorder %v500_v29, 0.0  ;;  %v556_v32 = vmul.f32 0.1, %v500_v29  ;;  %v502_v33 = vpop.f32.mrb[1].mxu0  ;;  %vm555_vm6 = vcmp.gt.f32.partialorder %v546_v34, 0.0  ;;  %v1088_v37 = vpop.f32.mrb[3].mxu1  ;;  %v564_v38 = vsel %vm552_vm3, %v543_v28, %v558_v30 }
 0x107   : > { %vm551_vm5 = vcmp.gt.f32.partialorder %v502_v33, 0.0  ;;  %v557_v35 = vmul.f32 0.1, %v502_v33  ;;  %v504_v36 = vpop.f32.mrb[2].mxu0  ;;  %v561_v40 = vmul.f32 0.1, %v546_v34 }
 0x108   : > { %vm553_vm7 = vcmp.gt.f32.partialorder %v504_v36, 0.0  ;;  %v559_v39 = vmul.f32 0.1, %v504_v36  ;;  %v506_v41 = vpop.f32.mrb[3].mxu0  ;;  %v562_v43 = vsel %vm550_vm4, %v500_v29, %v556_v32  ;;  %v877_v28 = vld [vmem:[%s426_s24] sm:$0x7] }
 0x109   : > { %vm554_vm8 = vcmp.gt.f32.partialorder %v506_v41, 0.0  ;;  %v560_v42 = vmul.f32 0.1, %v506_v41  ;;  %v567_v45 = vsel %vm555_vm6, %v546_v34, %v561_v40  ;;  %v563_v46 = vsel %vm551_vm5, %v502_v33, %v557_v35 }
 0x10a   : > { %v565_v44 = vsel %vm553_vm7, %v504_v36, %v559_v39  ;;  %v572_v48 = vpack.c.bf16 %v567_v45, %v564_v38  ;;  %v881_v36 = vsub.s32 0, %v880_v17  ;;  %v885_v40 = vsub.s32 1, %v880_v17 }
 0x10b   : > { %v570_v47 = vpack.c.bf16 %v565_v44, %v562_v43  ;;  %v566_v49 = vsel %vm554_vm8, %v506_v41, %v560_v42  ;;  %v890_v44 = vrot.slane %v877_v28, %v889_v26 }
 0x10c   : > { %v571_v50 = vpack.c.bf16 %v566_v49, %v563_v46  ;;  %1090 = vmatpush3.bf16.msra.mxu1 %v572_v48 }
 0x10d   : > { %1095 = vmatprep.subr.bf16.mxu1 %v1187_v18 }
 0x10e   : > { %582 = vmatprep.subr.bf16.mxu0 %v571_v50 }
 0x10f   : > { %583 = vmatpush1.bf16.msra.mxu0 %v570_v47  ;;  %1092 = vmatmul.mubr.msk.bf16.vlgmr.msra.gmra.mrb[4].mxu1 %vm578_vm9, %v1143_v51 }
 0x110   : > { %776 = vmatprep.subr.bf16.mxu0 %v1147_v52  ;;  %1096 = vmatpush3.bf16.msra.mxu1 %v1144_v53  ;;  %v886_v53 = vrot.slane %v877_v28, %v885_v40 }
 0x111   : > { %1105 = vmatprep.mubr.msk.bf16.mxu1 %vm1189_vm0, %v1187_v18  ;;  %1097 = vmatprep.subr.bf16.mxu1 %v1187_v18 }
 0x112   : > { %1046 = vmatmul.mubr.msk.bf16.vlgmr.msra.gmra.mrb[4].mxu0 %vm578_vm9, %v1143_v51  ;;  %v882_v51 = vrot.slane %v877_v28, %v881_v36 }
 0x113   : > { %777 = vmatpush1.bf16.msra.mxu0 %v1145_v54  ;;  %808 = vmatprep.mubr.bf16.mxu0 %v1188_v19  ;;  %v689_v19 = vpop.permute.xlu0 %688 }
 0x114   : > { %778 = vmatprep.subr.bf16.mxu0 %v1151_v55  ;;  %1098 = vmatpush3.bf16.msra.mxu1 %v1148_v56 }
 0x115   : > { %1099 = vmatprep.subr.bf16.mxu1 %v1187_v18 }
 0x117   : > { %779 = vmatpush1.bf16.msra.mxu0 %v1149_v57 }
 0x118   : > { %780 = vmatprep.subr.bf16.mxu0 %v1155_v58  ;;  %1100 = vmatpush3.bf16.msra.mxu1 %v1152_v59 }
 0x119   : > { %1101 = vmatprep.subr.bf16.mxu1 %v1187_v18 }
 0x11b   : > { %781 = vmatpush1.bf16.msra.mxu0 %v1153_v60 }
 0x11c   : > { %782 = vmatprep.subr.bf16.mxu0 %v1159_v61  ;;  %1102 = vmatpush3.bf16.msra.mxu1 %v1156_v62 }
 0x11d   : > { %1103 = vmatprep.subr.bf16.mxu1 %v1187_v18  ;;  %v857_v18 = vld [vmem:[%s414_s19] sm:$0xff] }
 0x11e   : > { %v859_v23 = vunpack.c.l.bf16 %v857_v18  ;;  %v860_v29 = vunpack.c.h.bf16 %v857_v18 }
 0x11f   : > { %783 = vmatpush1.bf16.msra.mxu0 %v1157_v1 }
 0x120   : > { %1063 = vmatprep.subr.msk.bf16.mxu0 %vm456_vm1, %v1061_v2  ;;  %1104 = vmatpush3.bf16.msra.mxu1 %v774_v4 }
 0x123   : > { %785 = vmatpush1.bf16.msra.mxu0 %v768_v5  ;;  %1106 = vmatmul.mubr.msk.bf16.vlgmr.msra.gmra.mrb[8].mxu1 %vm763_vm10, %v666_v6 }
 0x126   : > { %1064 = vmatmul.mubr.msk.bf16.vlgmr.msra.gmra.mrb[8].mxu0 %vm763_vm10, %v666_v6 }
 0x1e2   : > { %v659_v7 = vpop.f32.mrb[4].mxu1 }
 0x1e3   : > { %v1093_v8 = vpop.f32.mrb[5].mxu1  ;;  %v864_v21 = vadd.f32 1.0, %v659_v7 }
 0x1e4   : > { %v662_v10 = vpop.f32.mrb[6].mxu1 }
 0x1e5   : > { %v616_v9 = vpop.f32.mrb[4].mxu0  ;;  %v1094_v12 = vpop.f32.mrb[7].mxu1  ;;  %v867_v33 = vmul.f32 %v864_v21, %v861_v20 }
 0x1e6   : > { %v618_v11 = vpop.f32.mrb[5].mxu0  ;;  %v862_v24 = vadd.f32 1.0, %v616_v9 }
 0x1e7   : > { %v620_v13 = vpop.f32.mrb[6].mxu0  ;;  %v863_v30 = vadd.f32 1.0, %v618_v11 }
 0x1e8   : > { %v622_v14 = vpop.f32.mrb[7].mxu0  ;;  %v865_v42 = vmul.f32 %v862_v24, %v859_v23 }
 0x1e9   : > { %v866_v47 = vmul.f32 %v863_v30, %v860_v29 }
 0x1f6   : > { %v851_v22 = vpop.f32.mrb[8].mxu1 }
 0x1f7   : > { %v852_v25 = vadd.f32 %v851_v22, %v689_v19  ;;  %v1107_v27 = vpop.f32.mrb[9].mxu1 }
 0x1f8   : > { %v854_v32 = vpop.f32.mrb[10].mxu1 }
 0x1f9   : > { %v810_v31 = vpop.f32.mrb[8].mxu0  ;;  %v870_v34 = vadd.f32 %v852_v25, %v662_v10  ;;  %v1108_v38 = vpop.f32.mrb[11].mxu1 }
 0x1fa   : > { %v811_v35 = vadd.f32 %v810_v31, %v689_v19  ;;  %v812_v37 = vpop.f32.mrb[9].mxu0 }
 0x1fb   : > { %v813_v39 = vadd.f32 %v812_v37, %v689_v19  ;;  %v814_v41 = vpop.f32.mrb[10].mxu0  ;;  %v873_v43 = vadd.f32 %v870_v34, %v867_v33 }
 0x1fc   : > { %v868_v45 = vadd.f32 %v811_v35, %v620_v13  ;;  %v815_v46 = vpop.f32.mrb[11].mxu0 }
 0x1fd   : > { %v869_v48 = vadd.f32 %v813_v39, %v622_v14  ;;  %v876_v49 = vmax.f32 %v873_v43, 0.0 }
 0x1fe   : > { %v871_v50 = vadd.f32 %v868_v45, %v865_v42 }
 0x1ff   : > { %v872_v52 = vadd.f32 %v869_v48, %v866_v47  ;;  %v896_v54 = vmul.f32 %v890_v44, %v876_v49 }
 0x200   : > { %v874_v55 = vmax.f32 %v871_v50, 0.0 }
 0x201   : > { %v875_v56 = vmax.f32 %v872_v52, 0.0  ;;  %v1072_v57 = vpack.c.bf16 %v896_v54, %v896_v54 }
 0x202   : > { %v894_v58 = vmul.f32 %v882_v51, %v874_v55 }
 0x203   : > { %v895_v59 = vmul.f32 %v886_v53, %v875_v56  ;;  %911 = vst [vmem:[%s432_s26 + $0x8] sm:$0xf] %v1072_v57 }
 0x205   : > { %v1071_v60 = vpack.c.bf16 %v895_v59, %v894_v58 }
 0x207   : > { %910 = vst [vmem:[%s432_s26] sm:$0xff] %v1071_v60 }
 0x208 PF: > { %p15_p9 = scmp.ge.s32.totalorder %s1252_s9, 4   ;;  %s1406_s27 = smov %s1181_s28 }
 0x209   : > { %s1407_s28 = smov %s1261_s12  ;;  %s1408_s29 = smov %s1252_s9 }
 0x20a   :  { %17 = sbr.rel (!%p15_p9) target bundleno = 2 (0x2), region = 128 }

// kernel: dgg_forward.15
= control target key start
LH: loop header
LB: loop body
LE: loop exit
PB: predicated region body
PF: predicated region fallthrough
CT: control target
= control target key end

     0   :  { %s1745_s21 = smov 0   ;;  %s1947_s0 = inlined_call_operand.vmem [shape: bf16[8,768], index: 0, kind: input, shape index: {}, may-alias: {0,1,2}]   ;;  %s1948_s1 = inlined_call_operand.vmem [shape: bf16[8,768], index: 1, kind: input, shape index: {}, may-alias: {0,1,2}]   ;;  %s1949_s2 = inlined_call_operand.vmem [shape: bf16[8,768], index: 2, kind: input, shape index: {}, may-alias: {0,1,2}]   ;;  %s1950_s3 = inlined_call_operand.vmem [shape: bf16[8,72], index: 3, kind: input, shape index: {}]   ;;  %s1951_s4 = inlined_call_operand.vmem [shape: f32[8,1], index: 4, kind: input, shape index: {}]   ;;  %s1952_s5 = inlined_call_operand.vmem [shape: f32[1,768], index: 5, kind: input, shape index: {}]   ;;  %s1953_s6 = inlined_call_operand.vmem [shape: bf16[8,768], index: 6, kind: output, shape index: {}]  }
   0x1 LB: > { %s1513_s22 = sadd.s32 4294967295, %s1688_s21   ;;  %p1519_p0 = scmp.ge.s32.totalorder %s1688_s21, 1  ;;  %s1688_s21 = sphi %s1745_s21, %s16_s21  }
   0x2   : > { %p273_p1 = scmp.lt.s32.totalorder %s1688_s21, 3 }
   0x4   : > { %p274_p2 = pnand %p1519_p0, %p273_p1 }
   0x5   : > { %s323_s23 = smul.u32 (!%p274_p2), 3, %s1513_s22  ;;  %s341_s24 = sadd.s32 (!%p274_p2), 1, %s1513_s22  ;;  %v1771_v4 = vld [vmem:[%s1950_s3] sm:$0xf] (!%p274_p2)  ;;  %vm388_vm0 = vcmask (!%p274_p2), 154624   ;;  %v1692_v8 = vmov (!%p274_p2), 0.0  }
   0x6   : > { %277 = sbr.rel (%p274_p2) target bundleno = 552 (0x228), region = 44  ;;  %s1690_s9 = smov (!%p274_p2), 19   ;;  %v1779_v6 = vcombine.low (!%p274_p2), %v1771_v4, %v1771_v4  ;;  %1592 = vmatprep.subr.bf16.mxu1 (!%p274_p2), %v1692_v8  ;;  %v1694_v12 = vmov (!%p274_p2), 0   ;;  %vm1695_vm1 = vmmov (!%p274_p2), 0   ;;  %v1380_v19 = vld [vmem:[%s1951_s4] sm:$0xff] (!%p274_p2)  ;;  %vm419_vm2 = vcmask (!%p274_p2), 1039360  }
   0x7   : > { %p336_p3 = scmp.lt.s32.totalorder (!%p274_p2), %s323_s23, 5  ;;  %s1520_s25 = sadd.s32 (!%p274_p2), 4294967295, %s323_s23  ;;  %469 = vmatprep.mubr.bf16.mxu0 (!%p274_p2), %v1694_v12  ;;  %1594 = vmatprep.mubr.msk.bf16.mxu1 (!%p274_p2), %vm1695_vm1, %v1692_v8  ;;  %vm427_vm3 = vcmask (!%p274_p2), 1043456   ;;  %vm423_vm4 = vcmask (!%p274_p2), 64512   ;;  %vm620_vm5 = vcmask (!%p274_p2), 1031168   ;;  %vm730_vm6 = vcmask (!%p274_p2), 900096  }
   0x8   : > { %p325_p4 = scmp.gt.s32.totalorder (!%p274_p2), %s1520_s25, 0  ;;  %p1521_p5 = scmp.lt.s32.totalorder (!%p274_p2), %s1520_s25, 5  ;;  %1674 = vset.pattern.permute.xlu1 (!%p274_p2), %v1694_v12  ;;  %1675 = vset.pattern.permute.xlu0 (!%p274_p2), %v1694_v12  ;;  %vm840_vm7 = vcmask (!%p274_p2), 891904   ;;  %vm950_vm8 = vcmask (!%p274_p2), 883712   ;;  %vm1060_vm9 = vcmask (!%p274_p2), 752640   ;;  %vm1170_vm10 = vcmask (!%p274_p2), 744448  }
   0x9   : > { %s342_s27 = smul.u32 (!%p274_p2), 3, %s341_s24  ;;  %s1691_s19 = smov (!%p274_p2), 120   ;;  %vm1280_vm11 = vcmask (!%p274_p2), 736256  }
   0xa   : > { %s1693_s20 = smov (!%p274_p2), 127   ;;  %s1696_s22 = smov (!%p274_p2), 126  }
   0xb   : > { %p1761_p6 = scmp.lt.s32.totalorder (!%p274_p2), %s342_s27, 5  ;;  %s1697_s24 = smov (!%p274_p2), 112  }
   0xc   : > { %s1700_s28 = smov (!%p274_p2), 109   ;;  %s1701_s29 = smov (!%p274_p2), 96  }
   0xd   : > { %s1956_s23 = smov (!%p336_p3, %s323_s23), 5  ;;  %s1958_s25 = smov (!%p325_p4, %s1520_s25), 0 }
   0xe   : > { %s1527_s26 = sshll.u32 %s1956_s23, 2  ;;  %s1960_s25 = smov (!%p1521_p5, %s1958_s25), 5 }
   0xf   : > { %s339_s30 = scalar_lea.vmem %s1948_s1, %s1527_s26  ;;  %s1526_s8 = sshll.u32 %s1960_s25, 2 }
  0x10   : > { %v366_v0 = vld [vmem:[%s339_s30] sm:$0xff]  ;;  %v1678_v3 = vld [vmem:[%s339_s30 + $0x8] ss:$0 sps:$4 sm:$0xff]   ;;  %s330_s12 = scalar_lea.vmem %s1947_s0, %s1526_s8  ;;  %s1962_s27 = smov (!%p1761_p6, %s342_s27), 5 }
  0x11   : > { %v1535_v1 = vcombine.high %v366_v0, %v366_v0  ;;  %v1534_v2 = vcombine.low %v366_v0, %v366_v0  ;;  %v1679_v5 = vld [vmem:[%s330_s12] ss:$0 sps:$4 sm:$0xff]   ;;  %s1964_s27 = smov (!%p1761_p6, %s1962_s27), 5  ;;  %s1698_s25 = smov 110  }
  0x12   : > { %s1531_s15 = sshll.u32 %s1964_s27, 2  ;;  %s1699_s27 = smov 104  }
  0x13   : > { %384 = vrot.lane.b32.xlu1 %v1535_v1, %s1690_s9  ;;  %382 = vrot.lane.b32.xlu0 %v1534_v2, %s1690_s9  ;;  %s348_s18 = scalar_lea.vmem %s1949_s2, %s1531_s15  ;;  %s1702_s30 = smov 108  }
  0x14   : > { %v1680_v7 = vld [vmem:[%s348_s18] ss:$0 sps:$4 sm:$0xff]   ;;  %s1703_s7 = smov 88   ;;  %s1704_s8 = smov 92  }
  0x15   : > { %s1706_s10 = smov 91   ;;  %s1707_s11 = smov 72  }
  0x16   : > { %s1708_s12 = smov 90   ;;  %s1709_s13 = smov 64  }
  0x17   : > { %386 = vrot.lane.b32.xlu1 %v1678_v3, %s1690_s9  ;;  %372 = vrot.lane.b32.xlu0 %v1679_v5, %s1690_s9  ;;  %s356_s18 = scalar_lea.vmem %s1952_s5, %s1956_s23 }
  0x1b   : > { %407 = vrot.lane.b32.xlu1 %v1779_v6, %s1691_s19  ;;  %394 = vrot.lane.b32.xlu0 %v1680_v7, %s1690_s9  ;;  %s1705_s9 = smov 80  }
  0x85   : > { %v385_v9 = vpop.permute.xlu1 %384  ;;  %v383_v10 = vpop.permute.xlu0 %382 }
  0x86   : > { %v1787_v11 = vsel %vm388_vm0, %v383_v10, %v385_v9 }
  0x87   : > { %413 = vrot.lane.b32.xlu0 %v1787_v11, %s1693_s20 }
  0x89   : > { %v387_v13 = vpop.permute.xlu1 %386  ;;  %v373_v14 = vpop.permute.xlu0 %372 }
  0x8a   : > { %v1796_v15 = vsel %vm388_vm0, %v385_v9, %v387_v13  ;;  %v1801_v16 = vsel %vm388_vm0, %v373_v14, %v383_v10 }
  0x8b   : > { %415 = vrot.lane.b32.xlu1 %v1796_v15, %s1693_s20  ;;  %616 = vrot.lane.b32.xlu0 %v1796_v15, %s1696_s22  ;;  %v521_v33 = vsel %vm427_vm3, %v1801_v16, 0  ;;  %v527_v35 = vsel %vm427_vm3, %v1796_v15, 0 }
  0x8d   : > { %v395_v17 = vpop.permute.xlu0 %394  ;;  %v408_v20 = vpop.permute.xlu1 %407 }
  0x8e   : > { %v402_v18 = vsel %vm388_vm0, %v387_v13, %v395_v17 }
  0x8f   : > { %411 = vrot.lane.b32.xlu1 %v1801_v16, %s1693_s20  ;;  %417 = vrot.lane.b32.xlu0 %v402_v18, %s1693_s20 }
  0x93   : > { %614 = vrot.lane.b32.xlu1 %v1787_v11, %s1696_s22  ;;  %610 = vrot.lane.b32.xlu0 %v1779_v6, %s1697_s24 }
  0x97   : > { %726 = vrot.lane.b32.xlu1 %v1796_v15, %s1698_s25  ;;  %724 = vrot.lane.b32.xlu0 %v1787_v11, %s1698_s25 }
  0x9b   : > { %720 = vrot.lane.b32.xlu1 %v1779_v6, %s1699_s27  ;;  %836 = vrot.lane.b32.xlu0 %v1796_v15, %s1700_s28 }
  0x9f   : > { %834 = vrot.lane.b32.xlu1 %v1787_v11, %s1700_s28  ;;  %612 = vrot.lane.b32.xlu0 %v1801_v16, %s1696_s22 }
  0xa3   : > { %618 = vrot.lane.b32.xlu1 %v402_v18, %s1696_s22  ;;  %830 = vrot.lane.b32.xlu0 %v1779_v6, %s1701_s29  ;;  %s362_s22 = scalar_lea.vmem %s1953_s6, %s1527_s26 }
  0xa7   : > { %722 = vrot.lane.b32.xlu1 %v1801_v16, %s1698_s25  ;;  %728 = vrot.lane.b32.xlu0 %v402_v18, %s1698_s25 }
  0xab   : > { %946 = vrot.lane.b32.xlu1 %v1796_v15, %s1702_s30  ;;  %944 = vrot.lane.b32.xlu0 %v1787_v11, %s1702_s30 }
  0xaf   : > { %940 = vrot.lane.b32.xlu1 %v1779_v6, %s1703_s7  ;;  %832 = vrot.lane.b32.xlu0 %v1801_v16, %s1700_s28 }
  0xb3   : > { %838 = vrot.lane.b32.xlu1 %v402_v18, %s1700_s28  ;;  %1056 = vrot.lane.b32.xlu0 %v1796_v15, %s1704_s8 }
  0xb7   : > { %942 = vrot.lane.b32.xlu1 %v1801_v16, %s1702_s30  ;;  %948 = vrot.lane.b32.xlu0 %v402_v18, %s1702_s30 }
  0xbb   : > { %1054 = vrot.lane.b32.xlu1 %v1787_v11, %s1704_s8  ;;  %1050 = vrot.lane.b32.xlu0 %v1779_v6, %s1705_s9 }
  0xbf   : > { %1166 = vrot.lane.b32.xlu1 %v1796_v15, %s1706_s10  ;;  %1052 = vrot.lane.b32.xlu0 %v1801_v16, %s1704_s8 }
  0xc3   : > { %1058 = vrot.lane.b32.xlu1 %v402_v18, %s1704_s8  ;;  %1164 = vrot.lane.b32.xlu0 %v1787_v11, %s1706_s10 }
  0xc7   : > { %1162 = vrot.lane.b32.xlu1 %v1801_v16, %s1706_s10  ;;  %1168 = vrot.lane.b32.xlu0 %v402_v18, %s1706_s10 }
  0xcb   : > { %1160 = vrot.lane.b32.xlu1 %v1779_v6, %s1707_s11  ;;  %1272 = vrot.lane.b32.xlu0 %v1801_v16, %s1708_s12 }
  0xcf   : > { %1274 = vrot.lane.b32.xlu1 %v1787_v11, %s1708_s12  ;;  %1276 = vrot.lane.b32.xlu0 %v1796_v15, %s1708_s12 }
  0xd3   : > { %1278 = vrot.lane.b32.xlu1 %v402_v18, %s1708_s12  ;;  %1270 = vrot.lane.b32.xlu0 %v1779_v6, %s1709_s13 }
  0xd7   : > { %1383 = vperm.xlu1 %1674, %v1380_v19  }
  0xf9   : > { %v414_v21 = vpop.permute.xlu0 %413 }
  0xfd   : > { %v416_v22 = vpop.permute.xlu1 %415  ;;  %v617_v23 = vpop.permute.xlu0 %616 }
  0xfe   : > { %v421_v24 = vsel %vm419_vm2, %v414_v21, %v416_v22 }
  0xff   : > { %1539 = vmatprep.subr.msk.bf16.mxu0 %vm427_vm3, %v421_v24 }
 0x101   : > { %v412_v25 = vpop.permute.xlu1 %411  ;;  %v418_v26 = vpop.permute.xlu0 %417 }
 0x102   : > { %v420_v27 = vsel %vm419_vm2, %v412_v25, %v414_v21  ;;  %v422_v29 = vsel %vm419_vm2, %v416_v22, %v418_v26 }
 0x103   : > { %v429_v28 = vsel %vm427_vm3, %v420_v27, 0  ;;  %v435_v30 = vsel %vm427_vm3, %v422_v29, 0 }
 0x104   : > { %438 = vmatpush1.bf16.msra.mxu0 %v429_v28  ;;  %1593 = vmatpush3.bf16.msra.mxu1 %v435_v30 }
 0x105   : > { %v615_v31 = vpop.permute.xlu1 %614  ;;  %1542 = vmatprep.subr.msk.bf16.mxu0 %vm427_vm3, %v1787_v11  ;;  %v611_v32 = vpop.permute.xlu0 %610  ;;  %1598 = vmatprep.subr.bf16.mxu1 %v1692_v8 }
 0x106   : > { %v622_v34 = vsel %vm620_vm5, %v615_v31, %v617_v23 }
 0x107   : > { %1540 = vmatmul.mubr.msk.bf16.vlgmr.msra.gmra.mrb[0].mxu0 %vm423_vm4, %v408_v20  ;;  %1595 = vmatmul.mubr.msk.bf16.vlgmr.msra.gmra.mrb[0].mxu1 %vm423_vm4, %v408_v20 }
 0x108   : > { %530 = vmatpush1.bf16.msra.mxu0 %v521_v33  ;;  %1599 = vmatpush3.bf16.msra.mxu1 %v527_v35 }
 0x109   : > { %v727_v36 = vpop.permute.xlu1 %726  ;;  %1545 = vmatprep.subr.msk.bf16.mxu0 %vm427_vm3, %v622_v34  ;;  %v725_v37 = vpop.permute.xlu0 %724  ;;  %561 = vmatprep.mubr.bf16.mxu0 %v1694_v12 }
 0x10a   : > { %1600 = vmatprep.mubr.msk.bf16.mxu1 %vm1695_vm1, %v1692_v8  ;;  %1604 = vmatprep.subr.bf16.mxu1 %v1692_v8  ;;  %v732_v44 = vsel %vm730_vm6, %v725_v37, %v727_v36 }
 0x10d   : > { %v721_v38 = vpop.permute.xlu1 %720  ;;  %v837_v39 = vpop.permute.xlu0 %836 }
 0x10f   : > { %1543 = vmatmul.mubr.msk.bf16.vlgmr.msra.gmra.mrb[4].mxu0 %vm423_vm4, %v1771_v4  ;;  %1601 = vmatmul.mubr.msk.bf16.vlgmr.msra.gmra.mrb[4].mxu1 %vm423_vm4, %v1771_v4 }
 0x110   : > { %668 = vmatprep.mubr.bf16.mxu0 %v1694_v12  ;;  %1606 = vmatprep.mubr.msk.bf16.mxu1 %vm1695_vm1, %v1692_v8 }
 0x111   : > { %v835_v40 = vpop.permute.xlu1 %834  ;;  %v613_v41 = vpop.permute.xlu0 %612 }
 0x112   : > { %v621_v42 = vsel %vm620_vm5, %v613_v41, %v615_v31  ;;  %v842_v54 = vsel %vm840_vm7, %v835_v40, %v837_v39 }
 0x113   : > { %v628_v43 = vsel %vm427_vm3, %v621_v42, 0 }
 0x114   : > { %637 = vmatpush1.bf16.msra.mxu0 %v628_v43 }
 0x115   : > { %v619_v45 = vpop.permute.xlu1 %618  ;;  %1548 = vmatprep.subr.msk.bf16.mxu0 %vm427_vm3, %v732_v44  ;;  %v831_v47 = vpop.permute.xlu0 %830 }
 0x116   : > { %v623_v46 = vsel %vm620_vm5, %v617_v23, %v619_v45 }
 0x117   : > { %v634_v48 = vsel %vm427_vm3, %v623_v46, 0  ;;  %1546 = vmatmul.mubr.msk.bf16.vlgmr.msra.gmra.mrb[8].mxu0 %vm423_vm4, %v611_v32 }
 0x118   : > { %1605 = vmatpush3.bf16.msra.mxu1 %v634_v48  ;;  %778 = vmatprep.mubr.bf16.mxu0 %v1694_v12 }
 0x119   : > { %v723_v49 = vpop.permute.xlu1 %722  ;;  %1610 = vmatprep.subr.bf16.mxu1 %v1692_v8  ;;  %v729_v51 = vpop.permute.xlu0 %728 }
 0x11a   : > { %v731_v50 = vsel %vm730_vm6, %v723_v49, %v725_v37  ;;  %v733_v53 = vsel %vm730_vm6, %v727_v36, %v729_v51 }
 0x11b   : > { %v738_v52 = vsel %vm427_vm3, %v731_v50, 0  ;;  %1607 = vmatmul.mubr.msk.bf16.vlgmr.msra.gmra.mrb[8].mxu1 %vm423_vm4, %v611_v32  ;;  %v744_v55 = vsel %vm427_vm3, %v733_v53, 0 }
 0x11c   : > { %747 = vmatpush1.bf16.msra.mxu0 %v738_v52  ;;  %1612 = vmatprep.mubr.msk.bf16.mxu1 %vm1695_vm1, %v1692_v8 }
 0x11d   : > { %1611 = vmatpush3.bf16.msra.mxu1 %v744_v55  ;;  %v947_v56 = vpop.permute.xlu1 %946  ;;  %1551 = vmatprep.subr.msk.bf16.mxu0 %vm427_vm3, %v842_v54  ;;  %v945_v57 = vpop.permute.xlu0 %944 }
 0x11e   : > { %1616 = vmatprep.subr.bf16.mxu1 %v1692_v8  ;;  %v952_v62 = vsel %vm950_vm8, %v945_v57, %v947_v56 }
 0x11f   : > { %1549 = vmatmul.mubr.msk.bf16.vlgmr.msra.gmra.mrb[12].mxu0 %vm423_vm4, %v721_v38 }
 0x120   : > { %888 = vmatprep.mubr.bf16.mxu0 %v1694_v12 }
 0x121   : > { %v941_v58 = vpop.permute.xlu1 %940  ;;  %v833_v59 = vpop.permute.xlu0 %832 }
 0x122   : > { %v841_v60 = vsel %vm840_vm7, %v833_v59, %v835_v40 }
 0x123   : > { %1613 = vmatmul.mubr.msk.bf16.vlgmr.msra.gmra.mrb[12].mxu1 %vm423_vm4, %v721_v38  ;;  %v848_v61 = vsel %vm427_vm3, %v841_v60, 0 }
 0x124   : > { %1618 = vmatprep.mubr.msk.bf16.mxu1 %vm1695_vm1, %v1692_v8  ;;  %857 = vmatpush1.bf16.msra.mxu0 %v848_v61 }
 0x125   : > { %v839_v63 = vpop.permute.xlu1 %838  ;;  %1554 = vmatprep.subr.msk.bf16.mxu0 %vm427_vm3, %v952_v62  ;;  %v1057_v1 = vpop.permute.xlu0 %1056 }
 0x126   : > { %v843_v0 = vsel %vm840_vm7, %v837_v39, %v839_v63 }
 0x127   : > { %v854_v2 = vsel %vm427_vm3, %v843_v0, 0  ;;  %1552 = vmatmul.mubr.msk.bf16.vlgmr.msra.gmra.mrb[16].mxu0 %vm423_vm4, %v831_v47 }
 0x128   : > { %1617 = vmatpush3.bf16.msra.mxu1 %v854_v2  ;;  %998 = vmatprep.mubr.bf16.mxu0 %v1694_v12 }
 0x129   : > { %v943_v3 = vpop.permute.xlu1 %942  ;;  %1622 = vmatprep.subr.bf16.mxu1 %v1692_v8  ;;  %v949_v5 = vpop.permute.xlu0 %948 }
 0x12a   : > { %v951_v4 = vsel %vm950_vm8, %v943_v3, %v945_v57  ;;  %v953_v7 = vsel %vm950_vm8, %v947_v56, %v949_v5 }
 0x12b   : > { %v958_v6 = vsel %vm427_vm3, %v951_v4, 0  ;;  %1619 = vmatmul.mubr.msk.bf16.vlgmr.msra.gmra.mrb[16].mxu1 %vm423_vm4, %v831_v47  ;;  %v964_v9 = vsel %vm427_vm3, %v953_v7, 0 }
 0x12c   : > { %967 = vmatpush1.bf16.msra.mxu0 %v958_v6  ;;  %1624 = vmatprep.mubr.msk.bf16.mxu1 %vm1695_vm1, %v1692_v8 }
 0x12d   : > { %1623 = vmatpush3.bf16.msra.mxu1 %v964_v9  ;;  %v1055_v10 = vpop.permute.xlu1 %1054  ;;  %v1051_v13 = vpop.permute.xlu0 %1050 }
 0x12e   : > { %v1062_v11 = vsel %vm1060_vm9, %v1055_v10, %v1057_v1  ;;  %1628 = vmatprep.subr.bf16.mxu1 %v1692_v8 }
 0x12f   : > { %1557 = vmatprep.subr.msk.bf16.mxu0 %vm427_vm3, %v1062_v11  ;;  %1555 = vmatmul.mubr.msk.bf16.vlgmr.msra.gmra.mrb[20].mxu0 %vm423_vm4, %v941_v58 }
 0x130   : > { %1108 = vmatprep.mubr.bf16.mxu0 %v1694_v12 }
 0x131   : > { %v1167_v14 = vpop.permute.xlu1 %1166  ;;  %v1053_v15 = vpop.permute.xlu0 %1052 }
 0x132   : > { %v1061_v16 = vsel %vm1060_vm9, %v1053_v15, %v1055_v10 }
 0x133   : > { %1625 = vmatmul.mubr.msk.bf16.vlgmr.msra.gmra.mrb[20].mxu1 %vm423_vm4, %v941_v58  ;;  %v1068_v17 = vsel %vm427_vm3, %v1061_v16, 0 }
 0x134   : > { %1630 = vmatprep.mubr.msk.bf16.mxu1 %vm1695_vm1, %v1692_v8  ;;  %1077 = vmatpush1.bf16.msra.mxu0 %v1068_v17 }
 0x135   : > { %v1059_v18 = vpop.permute.xlu1 %1058  ;;  %v1165_v20 = vpop.permute.xlu0 %1164 }
 0x136   : > { %v1063_v19 = vsel %vm1060_vm9, %v1057_v1, %v1059_v18  ;;  %v1172_v22 = vsel %vm1170_vm10, %v1165_v20, %v1167_v14 }
 0x137   : > { %v1074_v21 = vsel %vm427_vm3, %v1063_v19, 0  ;;  %1558 = vmatmul.mubr.msk.bf16.vlgmr.msra.gmra.mrb[24].mxu0 %vm423_vm4, %v1051_v13  ;;  %1560 = vmatprep.subr.msk.bf16.mxu0 %vm427_vm3, %v1172_v22 }
 0x138   : > { %1629 = vmatpush3.bf16.msra.mxu1 %v1074_v21  ;;  %1218 = vmatprep.mubr.bf16.mxu0 %v1694_v12 }
 0x139   : > { %v1163_v23 = vpop.permute.xlu1 %1162  ;;  %v1169_v25 = vpop.permute.xlu0 %1168  ;;  %1634 = vmatprep.subr.bf16.mxu1 %v1692_v8 }
 0x13a   : > { %v1171_v24 = vsel %vm1170_vm10, %v1163_v23, %v1165_v20  ;;  %v1173_v27 = vsel %vm1170_vm10, %v1167_v14, %v1169_v25 }
 0x13b   : > { %v1178_v26 = vsel %vm427_vm3, %v1171_v24, 0  ;;  %v1184_v28 = vsel %vm427_vm3, %v1173_v27, 0  ;;  %1631 = vmatmul.mubr.msk.bf16.vlgmr.msra.gmra.mrb[24].mxu1 %vm423_vm4, %v1051_v13 }
 0x13c   : > { %1187 = vmatpush1.bf16.msra.mxu0 %v1178_v26  ;;  %1635 = vmatpush3.bf16.msra.mxu1 %v1184_v28 }
 0x13d   : > { %v1161_v29 = vpop.permute.xlu1 %1160  ;;  %1636 = vmatprep.mubr.msk.bf16.mxu1 %vm1695_vm1, %v1692_v8  ;;  %v1273_v30 = vpop.permute.xlu0 %1272  ;;  %1640 = vmatprep.subr.bf16.mxu1 %v1692_v8 }
 0x13f   : > { %1561 = vmatmul.mubr.msk.bf16.vlgmr.msra.gmra.mrb[28].mxu0 %vm423_vm4, %v1161_v29 }
 0x140   : > { %1328 = vmatprep.mubr.bf16.mxu0 %v1694_v12 }
 0x141   : > { %v1275_v31 = vpop.permute.xlu1 %1274  ;;  %v1277_v33 = vpop.permute.xlu0 %1276 }
 0x142   : > { %v1281_v32 = vsel %vm1280_vm11, %v1273_v30, %v1275_v31  ;;  %v1282_v35 = vsel %vm1280_vm11, %v1275_v31, %v1277_v33 }
 0x143   : > { %v1288_v34 = vsel %vm427_vm3, %v1281_v32, 0  ;;  %1637 = vmatmul.mubr.msk.bf16.vlgmr.msra.gmra.mrb[28].mxu1 %vm423_vm4, %v1161_v29  ;;  %1563 = vmatprep.subr.msk.bf16.mxu0 %vm427_vm3, %v1282_v35 }
 0x144   : > { %1297 = vmatpush1.bf16.msra.mxu0 %v1288_v34  ;;  %1642 = vmatprep.mubr.msk.bf16.mxu1 %vm1695_vm1, %v1692_v8 }
 0x145   : > { %v1279_v36 = vpop.permute.xlu1 %1278  ;;  %v1271_v38 = vpop.permute.xlu0 %1270 }
 0x146   : > { %v1283_v37 = vsel %vm1280_vm11, %v1277_v33, %v1279_v36 }
 0x147   : > { %v1294_v39 = vsel %vm427_vm3, %v1283_v37, 0  ;;  %1564 = vmatmul.mubr.msk.bf16.vlgmr.msra.gmra.mrb[32].mxu0 %vm423_vm4, %v1271_v38 }
 0x148   : > { %1641 = vmatpush3.bf16.msra.mxu1 %v1294_v39 }
 0x14b   : > { %1643 = vmatmul.mubr.msk.bf16.vlgmr.msra.gmra.mrb[32].mxu1 %vm423_vm4, %v1271_v38 }
 0x1da   : > { %v471_v12 = vpop.f32.mrb[0].mxu0  ;;  %v512_v40 = vpop.f32.mrb[0].mxu1 }
 0x1db   : > { %v473_v41 = vpop.f32.mrb[1].mxu0  ;;  %v1596_v42 = vpop.f32.mrb[1].mxu1 }
 0x1dc   : > { %v475_v43 = vpop.f32.mrb[2].mxu0  ;;  %v515_v44 = vpop.f32.mrb[2].mxu1 }
 0x1dd   : > { %v476_v45 = vpop.f32.mrb[3].mxu0  ;;  %v1597_v46 = vpop.f32.mrb[3].mxu1 }
 0x1e2   : > { %v563_v47 = vpop.f32.mrb[4].mxu0  ;;  %v604_v8 = vpop.f32.mrb[4].mxu1 }
 0x1e3   : > { %v564_v48 = vadd.f32 %v563_v47, %v471_v12  ;;  %v565_v49 = vpop.f32.mrb[5].mxu0  ;;  %v605_v50 = vadd.f32 %v604_v8, %v512_v40  ;;  %v1602_v53 = vpop.f32.mrb[5].mxu1  ;;  %v1391_v47 = vlaneseq }
 0x1e4   : > { %v566_v51 = vadd.f32 %v565_v49, %v473_v41  ;;  %v567_v52 = vpop.f32.mrb[6].mxu0  ;;  %v607_v55 = vpop.f32.mrb[6].mxu1 }
 0x1e5   : > { %v568_v54 = vpop.f32.mrb[7].mxu0  ;;  %v1603_v56 = vpop.f32.mrb[7].mxu1  ;;  %v1392_v52 = vshrl.u32 %v1391_v47, 7 }
 0x1ea   : > { %v670_v57 = vpop.f32.mrb[8].mxu0 }
 0x1eb   : > { %v717_v58 = vadd.f32 %v670_v57, %v564_v48  ;;  %v672_v59 = vpop.f32.mrb[9].mxu0 }
 0x1ec   : > { %v718_v60 = vadd.f32 %v672_v59, %v566_v51  ;;  %v674_v61 = vpop.f32.mrb[10].mxu0  ;;  %v1393_v59 = vsub.s32 0, %v1392_v52 }
 0x1ed   : > { %v675_v62 = vpop.f32.mrb[11].mxu0  ;;  %v1389_v61 = vld [vmem:[%s356_s18] sm:$0x7] }
 0x1ee   : > { %v711_v63 = vpop.f32.mrb[8].mxu1  ;;  %v1397_v62 = vsub.s32 1, %v1392_v52 }
 0x1ef   : > { %v719_v0 = vadd.f32 %v711_v63, %v605_v50  ;;  %v1608_v1 = vpop.f32.mrb[9].mxu1 }
 0x1f0   : > { %v714_v2 = vpop.f32.mrb[10].mxu1  ;;  %v1384_v1 = vpop.permute.xlu1 %1383 }
 0x1f1   : > { %v1609_v3 = vpop.f32.mrb[11].mxu1 }
 0x1f2   : > { %v780_v4 = vpop.f32.mrb[12].mxu0 }
 0x1f3   : > { %v827_v5 = vadd.f32 %v780_v4, %v717_v58  ;;  %v782_v6 = vpop.f32.mrb[13].mxu0  ;;  %v1394_v4 = vrot.slane %v1389_v61, %v1393_v59 }
 0x1f4   : > { %v828_v7 = vadd.f32 %v782_v6, %v718_v60  ;;  %v784_v9 = vpop.f32.mrb[14].mxu0 }
 0x1f5   : > { %v785_v10 = vpop.f32.mrb[15].mxu0 }
 0x1f6   : > { %v821_v11 = vpop.f32.mrb[12].mxu1 }
 0x1f7   : > { %v829_v13 = vadd.f32 %v821_v11, %v719_v0  ;;  %v1614_v14 = vpop.f32.mrb[13].mxu1 }
 0x1f8   : > { %v824_v15 = vpop.f32.mrb[14].mxu1 }
 0x1f9   : > { %v1615_v16 = vpop.f32.mrb[15].mxu1 }
 0x1fa   : > { %v890_v17 = vpop.f32.mrb[16].mxu0 }
 0x1fb   : > { %v937_v18 = vadd.f32 %v890_v17, %v827_v5  ;;  %v892_v19 = vpop.f32.mrb[17].mxu0  ;;  %v1401_v5 = vsub.s32 2, %v1392_v52 }
 0x1fc   : > { %v938_v20 = vadd.f32 %v892_v19, %v828_v7  ;;  %v894_v21 = vpop.f32.mrb[18].mxu0  ;;  %v1398_v7 = vrot.slane %v1389_v61, %v1397_v62 }
 0x1fd   : > { %v895_v22 = vpop.f32.mrb[19].mxu0  ;;  %v1402_v17 = vrot.slane %v1389_v61, %v1401_v5 }
 0x1fe   : > { %v931_v23 = vpop.f32.mrb[16].mxu1 }
 0x1ff   : > { %v939_v24 = vadd.f32 %v931_v23, %v829_v13  ;;  %v1620_v25 = vpop.f32.mrb[17].mxu1 }
 0x200   : > { %v934_v26 = vpop.f32.mrb[18].mxu1 }
 0x201   : > { %v1621_v27 = vpop.f32.mrb[19].mxu1 }
 0x202   : > { %v1000_v28 = vpop.f32.mrb[20].mxu0 }
 0x203   : > { %v1047_v29 = vadd.f32 %v1000_v28, %v937_v18  ;;  %v1002_v30 = vpop.f32.mrb[21].mxu0 }
 0x204   : > { %v1048_v31 = vadd.f32 %v1002_v30, %v938_v20  ;;  %v1004_v32 = vpop.f32.mrb[22].mxu0 }
 0x205   : > { %v1005_v33 = vpop.f32.mrb[23].mxu0 }
 0x206   : > { %v1041_v34 = vpop.f32.mrb[20].mxu1 }
 0x207   : > { %v1049_v35 = vadd.f32 %v1041_v34, %v939_v24  ;;  %v1626_v36 = vpop.f32.mrb[21].mxu1 }
 0x208   : > { %v1044_v37 = vpop.f32.mrb[22].mxu1 }
 0x209   : > { %v1627_v38 = vpop.f32.mrb[23].mxu1 }
 0x20a   : > { %v1110_v39 = vpop.f32.mrb[24].mxu0 }
 0x20b   : > { %v1157_v12 = vadd.f32 %v1110_v39, %v1047_v29  ;;  %v1112_v40 = vpop.f32.mrb[25].mxu0 }
 0x20c   : > { %v1158_v41 = vadd.f32 %v1112_v40, %v1048_v31  ;;  %v1114_v42 = vpop.f32.mrb[26].mxu0 }
 0x20d   : > { %v1115_v43 = vpop.f32.mrb[27].mxu0 }
 0x20e   : > { %v1151_v44 = vpop.f32.mrb[24].mxu1 }
 0x20f   : > { %v1159_v45 = vadd.f32 %v1151_v44, %v1049_v35  ;;  %v1632_v46 = vpop.f32.mrb[25].mxu1 }
 0x210   : > { %v1154_v48 = vpop.f32.mrb[26].mxu1 }
 0x211   : > { %v1633_v8 = vpop.f32.mrb[27].mxu1 }
 0x212   : > { %v1220_v49 = vpop.f32.mrb[28].mxu0 }
 0x213   : > { %v1267_v50 = vadd.f32 %v1220_v49, %v1157_v12  ;;  %v1222_v51 = vpop.f32.mrb[29].mxu0 }
 0x214   : > { %v1268_v53 = vadd.f32 %v1222_v51, %v1158_v41  ;;  %v1224_v54 = vpop.f32.mrb[30].mxu0 }
 0x215   : > { %v1225_v55 = vpop.f32.mrb[31].mxu0 }
 0x216   : > { %v1261_v56 = vpop.f32.mrb[28].mxu1 }
 0x217   : > { %v1269_v57 = vadd.f32 %v1261_v56, %v1159_v45  ;;  %v1638_v58 = vpop.f32.mrb[29].mxu1 }
 0x218   : > { %v1264_v60 = vpop.f32.mrb[30].mxu1 }
 0x219   : > { %v1639_v63 = vpop.f32.mrb[31].mxu1 }
 0x21a   : > { %v1330_v0 = vpop.f32.mrb[32].mxu0 }
 0x21b   : > { %v1377_v2 = vadd.f32 %v1330_v0, %v1267_v50  ;;  %v1332_v3 = vpop.f32.mrb[33].mxu0 }
 0x21c   : > { %v1378_v6 = vadd.f32 %v1332_v3, %v1268_v53  ;;  %v1334_v9 = vpop.f32.mrb[34].mxu0 }
 0x21d   : > { %v1386_v10 = vadd.f32 %v1384_v1, %v1377_v2  ;;  %v1335_v11 = vpop.f32.mrb[35].mxu0 }
 0x21e   : > { %v1387_v13 = vadd.f32 %v1384_v1, %v1378_v6  ;;  %v1371_v14 = vpop.f32.mrb[32].mxu1 }
 0x21f   : > { %v1406_v15 = vmul.f32 %v1394_v4, %v1386_v10  ;;  %v1379_v16 = vadd.f32 %v1371_v14, %v1269_v57  ;;  %v1644_v18 = vpop.f32.mrb[33].mxu1 }
 0x220   : > { %v1407_v19 = vmul.f32 %v1398_v7, %v1387_v13  ;;  %v1374_v20 = vpop.f32.mrb[34].mxu1 }
 0x221   : > { %v1388_v21 = vadd.f32 %v1384_v1, %v1379_v16  ;;  %v1645_v22 = vpop.f32.mrb[35].mxu1 }
 0x222   : > { %v1572_v23 = vpack.c.bf16 %v1407_v19, %v1406_v15 }
 0x223   : > { %v1408_v24 = vmul.f32 %v1402_v17, %v1388_v21 }
 0x224   : > { %1422 = vst [vmem:[%s362_s22] sm:$0xff] %v1572_v23 }
 0x225   : > { %v1573_v25 = vpack.c.bf16 %v1408_v24, %v1408_v24 }
 0x227   : > { %1423 = vst [vmem:[%s362_s22 + $0x8] sm:$0xf] %v1573_v25 }
 0x228 PF: > { %s16_s21 = sadd.s32 1, %s1688_s21  }
 0x229   : > { %p13_p7 = scmp.ge.s32.totalorder %s16_s21, 4  }
 0x22b   :  { %15 = sbr.rel (!%p13_p7) target bundleno = 1 (0x1), region = 83 }

// kernel: dgg_forward.18
= control target key start
LH: loop header
LB: loop body
LE: loop exit
PB: predicated region body
PF: predicated region fallthrough
CT: control target
= control target key end

     0   :  { %s1820_s24 = smov 0   ;;  %s2018_s0 = inlined_call_operand.vmem [shape: bf16[8,768], index: 0, kind: input, shape index: {}, may-alias: {0,1,2}]   ;;  %s2019_s1 = inlined_call_operand.vmem [shape: bf16[8,768], index: 1, kind: input, shape index: {}, may-alias: {0,1,2}]   ;;  %s2020_s2 = inlined_call_operand.vmem [shape: bf16[8,768], index: 2, kind: input, shape index: {}, may-alias: {0,1,2}]   ;;  %s2021_s3 = inlined_call_operand.vmem [shape: bf16[8,72], index: 3, kind: input, shape index: {}]   ;;  %s2022_s4 = inlined_call_operand.vmem [shape: f32[8,1], index: 4, kind: input, shape index: {}]   ;;  %s2023_s5 = inlined_call_operand.vmem [shape: f32[1,768], index: 5, kind: input, shape index: {}]   ;;  %s2024_s6 = inlined_call_operand.vmem [shape: bf16[8,768], index: 6, kind: input, shape index: {}]   ;;  %s2025_s7 = inlined_call_operand.vmem [shape: bf16[8,768], index: 7, kind: output, shape index: {}]  }
   0x1 LB: > { %s1582_s25 = sadd.s32 4294967295, %s1758_s24   ;;  %p1588_p0 = scmp.ge.s32.totalorder %s1758_s24, 1  ;;  %s1758_s24 = sphi %s1820_s24, %s17_s24  }
   0x2   : > { %p309_p1 = scmp.lt.s32.totalorder %s1758_s24, 3 }
   0x4   : > { %p310_p2 = pnand %p1588_p0, %p309_p1 }
   0x5   : > { %s366_s26 = smul.u32 (!%p310_p2), 3, %s1582_s25  ;;  %s384_s29 = sadd.s32 (!%p310_p2), 1, %s1582_s25  ;;  %v1843_v5 = vld [vmem:[%s2021_s3] sm:$0xf] (!%p310_p2)  ;;  %vm437_vm0 = vcmask (!%p310_p2), 154624   ;;  %v1762_v8 = vmov (!%p310_p2), 0.0  }
   0x6   : > { %313 = sbr.rel (%p310_p2) target bundleno = 554 (0x22a), region = 48  ;;  %s1760_s12 = smov (!%p310_p2), 19   ;;  %v1847_v6 = vcombine.low (!%p310_p2), %v1843_v5, %v1843_v5  ;;  %1662 = vmatprep.subr.bf16.mxu1 (!%p310_p2), %v1762_v8  ;;  %v1764_v12 = vmov (!%p310_p2), 0   ;;  %vm1765_vm1 = vmmov (!%p310_p2), 0   ;;  %v1429_v19 = vld [vmem:[%s2022_s4] sm:$0xff] (!%p310_p2)  ;;  %vm468_vm2 = vcmask (!%p310_p2), 1039360  }
   0x7   : > { %p379_p3 = scmp.lt.s32.totalorder (!%p310_p2), %s366_s26, 5  ;;  %s1589_s27 = sadd.s32 (!%p310_p2), 4294967295, %s366_s26  ;;  %518 = vmatprep.mubr.bf16.mxu0 (!%p310_p2), %v1764_v12  ;;  %1664 = vmatprep.mubr.msk.bf16.mxu1 (!%p310_p2), %vm1765_vm1, %v1762_v8  ;;  %vm476_vm3 = vcmask (!%p310_p2), 1043456   ;;  %vm472_vm4 = vcmask (!%p310_p2), 64512   ;;  %vm669_vm5 = vcmask (!%p310_p2), 1031168   ;;  %vm779_vm6 = vcmask (!%p310_p2), 900096  }
   0x8   : > { %p368_p4 = scmp.gt.s32.totalorder (!%p310_p2), %s1589_s27, 0  ;;  %p1590_p5 = scmp.lt.s32.totalorder (!%p310_p2), %s1589_s27, 5  ;;  %1744 = vset.pattern.permute.xlu1 (!%p310_p2), %v1764_v12  ;;  %1745 = vset.pattern.permute.xlu0 (!%p310_p2), %v1764_v12  ;;  %vm889_vm7 = vcmask (!%p310_p2), 891904   ;;  %vm999_vm8 = vcmask (!%p310_p2), 883712   ;;  %vm1109_vm9 = vcmask (!%p310_p2), 752640   ;;  %vm1219_vm10 = vcmask (!%p310_p2), 744448  }
   0x9   : > { %s385_s10 = smul.u32 (!%p310_p2), 3, %s384_s29  ;;  %s1761_s22 = smov (!%p310_p2), 120   ;;  %vm1329_vm11 = vcmask (!%p310_p2), 736256  }
   0xa   : > { %s1763_s23 = smov (!%p310_p2), 127   ;;  %s1766_s25 = smov (!%p310_p2), 126  }
   0xb   : > { %p386_p6 = scmp.lt.s32.totalorder (!%p310_p2), %s385_s10, 5  ;;  %s1768_s29 = smov (!%p310_p2), 110  }
   0xc   : > { %s1769_s30 = smov (!%p310_p2), 104   ;;  %s1770_s8 = smov (!%p310_p2), 109  }
   0xd   : > { %s2027_s26 = smov (!%p379_p3, %s366_s26), 5  ;;  %s2029_s27 = smov (!%p368_p4, %s1589_s27), 0 }
   0xe   : > { %s1831_s28 = sshll.u32 %s2027_s26, 2  ;;  %s2031_s27 = smov (!%p1590_p5, %s2029_s27), 5 }
   0xf   : > { %s382_s9 = scalar_lea.vmem %s2019_s1, %s1831_s28  ;;  %s1595_s11 = sshll.u32 %s2031_s27, 2 }
  0x10   : > { %v415_v0 = vld [vmem:[%s382_s9] sm:$0xff]  ;;  %v1748_v3 = vld [vmem:[%s382_s9 + $0x8] ss:$0 sps:$4 sm:$0xff]   ;;  %s373_s15 = scalar_lea.vmem %s2018_s0, %s1595_s11  ;;  %s2033_s10 = smov (!%p386_p6, %s385_s10), 5 }
  0x11   : > { %v1605_v1 = vcombine.high %v415_v0, %v415_v0  ;;  %v1604_v2 = vcombine.low %v415_v0, %v415_v0  ;;  %v1749_v4 = vld [vmem:[%s373_s15] ss:$0 sps:$4 sm:$0xff]   ;;  %s2035_s10 = smov (!%p386_p6, %s2033_s10), 5  ;;  %s1767_s27 = smov 112  }
  0x12   : > { %s1600_s18 = sshll.u32 %s2035_s10, 2  ;;  %s1771_s9 = smov 96  }
  0x13   : > { %433 = vrot.lane.b32.xlu1 %v1605_v1, %s1760_s12  ;;  %431 = vrot.lane.b32.xlu0 %v1604_v2, %s1760_s12  ;;  %s391_s21 = scalar_lea.vmem %s2020_s2, %s1600_s18  ;;  %s1772_s10 = smov 108  }
  0x14   : > { %v1750_v7 = vld [vmem:[%s391_s21] ss:$0 sps:$4 sm:$0xff]   ;;  %s1773_s11 = smov 88   ;;  %s1775_s13 = smov 80  }
  0x15   : > { %s1776_s14 = smov 91   ;;  %s1777_s15 = smov 72  }
  0x16   : > { %s1778_s16 = smov 90   ;;  %s1779_s19 = smov 64  }
  0x17   : > { %435 = vrot.lane.b32.xlu1 %v1748_v3, %s1760_s12  ;;  %421 = vrot.lane.b32.xlu0 %v1749_v4, %s1760_s12 }
  0x1b   : > { %456 = vrot.lane.b32.xlu1 %v1847_v6, %s1761_s22  ;;  %443 = vrot.lane.b32.xlu0 %v1750_v7, %s1760_s12  ;;  %s1774_s12 = smov 92   ;;  %s405_s22 = scalar_lea.vmem %s2024_s6, %s1831_s28 }
  0x85   : > { %v434_v9 = vpop.permute.xlu1 %433  ;;  %v432_v10 = vpop.permute.xlu0 %431 }
  0x86   : > { %v1855_v11 = vsel %vm437_vm0, %v432_v10, %v434_v9 }
  0x87   : > { %462 = vrot.lane.b32.xlu0 %v1855_v11, %s1763_s23 }
  0x89   : > { %v436_v13 = vpop.permute.xlu1 %435  ;;  %v422_v14 = vpop.permute.xlu0 %421 }
  0x8a   : > { %v1864_v15 = vsel %vm437_vm0, %v434_v9, %v436_v13  ;;  %v1869_v16 = vsel %vm437_vm0, %v422_v14, %v432_v10 }
  0x8b   : > { %464 = vrot.lane.b32.xlu1 %v1864_v15, %s1763_s23  ;;  %665 = vrot.lane.b32.xlu0 %v1864_v15, %s1766_s25  ;;  %v570_v33 = vsel %vm476_vm3, %v1869_v16, 0  ;;  %v576_v35 = vsel %vm476_vm3, %v1864_v15, 0 }
  0x8d   : > { %v444_v17 = vpop.permute.xlu0 %443  ;;  %v457_v20 = vpop.permute.xlu1 %456 }
  0x8e   : > { %v451_v18 = vsel %vm437_vm0, %v436_v13, %v444_v17 }
  0x8f   : > { %460 = vrot.lane.b32.xlu1 %v1869_v16, %s1763_s23  ;;  %466 = vrot.lane.b32.xlu0 %v451_v18, %s1763_s23 }
  0x93   : > { %663 = vrot.lane.b32.xlu1 %v1855_v11, %s1766_s25  ;;  %659 = vrot.lane.b32.xlu0 %v1847_v6, %s1767_s27  ;;  %s399_s27 = scalar_lea.vmem %s2023_s5, %s2027_s26 }
  0x97   : > { %775 = vrot.lane.b32.xlu1 %v1864_v15, %s1768_s29  ;;  %773 = vrot.lane.b32.xlu0 %v1855_v11, %s1768_s29 }
  0x9b   : > { %769 = vrot.lane.b32.xlu1 %v1847_v6, %s1769_s30  ;;  %885 = vrot.lane.b32.xlu0 %v1864_v15, %s1770_s8  ;;  %s411_s30 = scalar_lea.vmem %s2025_s7, %s1831_s28 }
  0x9f   : > { %883 = vrot.lane.b32.xlu1 %v1855_v11, %s1770_s8  ;;  %661 = vrot.lane.b32.xlu0 %v1869_v16, %s1766_s25 }
  0xa3   : > { %667 = vrot.lane.b32.xlu1 %v451_v18, %s1766_s25  ;;  %879 = vrot.lane.b32.xlu0 %v1847_v6, %s1771_s9 }
  0xa7   : > { %771 = vrot.lane.b32.xlu1 %v1869_v16, %s1768_s29  ;;  %777 = vrot.lane.b32.xlu0 %v451_v18, %s1768_s29 }
  0xab   : > { %995 = vrot.lane.b32.xlu1 %v1864_v15, %s1772_s10  ;;  %993 = vrot.lane.b32.xlu0 %v1855_v11, %s1772_s10 }
  0xaf   : > { %989 = vrot.lane.b32.xlu1 %v1847_v6, %s1773_s11  ;;  %881 = vrot.lane.b32.xlu0 %v1869_v16, %s1770_s8 }
  0xb3   : > { %887 = vrot.lane.b32.xlu1 %v451_v18, %s1770_s8  ;;  %1105 = vrot.lane.b32.xlu0 %v1864_v15, %s1774_s12 }
  0xb7   : > { %991 = vrot.lane.b32.xlu1 %v1869_v16, %s1772_s10  ;;  %997 = vrot.lane.b32.xlu0 %v451_v18, %s1772_s10 }
  0xbb   : > { %1103 = vrot.lane.b32.xlu1 %v1855_v11, %s1774_s12  ;;  %1099 = vrot.lane.b32.xlu0 %v1847_v6, %s1775_s13 }
  0xbf   : > { %1215 = vrot.lane.b32.xlu1 %v1864_v15, %s1776_s14  ;;  %1101 = vrot.lane.b32.xlu0 %v1869_v16, %s1774_s12 }
  0xc3   : > { %1107 = vrot.lane.b32.xlu1 %v451_v18, %s1774_s12  ;;  %1213 = vrot.lane.b32.xlu0 %v1855_v11, %s1776_s14 }
  0xc7   : > { %1211 = vrot.lane.b32.xlu1 %v1869_v16, %s1776_s14  ;;  %1217 = vrot.lane.b32.xlu0 %v451_v18, %s1776_s14 }
  0xcb   : > { %1209 = vrot.lane.b32.xlu1 %v1847_v6, %s1777_s15  ;;  %1321 = vrot.lane.b32.xlu0 %v1869_v16, %s1778_s16 }
  0xcf   : > { %1323 = vrot.lane.b32.xlu1 %v1855_v11, %s1778_s16  ;;  %1325 = vrot.lane.b32.xlu0 %v1864_v15, %s1778_s16 }
  0xd3   : > { %1327 = vrot.lane.b32.xlu1 %v451_v18, %s1778_s16  ;;  %1319 = vrot.lane.b32.xlu0 %v1847_v6, %s1779_s19 }
  0xd7   : > { %1432 = vperm.xlu1 %1744, %v1429_v19  }
  0xf9   : > { %v463_v21 = vpop.permute.xlu0 %462 }
  0xfd   : > { %v465_v22 = vpop.permute.xlu1 %464  ;;  %v666_v23 = vpop.permute.xlu0 %665 }
  0xfe   : > { %v470_v24 = vsel %vm468_vm2, %v463_v21, %v465_v22 }
  0xff   : > { %1609 = vmatprep.subr.msk.bf16.mxu0 %vm476_vm3, %v470_v24 }
 0x101   : > { %v461_v25 = vpop.permute.xlu1 %460  ;;  %v467_v27 = vpop.permute.xlu0 %466 }
 0x102   : > { %v469_v26 = vsel %vm468_vm2, %v461_v25, %v463_v21  ;;  %v471_v29 = vsel %vm468_vm2, %v465_v22, %v467_v27 }
 0x103   : > { %v478_v28 = vsel %vm476_vm3, %v469_v26, 0  ;;  %v484_v30 = vsel %vm476_vm3, %v471_v29, 0 }
 0x104   : > { %487 = vmatpush1.bf16.msra.mxu0 %v478_v28  ;;  %1663 = vmatpush3.bf16.msra.mxu1 %v484_v30 }
 0x105   : > { %v664_v31 = vpop.permute.xlu1 %663  ;;  %1612 = vmatprep.subr.msk.bf16.mxu0 %vm476_vm3, %v1855_v11  ;;  %v660_v32 = vpop.permute.xlu0 %659  ;;  %1668 = vmatprep.subr.bf16.mxu1 %v1762_v8 }
 0x106   : > { %v671_v34 = vsel %vm669_vm5, %v664_v31, %v666_v23 }
 0x107   : > { %1610 = vmatmul.mubr.msk.bf16.vlgmr.msra.gmra.mrb[0].mxu0 %vm472_vm4, %v457_v20  ;;  %1665 = vmatmul.mubr.msk.bf16.vlgmr.msra.gmra.mrb[0].mxu1 %vm472_vm4, %v457_v20 }
 0x108   : > { %579 = vmatpush1.bf16.msra.mxu0 %v570_v33  ;;  %610 = vmatprep.mubr.bf16.mxu0 %v1764_v12 }
 0x109   : > { %v776_v36 = vpop.permute.xlu1 %775  ;;  %1615 = vmatprep.subr.msk.bf16.mxu0 %vm476_vm3, %v671_v34  ;;  %1669 = vmatpush3.bf16.msra.mxu1 %v576_v35  ;;  %v774_v37 = vpop.permute.xlu0 %773 }
 0x10a   : > { %1670 = vmatprep.mubr.msk.bf16.mxu1 %vm1765_vm1, %v1762_v8  ;;  %1674 = vmatprep.subr.bf16.mxu1 %v1762_v8  ;;  %v781_v45 = vsel %vm779_vm6, %v774_v37, %v776_v36 }
 0x10d   : > { %v770_v38 = vpop.permute.xlu1 %769  ;;  %v886_v39 = vpop.permute.xlu0 %885 }
 0x10f   : > { %1613 = vmatmul.mubr.msk.bf16.vlgmr.msra.gmra.mrb[4].mxu0 %vm472_vm4, %v1843_v5  ;;  %1671 = vmatmul.mubr.msk.bf16.vlgmr.msra.gmra.mrb[4].mxu1 %vm472_vm4, %v1843_v5 }
 0x110   : > { %717 = vmatprep.mubr.bf16.mxu0 %v1764_v12  ;;  %1676 = vmatprep.mubr.msk.bf16.mxu1 %vm1765_vm1, %v1762_v8 }
 0x111   : > { %v884_v40 = vpop.permute.xlu1 %883  ;;  %v662_v41 = vpop.permute.xlu0 %661 }
 0x112   : > { %v670_v42 = vsel %vm669_vm5, %v662_v41, %v664_v31  ;;  %v891_v53 = vsel %vm889_vm7, %v884_v40, %v886_v39 }
 0x113   : > { %v677_v43 = vsel %vm476_vm3, %v670_v42, 0 }
 0x114   : > { %686 = vmatpush1.bf16.msra.mxu0 %v677_v43 }
 0x115   : > { %v668_v44 = vpop.permute.xlu1 %667  ;;  %1618 = vmatprep.subr.msk.bf16.mxu0 %vm476_vm3, %v781_v45  ;;  %v880_v48 = vpop.permute.xlu0 %879 }
 0x116   : > { %v672_v46 = vsel %vm669_vm5, %v666_v23, %v668_v44 }
 0x117   : > { %v683_v47 = vsel %vm476_vm3, %v672_v46, 0  ;;  %1616 = vmatmul.mubr.msk.bf16.vlgmr.msra.gmra.mrb[8].mxu0 %vm472_vm4, %v660_v32 }
 0x118   : > { %1675 = vmatpush3.bf16.msra.mxu1 %v683_v47  ;;  %827 = vmatprep.mubr.bf16.mxu0 %v1764_v12 }
 0x119   : > { %v772_v49 = vpop.permute.xlu1 %771  ;;  %1680 = vmatprep.subr.bf16.mxu1 %v1762_v8  ;;  %v778_v52 = vpop.permute.xlu0 %777 }
 0x11a   : > { %v780_v50 = vsel %vm779_vm6, %v772_v49, %v774_v37  ;;  %v782_v54 = vsel %vm779_vm6, %v776_v36, %v778_v52 }
 0x11b   : > { %v787_v51 = vsel %vm476_vm3, %v780_v50, 0  ;;  %1677 = vmatmul.mubr.msk.bf16.vlgmr.msra.gmra.mrb[8].mxu1 %vm472_vm4, %v660_v32  ;;  %v793_v55 = vsel %vm476_vm3, %v782_v54, 0 }
 0x11c   : > { %796 = vmatpush1.bf16.msra.mxu0 %v787_v51  ;;  %1682 = vmatprep.mubr.msk.bf16.mxu1 %vm1765_vm1, %v1762_v8 }
 0x11d   : > { %v996_v56 = vpop.permute.xlu1 %995  ;;  %1621 = vmatprep.subr.msk.bf16.mxu0 %vm476_vm3, %v891_v53  ;;  %1681 = vmatpush3.bf16.msra.mxu1 %v793_v55  ;;  %v994_v57 = vpop.permute.xlu0 %993 }
 0x11e   : > { %1686 = vmatprep.subr.bf16.mxu1 %v1762_v8  ;;  %v1001_v63 = vsel %vm999_vm8, %v994_v57, %v996_v56 }
 0x11f   : > { %1619 = vmatmul.mubr.msk.bf16.vlgmr.msra.gmra.mrb[12].mxu0 %vm472_vm4, %v770_v38 }
 0x120   : > { %937 = vmatprep.mubr.bf16.mxu0 %v1764_v12 }
 0x121   : > { %v990_v58 = vpop.permute.xlu1 %989  ;;  %v882_v59 = vpop.permute.xlu0 %881 }
 0x122   : > { %v890_v60 = vsel %vm889_vm7, %v882_v59, %v884_v40 }
 0x123   : > { %1683 = vmatmul.mubr.msk.bf16.vlgmr.msra.gmra.mrb[12].mxu1 %vm472_vm4, %v770_v38  ;;  %v897_v61 = vsel %vm476_vm3, %v890_v60, 0 }
 0x124   : > { %1688 = vmatprep.mubr.msk.bf16.mxu1 %vm1765_vm1, %v1762_v8  ;;  %906 = vmatpush1.bf16.msra.mxu0 %v897_v61 }
 0x125   : > { %v888_v62 = vpop.permute.xlu1 %887  ;;  %1624 = vmatprep.subr.msk.bf16.mxu0 %vm476_vm3, %v1001_v63  ;;  %v1106_v2 = vpop.permute.xlu0 %1105 }
 0x126   : > { %v892_v0 = vsel %vm889_vm7, %v886_v39, %v888_v62 }
 0x127   : > { %v903_v1 = vsel %vm476_vm3, %v892_v0, 0  ;;  %1622 = vmatmul.mubr.msk.bf16.vlgmr.msra.gmra.mrb[16].mxu0 %vm472_vm4, %v880_v48 }
 0x128   : > { %1687 = vmatpush3.bf16.msra.mxu1 %v903_v1  ;;  %1047 = vmatprep.mubr.bf16.mxu0 %v1764_v12 }
 0x129   : > { %v992_v3 = vpop.permute.xlu1 %991  ;;  %1692 = vmatprep.subr.bf16.mxu1 %v1762_v8  ;;  %v998_v6 = vpop.permute.xlu0 %997 }
 0x12a   : > { %v1000_v4 = vsel %vm999_vm8, %v992_v3, %v994_v57  ;;  %v1002_v7 = vsel %vm999_vm8, %v996_v56, %v998_v6 }
 0x12b   : > { %v1007_v5 = vsel %vm476_vm3, %v1000_v4, 0  ;;  %1689 = vmatmul.mubr.msk.bf16.vlgmr.msra.gmra.mrb[16].mxu1 %vm472_vm4, %v880_v48  ;;  %v1013_v9 = vsel %vm476_vm3, %v1002_v7, 0 }
 0x12c   : > { %1016 = vmatpush1.bf16.msra.mxu0 %v1007_v5  ;;  %1694 = vmatprep.mubr.msk.bf16.mxu1 %vm1765_vm1, %v1762_v8 }
 0x12d   : > { %v1104_v10 = vpop.permute.xlu1 %1103  ;;  %1693 = vmatpush3.bf16.msra.mxu1 %v1013_v9  ;;  %v1100_v13 = vpop.permute.xlu0 %1099 }
 0x12e   : > { %v1111_v11 = vsel %vm1109_vm9, %v1104_v10, %v1106_v2  ;;  %1698 = vmatprep.subr.bf16.mxu1 %v1762_v8 }
 0x12f   : > { %1627 = vmatprep.subr.msk.bf16.mxu0 %vm476_vm3, %v1111_v11  ;;  %1625 = vmatmul.mubr.msk.bf16.vlgmr.msra.gmra.mrb[20].mxu0 %vm472_vm4, %v990_v58 }
 0x130   : > { %1157 = vmatprep.mubr.bf16.mxu0 %v1764_v12 }
 0x131   : > { %v1216_v14 = vpop.permute.xlu1 %1215  ;;  %v1102_v15 = vpop.permute.xlu0 %1101 }
 0x132   : > { %v1110_v16 = vsel %vm1109_vm9, %v1102_v15, %v1104_v10 }
 0x133   : > { %1695 = vmatmul.mubr.msk.bf16.vlgmr.msra.gmra.mrb[20].mxu1 %vm472_vm4, %v990_v58  ;;  %v1117_v17 = vsel %vm476_vm3, %v1110_v16, 0 }
 0x134   : > { %1700 = vmatprep.mubr.msk.bf16.mxu1 %vm1765_vm1, %v1762_v8  ;;  %1126 = vmatpush1.bf16.msra.mxu0 %v1117_v17 }
 0x135   : > { %v1108_v18 = vpop.permute.xlu1 %1107  ;;  %v1214_v21 = vpop.permute.xlu0 %1213 }
 0x136   : > { %v1112_v19 = vsel %vm1109_vm9, %v1106_v2, %v1108_v18  ;;  %v1221_v22 = vsel %vm1219_vm10, %v1214_v21, %v1216_v14 }
 0x137   : > { %v1123_v20 = vsel %vm476_vm3, %v1112_v19, 0  ;;  %1628 = vmatmul.mubr.msk.bf16.vlgmr.msra.gmra.mrb[24].mxu0 %vm472_vm4, %v1100_v13  ;;  %1630 = vmatprep.subr.msk.bf16.mxu0 %vm476_vm3, %v1221_v22 }
 0x138   : > { %1699 = vmatpush3.bf16.msra.mxu1 %v1123_v20  ;;  %1267 = vmatprep.mubr.bf16.mxu0 %v1764_v12 }
 0x139   : > { %v1212_v23 = vpop.permute.xlu1 %1211  ;;  %1704 = vmatprep.subr.bf16.mxu1 %v1762_v8  ;;  %v1218_v26 = vpop.permute.xlu0 %1217 }
 0x13a   : > { %v1220_v24 = vsel %vm1219_vm10, %v1212_v23, %v1214_v21  ;;  %v1222_v27 = vsel %vm1219_vm10, %v1216_v14, %v1218_v26 }
 0x13b   : > { %v1227_v25 = vsel %vm476_vm3, %v1220_v24, 0  ;;  %1701 = vmatmul.mubr.msk.bf16.vlgmr.msra.gmra.mrb[24].mxu1 %vm472_vm4, %v1100_v13  ;;  %v1233_v28 = vsel %vm476_vm3, %v1222_v27, 0 }
 0x13c   : > { %1236 = vmatpush1.bf16.msra.mxu0 %v1227_v25  ;;  %1706 = vmatprep.mubr.msk.bf16.mxu1 %vm1765_vm1, %v1762_v8 }
 0x13d   : > { %v1210_v29 = vpop.permute.xlu1 %1209  ;;  %1705 = vmatpush3.bf16.msra.mxu1 %v1233_v28  ;;  %v1322_v30 = vpop.permute.xlu0 %1321 }
 0x13e   : > { %1710 = vmatprep.subr.bf16.mxu1 %v1762_v8 }
 0x13f   : > { %1631 = vmatmul.mubr.msk.bf16.vlgmr.msra.gmra.mrb[28].mxu0 %vm472_vm4, %v1210_v29 }
 0x140   : > { %1377 = vmatprep.mubr.bf16.mxu0 %v1764_v12 }
 0x141   : > { %v1324_v31 = vpop.permute.xlu1 %1323  ;;  %v1326_v34 = vpop.permute.xlu0 %1325 }
 0x142   : > { %v1330_v32 = vsel %vm1329_vm11, %v1322_v30, %v1324_v31  ;;  %v1331_v35 = vsel %vm1329_vm11, %v1324_v31, %v1326_v34 }
 0x143   : > { %v1337_v33 = vsel %vm476_vm3, %v1330_v32, 0  ;;  %1707 = vmatmul.mubr.msk.bf16.vlgmr.msra.gmra.mrb[28].mxu1 %vm472_vm4, %v1210_v29  ;;  %1633 = vmatprep.subr.msk.bf16.mxu0 %vm476_vm3, %v1331_v35 }
 0x144   : > { %1712 = vmatprep.mubr.msk.bf16.mxu1 %vm1765_vm1, %v1762_v8  ;;  %1346 = vmatpush1.bf16.msra.mxu0 %v1337_v33 }
 0x145   : > { %v1328_v36 = vpop.permute.xlu1 %1327  ;;  %v1320_v39 = vpop.permute.xlu0 %1319 }
 0x146   : > { %v1332_v37 = vsel %vm1329_vm11, %v1326_v34, %v1328_v36 }
 0x147   : > { %v1343_v38 = vsel %vm476_vm3, %v1332_v37, 0  ;;  %1634 = vmatmul.mubr.msk.bf16.vlgmr.msra.gmra.mrb[32].mxu0 %vm472_vm4, %v1320_v39 }
 0x148   : > { %1711 = vmatpush3.bf16.msra.mxu1 %v1343_v38 }
 0x14b   : > { %1713 = vmatmul.mubr.msk.bf16.vlgmr.msra.gmra.mrb[32].mxu1 %vm472_vm4, %v1320_v39 }
 0x1da   : > { %v520_v12 = vpop.f32.mrb[0].mxu0  ;;  %v561_v41 = vpop.f32.mrb[0].mxu1 }
 0x1db   : > { %v522_v40 = vpop.f32.mrb[1].mxu0  ;;  %v1666_v43 = vpop.f32.mrb[1].mxu1 }
 0x1dc   : > { %v524_v42 = vpop.f32.mrb[2].mxu0  ;;  %v564_v8 = vpop.f32.mrb[2].mxu1 }
 0x1dd   : > { %v525_v44 = vpop.f32.mrb[3].mxu0  ;;  %v1667_v45 = vpop.f32.mrb[3].mxu1 }
 0x1e2   : > { %v612_v46 = vpop.f32.mrb[4].mxu0  ;;  %v653_v49 = vpop.f32.mrb[4].mxu1 }
 0x1e3   : > { %v613_v47 = vadd.f32 %v612_v46, %v520_v12  ;;  %v614_v48 = vpop.f32.mrb[5].mxu0  ;;  %v654_v52 = vadd.f32 %v653_v49, %v561_v41  ;;  %v1672_v54 = vpop.f32.mrb[5].mxu1 }
 0x1e4   : > { %v615_v50 = vadd.f32 %v614_v48, %v522_v40  ;;  %v616_v51 = vpop.f32.mrb[6].mxu0  ;;  %v656_v55 = vpop.f32.mrb[6].mxu1  ;;  %v1448_v48 = vlaneseq }
 0x1e5   : > { %v617_v53 = vpop.f32.mrb[7].mxu0  ;;  %v1673_v56 = vpop.f32.mrb[7].mxu1 }
 0x1ea   : > { %v719_v57 = vpop.f32.mrb[8].mxu0 }
 0x1eb   : > { %v766_v58 = vadd.f32 %v719_v57, %v613_v47  ;;  %v721_v59 = vpop.f32.mrb[9].mxu0 }
 0x1ec   : > { %v767_v60 = vadd.f32 %v721_v59, %v615_v50  ;;  %v723_v61 = vpop.f32.mrb[10].mxu0 }
 0x1ed   : > { %v724_v63 = vpop.f32.mrb[11].mxu0  ;;  %v1438_v61 = vld [vmem:[%s405_s22] sm:$0xff] }
 0x1ee   : > { %v760_v62 = vpop.f32.mrb[8].mxu1 }
 0x1ef   : > { %v768_v0 = vadd.f32 %v760_v62, %v654_v52  ;;  %v1678_v1 = vpop.f32.mrb[9].mxu1 }
 0x1f0   : > { %v763_v2 = vpop.f32.mrb[10].mxu1 }
 0x1f1   : > { %v1679_v3 = vpop.f32.mrb[11].mxu1  ;;  %v1433_v2 = vpop.permute.xlu1 %1432 }
 0x1f2   : > { %v829_v4 = vpop.f32.mrb[12].mxu0  ;;  %v1439_v3 = vld [vmem:[%s405_s22 + $0x8] sm:$0xf] }
 0x1f3   : > { %v876_v5 = vadd.f32 %v829_v4, %v766_v58  ;;  %v831_v6 = vpop.f32.mrb[13].mxu0  ;;  %v1449_v58 = vshrl.u32 %v1448_v48, 7 }
 0x1f4   : > { %v877_v7 = vadd.f32 %v831_v6, %v767_v60  ;;  %v833_v9 = vpop.f32.mrb[14].mxu0  ;;  %v1440_v6 = vunpack.c.l.bf16 %v1438_v61 }
 0x1f5   : > { %v834_v11 = vpop.f32.mrb[15].mxu0  ;;  %v1450_v62 = vsub.s32 0, %v1449_v58  ;;  %v1454_v1 = vsub.s32 1, %v1449_v58 }
 0x1f6   : > { %v870_v10 = vpop.f32.mrb[12].mxu1 }
 0x1f7   : > { %v878_v13 = vadd.f32 %v870_v10, %v768_v0  ;;  %v1684_v14 = vpop.f32.mrb[13].mxu1  ;;  %v1446_v0 = vld [vmem:[%s399_s27] sm:$0x7]  ;;  %v1441_v10 = vunpack.c.h.bf16 %v1438_v61 }
 0x1f8   : > { %v873_v15 = vpop.f32.mrb[14].mxu1  ;;  %v1451_v14 = vrot.slane %v1446_v0, %v1450_v62 }
 0x1f9   : > { %v1685_v16 = vpop.f32.mrb[15].mxu1 }
 0x1fa   : > { %v939_v17 = vpop.f32.mrb[16].mxu0 }
 0x1fb   : > { %v986_v18 = vadd.f32 %v939_v17, %v876_v5  ;;  %v941_v19 = vpop.f32.mrb[17].mxu0  ;;  %v1442_v17 = vunpack.c.l.bf16 %v1439_v3 }
 0x1fc   : > { %v987_v20 = vadd.f32 %v941_v19, %v877_v7  ;;  %v943_v21 = vpop.f32.mrb[18].mxu0  ;;  %v1458_v7 = vsub.s32 2, %v1449_v58 }
 0x1fd   : > { %v944_v23 = vpop.f32.mrb[19].mxu0 }
 0x1fe   : > { %v980_v22 = vpop.f32.mrb[16].mxu1 }
 0x1ff   : > { %v988_v24 = vadd.f32 %v980_v22, %v878_v13  ;;  %v1690_v25 = vpop.f32.mrb[17].mxu1 }
 0x200   : > { %v983_v26 = vpop.f32.mrb[18].mxu1  ;;  %v1459_v25 = vrot.slane %v1446_v0, %v1458_v7 }
 0x201   : > { %v1691_v27 = vpop.f32.mrb[19].mxu1 }
 0x202   : > { %v1049_v28 = vpop.f32.mrb[20].mxu0 }
 0x203   : > { %v1096_v29 = vadd.f32 %v1049_v28, %v986_v18  ;;  %v1051_v30 = vpop.f32.mrb[21].mxu0 }
 0x204   : > { %v1097_v31 = vadd.f32 %v1051_v30, %v987_v20  ;;  %v1053_v32 = vpop.f32.mrb[22].mxu0  ;;  %v1455_v20 = vrot.slane %v1446_v0, %v1454_v1 }
 0x205   : > { %v1054_v34 = vpop.f32.mrb[23].mxu0 }
 0x206   : > { %v1090_v33 = vpop.f32.mrb[20].mxu1 }
 0x207   : > { %v1098_v35 = vadd.f32 %v1090_v33, %v988_v24  ;;  %v1696_v36 = vpop.f32.mrb[21].mxu1 }
 0x208   : > { %v1093_v37 = vpop.f32.mrb[22].mxu1 }
 0x209   : > { %v1697_v38 = vpop.f32.mrb[23].mxu1 }
 0x20a   : > { %v1159_v39 = vpop.f32.mrb[24].mxu0 }
 0x20b   : > { %v1206_v12 = vadd.f32 %v1159_v39, %v1096_v29  ;;  %v1161_v40 = vpop.f32.mrb[25].mxu0 }
 0x20c   : > { %v1207_v41 = vadd.f32 %v1161_v40, %v1097_v31  ;;  %v1163_v42 = vpop.f32.mrb[26].mxu0 }
 0x20d   : > { %v1164_v44 = vpop.f32.mrb[27].mxu0 }
 0x20e   : > { %v1200_v43 = vpop.f32.mrb[24].mxu1 }
 0x20f   : > { %v1208_v8 = vadd.f32 %v1200_v43, %v1098_v35  ;;  %v1702_v45 = vpop.f32.mrb[25].mxu1 }
 0x210   : > { %v1203_v46 = vpop.f32.mrb[26].mxu1 }
 0x211   : > { %v1703_v47 = vpop.f32.mrb[27].mxu1 }
 0x212   : > { %v1269_v49 = vpop.f32.mrb[28].mxu0 }
 0x213   : > { %v1316_v50 = vadd.f32 %v1269_v49, %v1206_v12  ;;  %v1271_v51 = vpop.f32.mrb[29].mxu0 }
 0x214   : > { %v1317_v52 = vadd.f32 %v1271_v51, %v1207_v41  ;;  %v1273_v53 = vpop.f32.mrb[30].mxu0 }
 0x215   : > { %v1274_v55 = vpop.f32.mrb[31].mxu0 }
 0x216   : > { %v1310_v54 = vpop.f32.mrb[28].mxu1 }
 0x217   : > { %v1318_v56 = vadd.f32 %v1310_v54, %v1208_v8  ;;  %v1708_v57 = vpop.f32.mrb[29].mxu1 }
 0x218   : > { %v1313_v59 = vpop.f32.mrb[30].mxu1 }
 0x219   : > { %v1709_v60 = vpop.f32.mrb[31].mxu1 }
 0x21a   : > { %v1379_v63 = vpop.f32.mrb[32].mxu0 }
 0x21b   : > { %v1426_v4 = vadd.f32 %v1379_v63, %v1316_v50  ;;  %v1381_v5 = vpop.f32.mrb[33].mxu0 }
 0x21c   : > { %v1427_v9 = vadd.f32 %v1381_v5, %v1317_v52  ;;  %v1383_v13 = vpop.f32.mrb[34].mxu0 }
 0x21d   : > { %v1435_v15 = vadd.f32 %v1433_v2, %v1426_v4  ;;  %v1384_v19 = vpop.f32.mrb[35].mxu0 }
 0x21e   : > { %v1420_v11 = vpop.f32.mrb[32].mxu1  ;;  %v1436_v21 = vadd.f32 %v1433_v2, %v1427_v9 }
 0x21f   : > { %v1428_v16 = vadd.f32 %v1420_v11, %v1318_v56  ;;  %v1714_v18 = vpop.f32.mrb[33].mxu1  ;;  %v1443_v23 = vadd.f32 %v1440_v6, %v1435_v15 }
 0x220   : > { %v1423_v22 = vpop.f32.mrb[34].mxu1  ;;  %v1444_v27 = vadd.f32 %v1441_v10, %v1436_v21 }
 0x221   : > { %v1437_v24 = vadd.f32 %v1433_v2, %v1428_v16  ;;  %v1715_v26 = vpop.f32.mrb[35].mxu1  ;;  %v1463_v28 = vmul.f32 %v1451_v14, %v1443_v23 }
 0x222   : > { %v1464_v30 = vmul.f32 %v1455_v20, %v1444_v27 }
 0x223   : > { %v1445_v29 = vadd.f32 %v1442_v17, %v1437_v24 }
 0x224   : > { %v1642_v32 = vpack.c.bf16 %v1464_v30, %v1463_v28 }
 0x225   : > { %v1465_v31 = vmul.f32 %v1459_v25, %v1445_v29 }
 0x226   : > { %1479 = vst [vmem:[%s411_s30] sm:$0xff] %v1642_v32 }
 0x227   : > { %v1643_v33 = vpack.c.bf16 %v1465_v31, %v1465_v31 }
 0x229   : > { %1480 = vst [vmem:[%s411_s30 + $0x8] sm:$0xf] %v1643_v33 }
 0x22a PF: > { %s17_s24 = sadd.s32 1, %s1758_s24  }
 0x22b   : > { %p14_p7 = scmp.ge.s32.totalorder %s17_s24, 4  }
 0x22d   :  { %16 = sbr.rel (!%p14_p7) target bundleno = 1 (0x1), region = 90 }

</bundles_post_ra>
